<compile_context>
chip_gen: v7x
topology: tpu7x:2x2x1
jax: 0.10.0
libtpu: 0.0.40
codegen_flags: <defaults>
</compile_context>

<pallas_src>
import jax
import jax.numpy as jnp
from jax.experimental import pallas as pl
from jax.experimental.pallas import tpu as pltpu

INPUT_SIZE = 1040
CLASS_NUMBER = 13
HIDDEN = 600
BN_EPS = 1e-5

H_PAD = 640     # 600 -> 640  (128-lane aligned hidden width)
OUT_PAD = 128   # 13  -> 128  (lane-dense padded output)


def _round_up(x, m):
    return (x + m - 1) // m * m


def _cdiv(a, b):
    return -(-a // b)


def mlp_kernel(x_ref,
               w1_ref, t1_ref,
               w2_ref, t2_ref,
               w3_ref, t3_ref,
               w4_ref, b4_ref,
               out_ref):
    # x arrives fp32 straight from HBM (no wrapper pad/cast pass); the bf16
    # cast is VPU work that hides under the MXU.
    x = x_ref[...].astype(jnp.bfloat16)
    # Layer 1: Linear (BN scale pre-folded into W) -> +shift -> ReLU
    h = jnp.dot(x, w1_ref[...], preferred_element_type=jnp.float32)
    h = jnp.maximum(h + t1_ref[...], 0.0).astype(jnp.bfloat16)
    # Layer 2
    h = jnp.dot(h, w2_ref[...], preferred_element_type=jnp.float32)
    h = jnp.maximum(h + t2_ref[...], 0.0).astype(jnp.bfloat16)
    # Layer 3
    h = jnp.dot(h, w3_ref[...], preferred_element_type=jnp.float32)
    h = jnp.maximum(h + t3_ref[...], 0.0).astype(jnp.bfloat16)
    # Output layer: Linear only, lane-dense 128-wide padded output.
    out_ref[...] = jnp.dot(h, w4_ref[...],
                           preferred_element_type=jnp.float32) + b4_ref[...]
    # TODO(synk): training-mode Dropout / batch-statistics BatchNorm not
    # implemented (eval-mode forward semantics reproduced instead).


def _choose_tiling(B, max_tile):
    """Pick (tile_b, num_steps).

    - rows rounded to 16 (bf16 packs 16 rows per sublane group),
    - an even number of grid steps (>= 2) whenever B > 16 so the "parallel"
      batch axis shards evenly across v7x's two TensorCores,
    - tile derived from B so batch-padding waste is < 16 rows per step.
    """
    if B <= 16:
        return _round_up(max(B, 8), 16), 1
    nb = max(2, _cdiv(B, max_tile))
    if nb % 2:
        nb += 1            # even step count -> balanced megacore split
    tile = _round_up(_cdiv(B, nb), 16)
    return tile, nb


def cnn_2d_forward(x, params, max_tile_b=1024):
    """x: (B, 1040) float32. Returns (B, 13) float32 logits."""
    B = x.shape[0]
    tile_b, nb = _choose_tiling(B, max_tile_b)
    B_pad = tile_b * nb

    # Only the batch remainder is padded; no feature-dim pad or dtype-cast
    # pass over x in the wrapper.
    xp = x if B_pad == B else jnp.pad(x, ((0, B_pad - B), (0, 0)))

    def w_spec(shape):
        # Constant index_map: weights/shifts stay VMEM-resident across steps.
        # TODO(synk): pipeline_mode=pl.Buffered(1) would single-buffer these
        # (~3 MiB VMEM saved on v7x) once that path is universally available.
        return pl.BlockSpec(shape, lambda i: (0, 0))

    in_specs = [
        pl.BlockSpec((tile_b, INPUT_SIZE), lambda i: (i, 0)),  # streamed x tile
        w_spec((INPUT_SIZE, H_PAD)), w_spec((1, H_PAD)),
        w_spec((H_PAD, H_PAD)), w_spec((1, H_PAD)),
        w_spec((H_PAD, H_PAD)), w_spec((1, H_PAD)),
        w_spec((H_PAD, OUT_PAD)), w_spec((1, OUT_PAD)),
    ]
    out_spec = pl.BlockSpec((tile_b, OUT_PAD), lambda i: (i, 0))

    out = pl.pallas_call(
        mlp_kernel,
        out_shape=jax.ShapeDtypeStruct((B_pad, OUT_PAD), jnp.float32),
        grid=(nb,),
        in_specs=in_specs,
        out_specs=out_spec,
        compiler_params=pltpu.CompilerParams(
            dimension_semantics=("parallel",),
            allow_input_fusion=[0],      # let XLA fuse the batch pad into x
            vmem_limit_bytes=48 << 20),
    )(xp,
      params["w1"], params["t1"],
      params["w2"], params["t2"],
      params["w3"], params["t3"],
      params["w4"], params["b4"])
    return out[:B, :CLASS_NUMBER]


def init_params(key):
    """PyTorch-shaped init. Linear weights are stored (in, out) so the kernel
    computes x @ W. Eval-mode BatchNorm1d (running_mean=0, running_var=1,
    affine gamma/beta) and the preceding Linear bias are folded: the scale
    goes into the weight columns, the shift stays as a (1, feat) fp32 add.
    Hidden/output dims are zero-padded to 128-aligned shapes; weights bf16."""
    ks = jax.random.split(key, 12)

    def linear(kw, kb, fan_in, fan_out):
        bound = 1.0 / jnp.sqrt(fan_in)
        w = jax.random.uniform(kw, (fan_in, fan_out), jnp.float32, -bound, bound)
        b = jax.random.uniform(kb, (fan_out,), jnp.float32, -bound, bound)
        return w, b

    def bn_fold(kg, kb, w, b, feat):
        gamma = 1.0 + 0.01 * jax.random.normal(kg, (feat,), jnp.float32)
        beta = 0.01 * jax.random.normal(kb, (feat,), jnp.float32)
        running_mean = jnp.zeros((feat,), jnp.float32)
        running_var = jnp.ones((feat,), jnp.float32)
        scale = gamma / jnp.sqrt(running_var + BN_EPS)
        w_folded = w * scale[None, :]                # (x @ W) * s == x @ (W * s)
        shift = (b - running_mean) * scale + beta
        return w_folded, shift

    def pad2(a, rows, cols):
        out = jnp.zeros((rows, cols), a.dtype)
        return out.at[:a.shape[0], :a.shape[1]].set(a)

    w1, b1 = linear(ks[0], ks[1], INPUT_SIZE, HIDDEN)
    w1, t1 = bn_fold(ks[2], ks[3], w1, b1, HIDDEN)
    w2, b2 = linear(ks[4], ks[5], HIDDEN, HIDDEN)
    w2, t2 = bn_fold(ks[6], ks[7], w2, b2, HIDDEN)
    w3, b3 = linear(ks[8], ks[9], HIDDEN, HIDDEN)
    w3, t3 = bn_fold(ks[10], ks[11], w3, b3, HIDDEN)
    kw4, kb4 = jax.random.split(jax.random.fold_in(key, 99))
    w4, b4 = linear(kw4, kb4, HIDDEN, CLASS_NUMBER)

    return dict(
        w1=pad2(w1, INPUT_SIZE, H_PAD).astype(jnp.bfloat16),   # no row padding
        t1=pad2(t1[None, :], 1, H_PAD),
        w2=pad2(w2, H_PAD, H_PAD).astype(jnp.bfloat16),
        t2=pad2(t2[None, :], 1, H_PAD),
        w3=pad2(w3, H_PAD, H_PAD).astype(jnp.bfloat16),
        t3=pad2(t3[None, :], 1, H_PAD),
        w4=pad2(w4, H_PAD, OUT_PAD).astype(jnp.bfloat16),
        b4=pad2(b4[None, :], 1, OUT_PAD),
    )


def reference_forward(x, p):
    """Plain-JAX mirror of the kernel math (bf16 weights/activations,
    fp32 MXU accumulation)."""
    xb = x.astype(jnp.bfloat16)
    h = jnp.dot(xb, p["w1"], preferred_element_type=jnp.float32)
    h = jnp.maximum(h + p["t1"], 0.0).astype(jnp.bfloat16)
    h = jnp.dot(h, p["w2"], preferred_element_type=jnp.float32)
    h = jnp.maximum(h + p["t2"], 0.0).astype(jnp.bfloat16)
    h = jnp.dot(h, p["w3"], preferred_element_type=jnp.float32)
    h = jnp.maximum(h + p["t3"], 0.0).astype(jnp.bfloat16)
    out = jnp.dot(h, p["w4"], preferred_element_type=jnp.float32) + p["b4"]
    return out[:, :CLASS_NUMBER]


if __name__ == "__main__":
    key = jax.random.PRNGKey(0)
    k_x, k_p = jax.random.split(key)
    batch = 8
    x = jax.random.normal(k_x, (batch, INPUT_SIZE), jnp.float32)
    params = init_params(k_p)

    out = cnn_2d_forward(x, params)
    out = jax.block_until_ready(out)

    ref = reference_forward(x, params)
    assert out.shape == (batch, CLASS_NUMBER), out.shape
    max_err = float(jnp.max(jnp.abs(out - ref)))
    assert jnp.allclose(out, ref, atol=1e-2, rtol=1e-2), max_err
    print("KERNEL_OK")
</pallas_src>

<mosaic_0001>
module attributes {stable_mosaic.version = 11 : i64} {
  func.func @mlp_kernel(%arg0: i32, %arg1: memref<16x1040xf32, #tpu.memory_space<vmem>>, %arg2: memref<1040x640xbf16, #tpu.memory_space<vmem>>, %arg3: memref<1x640xf32, #tpu.memory_space<vmem>>, %arg4: memref<640x640xbf16, #tpu.memory_space<vmem>>, %arg5: memref<1x640xf32, #tpu.memory_space<vmem>>, %arg6: memref<640x640xbf16, #tpu.memory_space<vmem>>, %arg7: memref<1x640xf32, #tpu.memory_space<vmem>>, %arg8: memref<640x128xbf16, #tpu.memory_space<vmem>>, %arg9: memref<1x128xf32, #tpu.memory_space<vmem>>, %arg10: memref<16x128xf32, #tpu.memory_space<vmem>>) attributes {dimension_semantics = [#tpu.dimension_semantics<parallel>], iteration_bounds = array<i64: 1>, scalar_prefetch = 0 : i64, scratch_operands = 0 : i64, tpu.core_type = #tpu.core_type<tc>, window_params = [{transform_indices = @transform_0, window_bounds = array<i64: 16, 1040>}, {pipeline_mode = #tpu.pipeline_mode<synchronous>, transform_indices = @transform_1, window_bounds = array<i64: 1040, 640>}, {pipeline_mode = #tpu.pipeline_mode<synchronous>, transform_indices = @transform_2, window_bounds = array<i64: 1, 640>}, {pipeline_mode = #tpu.pipeline_mode<synchronous>, transform_indices = @transform_3, window_bounds = array<i64: 640, 640>}, {pipeline_mode = #tpu.pipeline_mode<synchronous>, transform_indices = @transform_4, window_bounds = array<i64: 1, 640>}, {pipeline_mode = #tpu.pipeline_mode<synchronous>, transform_indices = @transform_5, window_bounds = array<i64: 640, 640>}, {pipeline_mode = #tpu.pipeline_mode<synchronous>, transform_indices = @transform_6, window_bounds = array<i64: 1, 640>}, {pipeline_mode = #tpu.pipeline_mode<synchronous>, transform_indices = @transform_7, window_bounds = array<i64: 640, 128>}, {pipeline_mode = #tpu.pipeline_mode<synchronous>, transform_indices = @transform_8, window_bounds = array<i64: 1, 128>}, {transform_indices = @transform_9, window_bounds = array<i64: 16, 128>}]} {
    %c0 = arith.constant 0 : index
    %c0_0 = arith.constant 0 : index
    %0 = vector.load %arg1[%c0, %c0_0] : memref<16x1040xf32, #tpu.memory_space<vmem>>, vector<16x1040xf32>
    %1 = arith.truncf %0 : vector<16x1040xf32> to vector<16x1040xbf16>
    %c0_1 = arith.constant 0 : index
    %c0_2 = arith.constant 0 : index
    %2 = vector.load %arg2[%c0_1, %c0_2] : memref<1040x640xbf16, #tpu.memory_space<vmem>>, vector<1040x640xbf16>
    %cst = arith.constant dense<0.000000e+00> : vector<16x640xf32>
    %3 = tpu.matmul %1, %2, %cst {dimension_numbers = #tpu.dot_dimension_numbers<[1], [0], [0], [1], [0, 0, 1, 1], [], []>} : vector<16x1040xbf16>, vector<1040x640xbf16>, vector<16x640xf32> -> vector<16x640xf32>
    %c0_3 = arith.constant 0 : index
    %c0_4 = arith.constant 0 : index
    %4 = vector.load %arg3[%c0_3, %c0_4] : memref<1x640xf32, #tpu.memory_space<vmem>>, vector<1x640xf32>
    %5 = vector.broadcast %4 : vector<1x640xf32> to vector<16x640xf32>
    %6 = arith.addf %3, %5 : vector<16x640xf32>
    %cst_5 = arith.constant 0.000000e+00 : f32
    %7 = vector.broadcast %cst_5 : f32 to vector<16x640xf32>
    %8 = arith.maximumf %6, %7 : vector<16x640xf32>
    %9 = arith.truncf %8 : vector<16x640xf32> to vector<16x640xbf16>
    %c0_6 = arith.constant 0 : index
    %c0_7 = arith.constant 0 : index
    %10 = vector.load %arg4[%c0_6, %c0_7] : memref<640x640xbf16, #tpu.memory_space<vmem>>, vector<640x640xbf16>
    %cst_8 = arith.constant dense<0.000000e+00> : vector<16x640xf32>
    %11 = tpu.matmul %9, %10, %cst_8 {dimension_numbers = #tpu.dot_dimension_numbers<[1], [0], [0], [1], [0, 0, 1, 1], [], []>} : vector<16x640xbf16>, vector<640x640xbf16>, vector<16x640xf32> -> vector<16x640xf32>
    %c0_9 = arith.constant 0 : index
    %c0_10 = arith.constant 0 : index
    %12 = vector.load %arg5[%c0_9, %c0_10] : memref<1x640xf32, #tpu.memory_space<vmem>>, vector<1x640xf32>
    %13 = vector.broadcast %12 : vector<1x640xf32> to vector<16x640xf32>
    %14 = arith.addf %11, %13 : vector<16x640xf32>
    %cst_11 = arith.constant 0.000000e+00 : f32
    %15 = vector.broadcast %cst_11 : f32 to vector<16x640xf32>
    %16 = arith.maximumf %14, %15 : vector<16x640xf32>
    %17 = arith.truncf %16 : vector<16x640xf32> to vector<16x640xbf16>
    %c0_12 = arith.constant 0 : index
    %c0_13 = arith.constant 0 : index
    %18 = vector.load %arg6[%c0_12, %c0_13] : memref<640x640xbf16, #tpu.memory_space<vmem>>, vector<640x640xbf16>
    %cst_14 = arith.constant dense<0.000000e+00> : vector<16x640xf32>
    %19 = tpu.matmul %17, %18, %cst_14 {dimension_numbers = #tpu.dot_dimension_numbers<[1], [0], [0], [1], [0, 0, 1, 1], [], []>} : vector<16x640xbf16>, vector<640x640xbf16>, vector<16x640xf32> -> vector<16x640xf32>
    %c0_15 = arith.constant 0 : index
    %c0_16 = arith.constant 0 : index
    %20 = vector.load %arg7[%c0_15, %c0_16] : memref<1x640xf32, #tpu.memory_space<vmem>>, vector<1x640xf32>
    %21 = vector.broadcast %20 : vector<1x640xf32> to vector<16x640xf32>
    %22 = arith.addf %19, %21 : vector<16x640xf32>
    %cst_17 = arith.constant 0.000000e+00 : f32
    %23 = vector.broadcast %cst_17 : f32 to vector<16x640xf32>
    %24 = arith.maximumf %22, %23 : vector<16x640xf32>
    %25 = arith.truncf %24 : vector<16x640xf32> to vector<16x640xbf16>
    %c0_18 = arith.constant 0 : index
    %c0_19 = arith.constant 0 : index
    %26 = vector.load %arg8[%c0_18, %c0_19] : memref<640x128xbf16, #tpu.memory_space<vmem>>, vector<640x128xbf16>
    %cst_20 = arith.constant dense<0.000000e+00> : vector<16x128xf32>
    %27 = tpu.matmul %25, %26, %cst_20 {dimension_numbers = #tpu.dot_dimension_numbers<[1], [0], [0], [1], [0, 0, 1, 1], [], []>} : vector<16x640xbf16>, vector<640x128xbf16>, vector<16x128xf32> -> vector<16x128xf32>
    %c0_21 = arith.constant 0 : index
    %c0_22 = arith.constant 0 : index
    %28 = vector.load %arg9[%c0_21, %c0_22] : memref<1x128xf32, #tpu.memory_space<vmem>>, vector<1x128xf32>
    %29 = vector.broadcast %28 : vector<1x128xf32> to vector<16x128xf32>
    %30 = arith.addf %27, %29 : vector<16x128xf32>
    %c0_23 = arith.constant 0 : index
    %c0_24 = arith.constant 0 : index
    %31 = vector.load %arg10[%c0_23, %c0_24] : memref<16x128xf32, #tpu.memory_space<vmem>>, vector<16x128xf32>
    tpu.vector_store %arg10[%c0_23, %c0_24], %30 {strides = array<i32>} : memref<16x128xf32, #tpu.memory_space<vmem>>, vector<16x128xf32>,
    return
  }
  func.func @transform_0(%arg0: i32) -> (i32, i32) {
    %c0_i32 = arith.constant 0 : i32
    %c0_i32_0 = arith.constant 0 : i32
    return %arg0, %c0_i32 : i32, i32
  }
  func.func @transform_1(%arg0: i32) -> (i32, i32) {
    %c0_i32 = arith.constant 0 : i32
    %c0_i32_0 = arith.constant 0 : i32
    %c0_i32_1 = arith.constant 0 : i32
    return %c0_i32, %c0_i32_0 : i32, i32
  }
  func.func @transform_2(%arg0: i32) -> (i32, i32) {
    %c0_i32 = arith.constant 0 : i32
    %c0_i32_0 = arith.constant 0 : i32
    %c0_i32_1 = arith.constant 0 : i32
    return %c0_i32, %c0_i32_0 : i32, i32
  }
  func.func @transform_3(%arg0: i32) -> (i32, i32) {
    %c0_i32 = arith.constant 0 : i32
    %c0_i32_0 = arith.constant 0 : i32
    %c0_i32_1 = arith.constant 0 : i32
    return %c0_i32, %c0_i32_0 : i32, i32
  }
  func.func @transform_4(%arg0: i32) -> (i32, i32) {
    %c0_i32 = arith.constant 0 : i32
    %c0_i32_0 = arith.constant 0 : i32
    %c0_i32_1 = arith.constant 0 : i32
    return %c0_i32, %c0_i32_0 : i32, i32
  }
  func.func @transform_5(%arg0: i32) -> (i32, i32) {
    %c0_i32 = arith.constant 0 : i32
    %c0_i32_0 = arith.constant 0 : i32
    %c0_i32_1 = arith.constant 0 : i32
    return %c0_i32, %c0_i32_0 : i32, i32
  }
  func.func @transform_6(%arg0: i32) -> (i32, i32) {
    %c0_i32 = arith.constant 0 : i32
    %c0_i32_0 = arith.constant 0 : i32
    %c0_i32_1 = arith.constant 0 : i32
    return %c0_i32, %c0_i32_0 : i32, i32
  }
  func.func @transform_7(%arg0: i32) -> (i32, i32) {
    %c0_i32 = arith.constant 0 : i32
    %c0_i32_0 = arith.constant 0 : i32
    %c0_i32_1 = arith.constant 0 : i32
    return %c0_i32, %c0_i32_0 : i32, i32
  }
  func.func @transform_8(%arg0: i32) -> (i32, i32) {
    %c0_i32 = arith.constant 0 : i32
    %c0_i32_0 = arith.constant 0 : i32
    %c0_i32_1 = arith.constant 0 : i32
    return %c0_i32, %c0_i32_0 : i32, i32
  }
  func.func @transform_9(%arg0: i32) -> (i32, i32) {
    %c0_i32 = arith.constant 0 : i32
    %c0_i32_0 = arith.constant 0 : i32
    return %arg0, %c0_i32 : i32, i32
  }
}

</mosaic_0001>

<bundles_post_ra>
// kernel: tpu_custom_call.1
= control target key start
LH: loop header
LB: loop body
LE: loop exit
PB: predicated region body
PF: predicated region fallthrough
CT: control target
= control target key end

     0   :  { %14 = vsyncpa [#allocation3], 0  ;;  %s9684_s0 = inlined_call_operand.hbm [shape: f32[16,1040], index: 0, kind: input, shape index: {}]   ;;  %s9685_s1 = inlined_call_operand.hbm [shape: bf16[1040,640], index: 1, kind: input, shape index: {}]   ;;  %s9686_s2 = inlined_call_operand.hbm [shape: f32[1,640], index: 2, kind: input, shape index: {}]   ;;  %s9687_s3 = inlined_call_operand.hbm [shape: bf16[640,640], index: 3, kind: input, shape index: {}]   ;;  %s9688_s4 = inlined_call_operand.hbm [shape: f32[1,640], index: 4, kind: input, shape index: {}]   ;;  %s9689_s5 = inlined_call_operand.hbm [shape: bf16[640,640], index: 5, kind: input, shape index: {}]   ;;  %s9690_s6 = inlined_call_operand.hbm [shape: f32[1,640], index: 6, kind: input, shape index: {}]   ;;  %s9691_s7 = inlined_call_operand.hbm [shape: bf16[640,128], index: 7, kind: input, shape index: {}]   ;;  %s9692_s8 = inlined_call_operand.hbm [shape: f32[1,128], index: 8, kind: input, shape index: {}]   ;;  %s9693_s9 = inlined_call_operand.hbm [shape: f32[16,128], index: 9, kind: output, shape index: {}]  }
   0x1   :  { %15 = vsyncpa [#allocation6], 0 }
   0x2   :  { %16 = vsyncpa [#allocation9], 0 }
   0x3   :  { %17 = vsyncpa [#allocation12], 0 }
   0x4   :  { %18 = vsyncpa [#allocation15], 0 }
   0x5   :  { %19 = vsyncpa [#allocation4], 0  ;;  %s9295_s30 = smov [#allocation5]   ;;  %s9063_s13 = scalar_lea.hbm %s9685_s1, 41600 }
   0x6   :  { %s37_s10 = sshll.u32 %s9295_s30, 4  ;;  %p9064_p0 = scmp.ne.s32.totalorder %s9685_s1, %s9063_s13  ;;  %s38_s10 = int_to_ptr.vmem [resolvable:$true] %s37_s10 }
   0x7   :  { %p9067_p1 = scmp.lt.u32.totalorder %s9063_s13, %s9685_s1 }
   0x9   :  { %p9069_p2 = pnand %p9067_p1, %p9064_p0 }
   0xb   :  { %9072 = shalt.err (!%p9069_p2)
}
   0xc   :  { %s9073_s18 = scalar_lea.vmem %s38_s10, 41600  ;;  %p9078_p4 = scmp.lt.s32.totalorder %s38_s10, %s38_s10 }
   0xd   :  { %p9074_p3 = scmp.ne.s32.totalorder %s38_s10, %s9073_s18  ;;  %p9079_p5 = scmp.lt.s32.totalorder %s9073_s18, %s9073_s18 }
   0xf   :  { %p9080_p6 = por %p9079_p5, %p9078_p4 }
  0x11   :  { %p9081_p7 = pnand %p9080_p6, %p9074_p3 }
  0x13   :  { %9084 = shalt.err (!%p9081_p7)
}
  0x14   :  { %s9296_s19 = smov 320   ;;  %s9297_s20 = smov 20  }
  0x15   :  { %43 = dma.hbm_to_vmem [thread:$0]  %s9685_s1, 41600, %s38_s10, [#allocation6], %s9296_s19, %s9296_s19, %s9297_s20  }
  0x16   :  { %s9298_s23 = smov [#allocation8]   ;;  %s9299_s25 = smov [#allocation11]  }
  0x17   :  { %s59_s24 = sshll.u32 %s9298_s23, 4  ;;  %s81_s26 = sshll.u32 %s9299_s25, 4  ;;  %s60_s24 = int_to_ptr.vmem [resolvable:$true] %s59_s24  ;;  %s82_s26 = int_to_ptr.vmem [resolvable:$true] %s81_s26 }
  0x18   :  { %s9085_s29 = scalar_lea.hbm %s9687_s3, 25600 }
  0x19   :  { %p9086_p8 = scmp.ne.s32.totalorder %s9687_s3, %s9085_s29  ;;  %p9089_p9 = scmp.lt.u32.totalorder %s9085_s29, %s9687_s3 }
  0x1b   :  { %p9091_p10 = pnand %p9089_p9, %p9086_p8 }
  0x1d   :  { %9094 = shalt.err (!%p9091_p10)
}
  0x1e   :  { %s9095_s1 = scalar_lea.vmem %s60_s24, 25600  ;;  %p9100_p12 = scmp.lt.s32.totalorder %s60_s24, %s60_s24 }
  0x1f   :  { %p9096_p11 = scmp.ne.s32.totalorder %s60_s24, %s9095_s1  ;;  %p9101_p13 = scmp.lt.s32.totalorder %s9095_s1, %s9095_s1 }
  0x21   :  { %p9102_p0 = por %p9101_p13, %p9100_p12 }
  0x23   :  { %p9103_p1 = pnand %p9102_p0, %p9096_p11 }
  0x25   :  { %9106 = shalt.err (!%p9103_p1)
}
  0x26   :  { %65 = dma.hbm_to_vmem [thread:$0]  %s9687_s3, 25600, %s60_s24, [#allocation9], %s9296_s19, %s9296_s19, %s9297_s20  }
  0x27   :  { %s9107_s17 = scalar_lea.hbm %s9689_s5, 25600 }
  0x28   :  { %p9108_p2 = scmp.ne.s32.totalorder %s9689_s5, %s9107_s17  ;;  %p9111_p3 = scmp.lt.u32.totalorder %s9107_s17, %s9689_s5 }
  0x2a   :  { %p9113_p4 = pnand %p9111_p3, %p9108_p2 }
  0x2c   :  { %9116 = shalt.err (!%p9113_p4)
}
  0x2d   :  { %s9117_s25 = scalar_lea.vmem %s82_s26, 25600  ;;  %p9122_p6 = scmp.lt.s32.totalorder %s82_s26, %s82_s26 }
  0x2e   :  { %p9118_p5 = scmp.ne.s32.totalorder %s82_s26, %s9117_s25  ;;  %p9123_p7 = scmp.lt.s32.totalorder %s9117_s25, %s9117_s25 }
  0x30   :  { %p9124_p8 = por %p9123_p7, %p9122_p6 }
  0x32   :  { %p9125_p9 = pnand %p9124_p8, %p9118_p5 }
  0x34   :  { %9128 = shalt.err (!%p9125_p9)
}
  0x35   :  { %87 = dma.hbm_to_vmem [thread:$0]  %s9689_s5, 25600, %s82_s26, [#allocation12], %s9296_s19, %s9296_s19, %s9297_s20  }
  0x36   :  { %s9300_s27 = smov [#allocation14]   ;;  %s9129_s11 = scalar_lea.hbm %s9691_s7, 5120 }
  0x37   :  { %s103_s28 = sshll.u32 %s9300_s27, 4  ;;  %p9130_p10 = scmp.ne.s32.totalorder %s9691_s7, %s9129_s11  ;;  %s104_s28 = int_to_ptr.vmem [resolvable:$true] %s103_s28 }
  0x38   :  { %p9133_p11 = scmp.lt.u32.totalorder %s9129_s11, %s9691_s7 }
  0x3a   :  { %p9135_p12 = pnand %p9133_p11, %p9130_p10 }
  0x3c   :  { %9138 = shalt.err (!%p9135_p12)
}
  0x3d   :  { %s9139_s14 = scalar_lea.vmem %s104_s28, 5120  ;;  %p9144_p0 = scmp.lt.s32.totalorder %s104_s28, %s104_s28 }
  0x3e   :  { %p9140_p13 = scmp.ne.s32.totalorder %s104_s28, %s9139_s14  ;;  %p9145_p1 = scmp.lt.s32.totalorder %s9139_s14, %s9139_s14 }
  0x40   :  { %p9146_p2 = por %p9145_p1, %p9144_p0 }
  0x42   :  { %p9147_p3 = pnand %p9146_p2, %p9140_p13 }
  0x44   :  { %9150 = shalt.err (!%p9147_p3)
}
  0x45   :  { %s9301_s5 = smov 64   ;;  %s9302_s19 = smov 4  }
  0x46   :  { %109 = dma.hbm_to_vmem [thread:$0]  %s9691_s7, 5120, %s104_s28, [#allocation15], %s9301_s5, %s9301_s5, %s9302_s19  }
  0x47   :  { %s9303_s15 = smov [#allocation2]   ;;  %s9151_s21 = scalar_lea.hbm %s9684_s0, 2304 }
  0x48   :  { %s25_s16 = sshll.u32 %s9303_s15, 4  ;;  %p9152_p4 = scmp.ne.s32.totalorder %s9684_s0, %s9151_s21  ;;  %s26_s16 = int_to_ptr.vmem [resolvable:$true] %s25_s16 }
  0x49   :  { %p9155_p5 = scmp.lt.u32.totalorder %s9151_s21, %s9684_s0 }
  0x4b   :  { %p9157_p6 = pnand %p9155_p5, %p9152_p4 }
  0x4d   :  { %9160 = shalt.err (!%p9157_p6)
}
  0x4e   :  { %s9161_s24 = scalar_lea.vmem %s26_s16, 2304  ;;  %p9166_p8 = scmp.lt.s32.totalorder %s26_s16, %s26_s16 }
  0x4f   :  { %p9162_p7 = scmp.ne.s32.totalorder %s26_s16, %s9161_s24  ;;  %p9167_p9 = scmp.lt.s32.totalorder %s9161_s24, %s9161_s24 }
  0x51   :  { %p9168_p10 = por %p9167_p9, %p9166_p8 }
  0x53   :  { %p9169_p11 = pnand %p9168_p10, %p9162_p7 }
  0x55   :  { %9172 = shalt.err (!%p9169_p11)
}
  0x56   :  { %s9304_s7 = smov 1152   ;;  %s9305_s27 = smov 72  }
  0x57   :  { %31 = dma.hbm_to_vmem [thread:$0]  %s9684_s0, 2304, %s26_s16, [#allocation3], %s9304_s7, %s9304_s7, %s9305_s27  }
  0x58   :  { %s9306_s30 = smov [#allocation7]   ;;  %s9307_s12 = smov [#allocation10]  }
  0x59   :  { %s50_s11 = sshll.u32 %s9306_s30, 4  ;;  %s72_s13 = sshll.u32 %s9307_s12, 4  ;;  %s51_s11 = int_to_ptr.vmem [resolvable:$true] %s50_s11  ;;  %s73_s13 = int_to_ptr.vmem [resolvable:$true] %s72_s13 }
  0x5a   :  { %s9173_s14 = scalar_lea.hbm %s9686_s2, 80 }
  0x5b   :  { %p9174_p12 = scmp.ne.s32.totalorder %s9686_s2, %s9173_s14  ;;  %p9177_p13 = scmp.lt.u32.totalorder %s9173_s14, %s9686_s2 }
  0x5d   :  { %p9179_p0 = pnand %p9177_p13, %p9174_p12 }
  0x5f   :  { %9182 = shalt.err (!%p9179_p0)
}
  0x60   :  { %s9183_s0 = scalar_lea.vmem %s51_s11, 80  ;;  %s9187_s15 = scalar_lea.vmem %s51_s11, 96 }
  0x61   :  { %p9184_p1 = scmp.ne.s32.totalorder %s51_s11, %s9183_s0  ;;  %p9188_p2 = scmp.lt.s32.totalorder %s51_s11, %s51_s11 }
  0x62   :  { %p9189_p3 = scmp.lt.s32.totalorder %s9187_s15, %s9183_s0 }
  0x64   :  { %p9190_p4 = por %p9189_p3, %p9188_p2 }
  0x66   :  { %p9191_p5 = pnand %p9190_p4, %p9184_p1 }
  0x68   :  { %9194 = shalt.err (!%p9191_p5)
}
  0x69   :  { %53 = dma.hbm_to_vmem [thread:$0]  %s9686_s2, 80, %s51_s11, [#allocation6]  }
  0x6a   :  { %s9195_s22 = scalar_lea.hbm %s9688_s4, 80 }
  0x6b   :  { %p9196_p6 = scmp.ne.s32.totalorder %s9688_s4, %s9195_s22  ;;  %p9199_p7 = scmp.lt.u32.totalorder %s9195_s22, %s9688_s4 }
  0x6d   :  { %p9201_p8 = pnand %p9199_p7, %p9196_p6 }
  0x6f   :  { %9204 = shalt.err (!%p9201_p8)
}
  0x70   :  { %s9205_s7 = scalar_lea.vmem %s73_s13, 80  ;;  %s9209_s27 = scalar_lea.vmem %s73_s13, 96 }
  0x71   :  { %p9206_p9 = scmp.ne.s32.totalorder %s73_s13, %s9205_s7  ;;  %p9210_p10 = scmp.lt.s32.totalorder %s73_s13, %s73_s13 }
  0x72   :  { %p9211_p11 = scmp.lt.s32.totalorder %s9209_s27, %s9205_s7 }
  0x74   :  { %p9212_p12 = por %p9211_p11, %p9210_p10 }
  0x76   :  { %p9213_p13 = pnand %p9212_p12, %p9206_p9 }
  0x78   :  { %9216 = shalt.err (!%p9213_p13)
}
  0x79   :  { %75 = dma.hbm_to_vmem [thread:$0]  %s9688_s4, 80, %s73_s13, [#allocation9]  }
  0x7a   :  { %s9308_s29 = smov [#allocation13]   ;;  %s9309_s11 = smov [#allocation16]  }
  0x7b   :  { %s94_s30 = sshll.u32 %s9308_s29, 4  ;;  %s116_s12 = sshll.u32 %s9309_s11, 4  ;;  %s95_s30 = int_to_ptr.vmem [resolvable:$true] %s94_s30  ;;  %s117_s12 = int_to_ptr.vmem [resolvable:$true] %s116_s12 }
  0x7c   :  { %s9217_s14 = scalar_lea.hbm %s9690_s6, 80 }
  0x7d   :  { %p9218_p0 = scmp.ne.s32.totalorder %s9690_s6, %s9217_s14  ;;  %p9221_p1 = scmp.lt.u32.totalorder %s9217_s14, %s9690_s6 }
  0x7f   :  { %p9223_p2 = pnand %p9221_p1, %p9218_p0 }
  0x81   :  { %9226 = shalt.err (!%p9223_p2)
}
  0x82   :  { %s9227_s4 = scalar_lea.vmem %s95_s30, 80  ;;  %s9231_s13 = scalar_lea.vmem %s95_s30, 96 }
  0x83   :  { %p9228_p3 = scmp.ne.s32.totalorder %s95_s30, %s9227_s4  ;;  %p9232_p4 = scmp.lt.s32.totalorder %s95_s30, %s95_s30 }
  0x84   :  { %p9233_p5 = scmp.lt.s32.totalorder %s9231_s13, %s9227_s4 }
  0x86   :  { %p9234_p6 = por %p9233_p5, %p9232_p4 }
  0x88   :  { %p9235_p7 = pnand %p9234_p6, %p9228_p3 }
  0x8a   :  { %9238 = shalt.err (!%p9235_p7)
}
  0x8b   :  { %97 = dma.hbm_to_vmem [thread:$0]  %s9690_s6, 80, %s95_s30, [#allocation12]  }
  0x8c   :  { %s9239_s18 = scalar_lea.hbm %s9692_s8, 16 }
  0x8d   :  { %p9240_p8 = scmp.ne.s32.totalorder %s9692_s8, %s9239_s18  ;;  %p9243_p9 = scmp.lt.u32.totalorder %s9239_s18, %s9692_s8 }
  0x8f   :  { %p9245_p10 = pnand %p9243_p9, %p9240_p8 }
  0x91   :  { %9248 = shalt.err (!%p9245_p10)
}
  0x92   :  { %s9249_s3 = scalar_lea.vmem %s117_s12, 16  ;;  %s9253_s24 = scalar_lea.vmem %s117_s12, 32 }
  0x93   :  { %p9250_p11 = scmp.ne.s32.totalorder %s117_s12, %s9249_s3  ;;  %p9254_p12 = scmp.lt.s32.totalorder %s117_s12, %s117_s12 }
  0x94   :  { %p9255_p13 = scmp.lt.s32.totalorder %s9253_s24, %s9249_s3 }
  0x96   :  { %p9256_p0 = por %p9255_p13, %p9254_p12 }
  0x98   :  { %p9257_p1 = pnand %p9256_p0, %p9250_p11 }
  0x9a   :  { %9260 = shalt.err (!%p9257_p1)
}
  0x9b   :  { %119 = dma.hbm_to_vmem [thread:$0]  %s9692_s8, 16, %s117_s12, [#allocation15]  }
  0x9c   :  { %9283 = dma.done.wait [#allocation3], 2304  }
  0x9d   :  { %9284 = vsyncadd [#allocation3], 4294964992 }
  0x9e   :  { %9285 = dma.done.wait [#allocation6], 41680  }
  0x9f   :  { %9286 = vsyncadd [#allocation6], 4294925616 }
  0xa0   :  { %9287 = dma.done.wait [#allocation9], 25680  }
  0xa1   :  { %9288 = vsyncadd [#allocation9], 4294941616 }
  0xa2   :  { %9289 = dma.done.wait [#allocation12], 25680  }
  0xa3   :  { %9290 = vsyncadd [#allocation12], 4294941616 }
  0xa4   :  { %9291 = dma.done.wait [#allocation15], 5136  }
  0xa5   :  { %9292 = vsyncadd [#allocation15], 4294962160  ;;  %v8008_v0 = vld [vmem:[#allocation5 + $0x4] ss:$20 sps:$4 sm:$0xff]   ;;  %v8010_v1 = vld [vmem:[#allocation5 + $0xc] ss:$20 sps:$4 sm:$0xff]  }
  0xa6   :  { %2286 = vmatprep.subr.bf16.mxu0 %v8008_v0  ;;  %v8012_v2 = vld [vmem:[#allocation5] ss:$20 sps:$4 sm:$0xff]   ;;  %v8013_v3 = vld [vmem:[#allocation5 + $0x8] ss:$20 sps:$4 sm:$0xff]   ;;  %2501 = vmatprep.subr.bf16.mxu1 %v8010_v1  ;;  %v8019_v7 = vld [vmem:[#allocation5 + $0x30] ss:$20 sps:$4 sm:$0xff]  }
  0xa7   :  { %v8014_v4 = vld [vmem:[#allocation5 + $0x2c] ss:$20 sps:$4 sm:$0xff]   ;;  %2287 = vmatpush1.bf16.msra.mxu0 %v8012_v2  ;;  %2502 = vmatpush1.bf16.msra.mxu1 %v8013_v3  ;;  %v8016_v5 = vld [vmem:[#allocation5 + $0x34] ss:$20 sps:$4 sm:$0xff]   ;;  %v8022_v9 = vld [vmem:[#allocation5 + $0x5c] ss:$20 sps:$4 sm:$0xff]  }
  0xa8   :  { %v8018_v6 = vld [vmem:[#allocation5 + $0x28] ss:$20 sps:$4 sm:$0xff]   ;;  %2288 = vmatprep.subr.bf16.mxu0 %v8014_v4  ;;  %2503 = vmatprep.subr.bf16.mxu1 %v8016_v5  ;;  %v8024_v10 = vld [vmem:[#allocation5 + $0x50] ss:$20 sps:$4 sm:$0xff]   ;;  %v8025_v11 = vld [vmem:[#allocation5 + $0x58] ss:$20 sps:$4 sm:$0xff]  }
  0xa9   :  { %v8020_v8 = vld [vmem:[#allocation5 + $0x54] ss:$20 sps:$4 sm:$0xff]   ;;  %v8026_v12 = vld [vmem:[#allocation5 + $0x7c] ss:$20 sps:$4 sm:$0xff]   ;;  %v8028_v13 = vld [vmem:[#allocation5 + $0x84] ss:$20 sps:$4 sm:$0xff]  }
  0xaa   :  { %v8030_v14 = vld [vmem:[#allocation5 + $0x78] ss:$20 sps:$4 sm:$0xff]   ;;  %v8031_v15 = vld [vmem:[#allocation5 + $0x80] ss:$20 sps:$4 sm:$0xff]   ;;  %v8037_v19 = vld [vmem:[#allocation5 + $0xa8] ss:$20 sps:$4 sm:$0xff]  }
  0xab   :  { %2289 = vmatpush1.bf16.msra.mxu0 %v8018_v6  ;;  %2504 = vmatpush1.bf16.msra.mxu1 %v8019_v7  ;;  %v8032_v16 = vld [vmem:[#allocation5 + $0xa4] ss:$20 sps:$4 sm:$0xff]   ;;  %v8034_v17 = vld [vmem:[#allocation5 + $0xac] ss:$20 sps:$4 sm:$0xff]   ;;  %v8040_v21 = vld [vmem:[#allocation5 + $0xd4] ss:$20 sps:$4 sm:$0xff]  }
  0xac   :  { %2290 = vmatprep.subr.bf16.mxu0 %v8020_v8  ;;  %2505 = vmatprep.subr.bf16.mxu1 %v8022_v9  ;;  %v8036_v18 = vld [vmem:[#allocation5 + $0xa0] ss:$20 sps:$4 sm:$0xff]   ;;  %v8042_v22 = vld [vmem:[#allocation5 + $0xc8] ss:$20 sps:$4 sm:$0xff]   ;;  %v8043_v23 = vld [vmem:[#allocation5 + $0xd0] ss:$20 sps:$4 sm:$0xff]  }
  0xad   :  { %v8038_v20 = vld [vmem:[#allocation5 + $0xcc] ss:$20 sps:$4 sm:$0xff]   ;;  %v8044_v24 = vld [vmem:[#allocation5 + $0xf4] ss:$20 sps:$4 sm:$0xff]   ;;  %v8046_v25 = vld [vmem:[#allocation5 + $0xfc] ss:$20 sps:$4 sm:$0xff]  }
  0xae   :  { %v8048_v26 = vld [vmem:[#allocation5 + $0xf0] ss:$20 sps:$4 sm:$0xff]   ;;  %v8049_v27 = vld [vmem:[#allocation5 + $0xf8] ss:$20 sps:$4 sm:$0xff]   ;;  %v8055_v31 = vld [vmem:[#allocation5 + $0x120] ss:$20 sps:$4 sm:$0xff]  }
  0xaf   :  { %2291 = vmatpush1.bf16.msra.mxu0 %v8024_v10  ;;  %2506 = vmatpush1.bf16.msra.mxu1 %v8025_v11  ;;  %v8050_v28 = vld [vmem:[#allocation5 + $0x11c] ss:$20 sps:$4 sm:$0xff]   ;;  %v8052_v29 = vld [vmem:[#allocation5 + $0x124] ss:$20 sps:$4 sm:$0xff]   ;;  %v8058_v33 = vld [vmem:[#allocation5 + $0x14c] ss:$20 sps:$4 sm:$0xff]  }
  0xb0   :  { %2292 = vmatprep.subr.bf16.mxu0 %v8026_v12  ;;  %2507 = vmatprep.subr.bf16.mxu1 %v8028_v13  ;;  %v8054_v30 = vld [vmem:[#allocation5 + $0x118] ss:$20 sps:$4 sm:$0xff]   ;;  %v8060_v34 = vld [vmem:[#allocation5 + $0x140] ss:$20 sps:$4 sm:$0xff]   ;;  %v8061_v35 = vld [vmem:[#allocation5 + $0x148] ss:$20 sps:$4 sm:$0xff]  }
  0xb1   :  { %v8056_v32 = vld [vmem:[#allocation5 + $0x144] ss:$20 sps:$4 sm:$0xff]   ;;  %v8062_v36 = vld [vmem:[#allocation5 + $0x16c] ss:$20 sps:$4 sm:$0xff]   ;;  %v8064_v37 = vld [vmem:[#allocation5 + $0x174] ss:$20 sps:$4 sm:$0xff]  }
  0xb2   :  { %v8066_v38 = vld [vmem:[#allocation5 + $0x168] ss:$20 sps:$4 sm:$0xff]   ;;  %v8067_v39 = vld [vmem:[#allocation5 + $0x170] ss:$20 sps:$4 sm:$0xff]   ;;  %v8073_v43 = vld [vmem:[#allocation5 + $0x198] ss:$20 sps:$4 sm:$0xff]  }
  0xb3   :  { %2293 = vmatpush1.bf16.msra.mxu0 %v8030_v14  ;;  %2508 = vmatpush1.bf16.msra.mxu1 %v8031_v15  ;;  %v8068_v40 = vld [vmem:[#allocation5 + $0x194] ss:$20 sps:$4 sm:$0xff]   ;;  %v8070_v41 = vld [vmem:[#allocation5 + $0x19c] ss:$20 sps:$4 sm:$0xff]   ;;  %v8076_v45 = vld [vmem:[#allocation5 + $0x1c4] ss:$20 sps:$4 sm:$0xff]  }
  0xb4   :  { %2294 = vmatprep.subr.bf16.mxu0 %v8032_v16  ;;  %2509 = vmatprep.subr.bf16.mxu1 %v8034_v17  ;;  %v8072_v42 = vld [vmem:[#allocation5 + $0x190] ss:$20 sps:$4 sm:$0xff]   ;;  %v149_v46 = vld [vmem:[#allocation2 + $0x8] sm:$0xff]  ;;  %v8079_v49 = vld [vmem:[#allocation5 + $0x1c0] ss:$20 sps:$4 sm:$0xff]   ;;  %vm2282_vm0 = vcmask 130048  }
  0xb5   :  { %v8074_v44 = vld [vmem:[#allocation5 + $0x1bc] ss:$20 sps:$4 sm:$0xff]   ;;  %v158_v47 = vld [vmem:[#allocation2 + $0x50] sm:$0xff]  ;;  %v8078_v48 = vld [vmem:[#allocation5 + $0x1b8] ss:$20 sps:$4 sm:$0xff]   ;;  %vm9312_vm1 = vmmov 0  }
  0xb6   :  { %v9483_v50 = vpack.c.bf16 %v158_v47, %v149_v46  ;;  %v8080_v51 = vld [vmem:[#allocation5 + $0x1e4] ss:$20 sps:$4 sm:$0xff]   ;;  %v8082_v52 = vld [vmem:[#allocation5 + $0x1ec] ss:$20 sps:$4 sm:$0xff]   ;;  %v8085_v54 = vld [vmem:[#allocation5 + $0x1e8] ss:$20 sps:$4 sm:$0xff]  }
  0xb7   :  { %2295 = vmatpush1.bf16.msra.mxu0 %v8036_v18  ;;  %2510 = vmatpush1.bf16.msra.mxu1 %v8037_v19  ;;  %v8084_v53 = vld [vmem:[#allocation5 + $0x1e0] ss:$20 sps:$4 sm:$0xff]   ;;  %v8090_v57 = vld [vmem:[#allocation5 + $0x208] ss:$20 sps:$4 sm:$0xff]   ;;  %v8091_v58 = vld [vmem:[#allocation5 + $0x210] ss:$20 sps:$4 sm:$0xff]  }
  0xb8   :  { %2296 = vmatprep.subr.bf16.mxu0 %v8038_v20  ;;  %2511 = vmatprep.subr.bf16.mxu1 %v8040_v21  ;;  %v8086_v55 = vld [vmem:[#allocation5 + $0x20c] ss:$20 sps:$4 sm:$0xff]   ;;  %v8088_v56 = vld [vmem:[#allocation5 + $0x214] ss:$20 sps:$4 sm:$0xff]   ;;  %v8094_v60 = vld [vmem:[#allocation5 + $0x23c] ss:$20 sps:$4 sm:$0xff]  }
  0xb9   :  { %2318 = vmatprep.mubr.bf16.mxu0 %v9483_v50  ;;  %2533 = vmatprep.mubr.bf16.mxu1 %v9483_v50  ;;  %v8092_v59 = vld [vmem:[#allocation5 + $0x234] ss:$20 sps:$4 sm:$0xff]   ;;  %v8096_v61 = vld [vmem:[#allocation5 + $0x230] ss:$20 sps:$4 sm:$0xff]   ;;  %v8097_v62 = vld [vmem:[#allocation5 + $0x238] ss:$20 sps:$4 sm:$0xff]  }
  0xba   :  { %v8098_v63 = vld [vmem:[#allocation5 + $0x25c] ss:$20 sps:$4 sm:$0xff]   ;;  %v8100_v0 = vld [vmem:[#allocation5 + $0x264] ss:$20 sps:$4 sm:$0xff]   ;;  %v8103_v2 = vld [vmem:[#allocation5 + $0x260] ss:$20 sps:$4 sm:$0xff]  }
  0xbb   :  { %2297 = vmatpush1.bf16.msra.mxu0 %v8042_v22  ;;  %2512 = vmatpush1.bf16.msra.mxu1 %v8043_v23  ;;  %v8102_v1 = vld [vmem:[#allocation5 + $0x258] ss:$20 sps:$4 sm:$0xff]   ;;  %v148_v4 = vld [vmem:[#allocation2] sm:$0xff]  ;;  %v8107_v8 = vld [vmem:[#allocation5 + $0x288] ss:$20 sps:$4 sm:$0xff]   ;;  %s9313_s8 = smov [#allocation17]  }
  0xbc   :  { %2298 = vmatprep.subr.bf16.mxu0 %v8044_v24  ;;  %2513 = vmatprep.subr.bf16.mxu1 %v8046_v25  ;;  %v8106_v3 = vld [vmem:[#allocation5 + $0x284] ss:$20 sps:$4 sm:$0xff]   ;;  %v8109_v6 = vld [vmem:[#allocation5 + $0x28c] ss:$20 sps:$4 sm:$0xff]   ;;  %v8115_v11 = vld [vmem:[#allocation5 + $0x2b4] ss:$20 sps:$4 sm:$0xff]  }
  0xbd   :  { %v157_v5 = vld [vmem:[#allocation2 + $0x48] sm:$0xff]  ;;  %v8104_v7 = vld [vmem:[#allocation5 + $0x280] ss:$20 sps:$4 sm:$0xff]   ;;  %v8113_v13 = vld [vmem:[#allocation5 + $0x2b0] ss:$20 sps:$4 sm:$0xff]   ;;  %s6799_s27 = sshll.u32 %s9313_s8, 4  ;;  %s6800_s27 = int_to_ptr.vmem [resolvable:$true] %s6799_s27 }
  0xbe   :  { %v9487_v9 = vpack.c.bf16 %v157_v5, %v148_v4  ;;  %v8112_v10 = vld [vmem:[#allocation5 + $0x2ac] ss:$20 sps:$4 sm:$0xff]   ;;  %v8110_v12 = vld [vmem:[#allocation5 + $0x2a8] ss:$20 sps:$4 sm:$0xff]   ;;  %v8116_v16 = vld [vmem:[#allocation5 + $0x2d0] ss:$20 sps:$4 sm:$0xff]   ;;  %p9266_p3 = scmp.lt.s32.totalorder %s6800_s27, %s6800_s27 }
  0xbf   :  { %2299 = vmatpush1.bf16.msra.mxu0 %v8048_v26  ;;  %2514 = vmatpush1.bf16.msra.mxu1 %v8049_v27  ;;  %v8118_v14 = vld [vmem:[#allocation5 + $0x2d4] ss:$20 sps:$4 sm:$0xff]   ;;  %v8121_v15 = vld [vmem:[#allocation5 + $0x2dc] ss:$20 sps:$4 sm:$0xff]   ;;  %v8119_v17 = vld [vmem:[#allocation5 + $0x2d8] ss:$20 sps:$4 sm:$0xff]  }
  0xc0   :  { %2300 = vmatprep.subr.bf16.mxu0 %v8050_v28  ;;  %2515 = vmatprep.subr.bf16.mxu1 %v8052_v29  ;;  %v8124_v18 = vld [vmem:[#allocation5 + $0x2fc] ss:$20 sps:$4 sm:$0xff]   ;;  %v8127_v19 = vld [vmem:[#allocation5 + $0x304] ss:$20 sps:$4 sm:$0xff]   ;;  %v8125_v21 = vld [vmem:[#allocation5 + $0x300] ss:$20 sps:$4 sm:$0xff]  }
  0xc1   :  { %v8122_v20 = vld [vmem:[#allocation5 + $0x2f8] ss:$20 sps:$4 sm:$0xff]   ;;  %v8128_v24 = vld [vmem:[#allocation5 + $0x320] ss:$20 sps:$4 sm:$0xff]   ;;  %v8131_v25 = vld [vmem:[#allocation5 + $0x328] ss:$20 sps:$4 sm:$0xff]  }
  0xc2   :  { %v8130_v22 = vld [vmem:[#allocation5 + $0x324] ss:$20 sps:$4 sm:$0xff]   ;;  %v8133_v23 = vld [vmem:[#allocation5 + $0x32c] ss:$20 sps:$4 sm:$0xff]   ;;  %v8139_v27 = vld [vmem:[#allocation5 + $0x354] ss:$20 sps:$4 sm:$0xff]  }
  0xc3   :  { %2301 = vmatpush1.bf16.msra.mxu0 %v8054_v30  ;;  %2516 = vmatpush1.bf16.msra.mxu1 %v8055_v31  ;;  %v8136_v26 = vld [vmem:[#allocation5 + $0x34c] ss:$20 sps:$4 sm:$0xff]   ;;  %v8134_v28 = vld [vmem:[#allocation5 + $0x348] ss:$20 sps:$4 sm:$0xff]   ;;  %v8137_v29 = vld [vmem:[#allocation5 + $0x350] ss:$20 sps:$4 sm:$0xff]  }
  0xc4   :  { %2302 = vmatprep.subr.bf16.mxu0 %v8056_v32  ;;  %2517 = vmatprep.subr.bf16.mxu1 %v8058_v33  ;;  %v8142_v30 = vld [vmem:[#allocation5 + $0x374] ss:$20 sps:$4 sm:$0xff]   ;;  %v8145_v31 = vld [vmem:[#allocation5 + $0x37c] ss:$20 sps:$4 sm:$0xff]   ;;  %v8191_v5 = vld [vmem:[#allocation5 + $0x4b8] ss:$20 sps:$4 sm:$0xff]  }
  0xc5   :  { %v151_v32 = vld [vmem:[#allocation2 + $0x18] sm:$0xff]  ;;  %v160_v33 = vld [vmem:[#allocation2 + $0x60] sm:$0xff]  ;;  %s9261_s2 = scalar_lea.vmem %s6800_s27, 256 }
  0xc6   :  { %v8163_v46 = vld [vmem:[#allocation5 + $0x3f4] ss:$20 sps:$4 sm:$0xff]   ;;  %v8188_v4 = vld [vmem:[#allocation5 + $0x4b0] ss:$20 sps:$4 sm:$0xff]   ;;  %p9262_p2 = scmp.ne.s32.totalorder %s6800_s27, %s9261_s2  ;;  %p9267_p4 = scmp.lt.s32.totalorder %s9261_s2, %s9261_s2 }
  0xc7   :  { %2303 = vmatpush1.bf16.msra.mxu0 %v8060_v34  ;;  %2518 = vmatpush1.bf16.msra.mxu1 %v8061_v35  ;;  %v8140_v34 = vld [vmem:[#allocation5 + $0x370] ss:$20 sps:$4 sm:$0xff]   ;;  %v8143_v35 = vld [vmem:[#allocation5 + $0x378] ss:$20 sps:$4 sm:$0xff]   ;;  %v8158_v47 = vld [vmem:[#allocation5 + $0x3e8] ss:$20 sps:$4 sm:$0xff]  }
  0xc8   :  { %2304 = vmatprep.subr.bf16.mxu0 %v8062_v36  ;;  %2519 = vmatprep.subr.bf16.mxu1 %v8064_v37  ;;  %v9491_v36 = vpack.c.bf16 %v160_v33, %v151_v32  ;;  %v8148_v37 = vld [vmem:[#allocation5 + $0x39c] ss:$20 sps:$4 sm:$0xff]   ;;  %v8221_v32 = vld [vmem:[#allocation5 + $0x580] ss:$20 sps:$4 sm:$0xff]   ;;  %v8226_v33 = vld [vmem:[#allocation5 + $0x5a4] ss:$20 sps:$4 sm:$0xff]   ;;  %p9268_p5 = por %p9267_p4, %p9266_p3 }
  0xca   :  { %p9269_p6 = pnand %p9268_p5, %p9262_p2 }
  0xcb   :  { %2305 = vmatpush1.bf16.msra.mxu0 %v8066_v38  ;;  %2520 = vmatpush1.bf16.msra.mxu1 %v8067_v39  ;;  %v8151_v38 = vld [vmem:[#allocation5 + $0x3a4] ss:$20 sps:$4 sm:$0xff]  }
  0xcc   :  { %2306 = vmatprep.subr.bf16.mxu0 %v8068_v40  ;;  %2521 = vmatprep.subr.bf16.mxu1 %v8070_v41  ;;  %v8146_v39 = vld [vmem:[#allocation5 + $0x398] ss:$20 sps:$4 sm:$0xff]   ;;  %v8149_v40 = vld [vmem:[#allocation5 + $0x3a0] ss:$20 sps:$4 sm:$0xff]  }
  0xcd   :  { %v8154_v41 = vld [vmem:[#allocation5 + $0x3c4] ss:$20 sps:$4 sm:$0xff]  }
  0xcf   :  { %2307 = vmatpush1.bf16.msra.mxu0 %v8072_v42  ;;  %2522 = vmatpush1.bf16.msra.mxu1 %v8073_v43  ;;  %v8157_v42 = vld [vmem:[#allocation5 + $0x3cc] ss:$20 sps:$4 sm:$0xff]  }
  0xd0   :  { %2308 = vmatprep.subr.bf16.mxu0 %v8074_v44  ;;  %2523 = vmatprep.subr.bf16.mxu1 %v8076_v45  ;;  %v8152_v43 = vld [vmem:[#allocation5 + $0x3c0] ss:$20 sps:$4 sm:$0xff]   ;;  %v8155_v44 = vld [vmem:[#allocation5 + $0x3c8] ss:$20 sps:$4 sm:$0xff]  }
  0xd1   :  { %v8160_v45 = vld [vmem:[#allocation5 + $0x3ec] ss:$20 sps:$4 sm:$0xff]  }
  0xd3   :  { %2309 = vmatpush1.bf16.msra.mxu0 %v8078_v48  ;;  %2524 = vmatpush1.bf16.msra.mxu1 %v8079_v49  ;;  %v8161_v48 = vld [vmem:[#allocation5 + $0x3f0] ss:$20 sps:$4 sm:$0xff]   ;;  %v8166_v49 = vld [vmem:[#allocation5 + $0x414] ss:$20 sps:$4 sm:$0xff]  }
  0xd4   :  { %2310 = vmatprep.subr.bf16.mxu0 %v8080_v51  ;;  %2525 = vmatprep.subr.bf16.mxu1 %v8082_v52  ;;  %v8169_v51 = vld [vmem:[#allocation5 + $0x41c] ss:$20 sps:$4 sm:$0xff]  }
  0xd5   :  { %v8164_v52 = vld [vmem:[#allocation5 + $0x410] ss:$20 sps:$4 sm:$0xff]  }
  0xd7   :  { %2311 = vmatpush1.bf16.msra.mxu0 %v8084_v53  ;;  %2526 = vmatpush1.bf16.msra.mxu1 %v8085_v54  ;;  %v8167_v53 = vld [vmem:[#allocation5 + $0x418] ss:$20 sps:$4 sm:$0xff]   ;;  %v8172_v54 = vld [vmem:[#allocation5 + $0x43c] ss:$20 sps:$4 sm:$0xff]  }
  0xd8   :  { %2312 = vmatprep.subr.bf16.mxu0 %v8086_v55  ;;  %2527 = vmatprep.subr.bf16.mxu1 %v8088_v56  ;;  %v8175_v55 = vld [vmem:[#allocation5 + $0x444] ss:$20 sps:$4 sm:$0xff]  }
  0xd9   :  { %v8170_v56 = vld [vmem:[#allocation5 + $0x438] ss:$20 sps:$4 sm:$0xff]  }
  0xdb   :  { %2313 = vmatpush1.bf16.msra.mxu0 %v8090_v57  ;;  %2528 = vmatpush1.bf16.msra.mxu1 %v8091_v58  ;;  %v8173_v57 = vld [vmem:[#allocation5 + $0x440] ss:$20 sps:$4 sm:$0xff]   ;;  %v8178_v58 = vld [vmem:[#allocation5 + $0x464] ss:$20 sps:$4 sm:$0xff]  }
  0xdc   :  { %2314 = vmatprep.subr.bf16.mxu0 %v8092_v59  ;;  %2529 = vmatprep.subr.bf16.mxu1 %v8094_v60  ;;  %v8181_v59 = vld [vmem:[#allocation5 + $0x46c] ss:$20 sps:$4 sm:$0xff]  }
  0xdd   :  { %v8176_v60 = vld [vmem:[#allocation5 + $0x460] ss:$20 sps:$4 sm:$0xff]  }
  0xdf   :  { %2315 = vmatpush1.bf16.msra.mxu0 %v8096_v61  ;;  %2530 = vmatpush1.bf16.msra.mxu1 %v8097_v62  ;;  %v8179_v61 = vld [vmem:[#allocation5 + $0x468] ss:$20 sps:$4 sm:$0xff]   ;;  %v8184_v62 = vld [vmem:[#allocation5 + $0x48c] ss:$20 sps:$4 sm:$0xff]  }
  0xe0   :  { %2316 = vmatprep.subr.bf16.mxu0 %v8098_v63  ;;  %2531 = vmatprep.subr.bf16.mxu1 %v8100_v0  ;;  %v8187_v63 = vld [vmem:[#allocation5 + $0x494] ss:$20 sps:$4 sm:$0xff]  }
  0xe1   :  { %v8182_v0 = vld [vmem:[#allocation5 + $0x488] ss:$20 sps:$4 sm:$0xff]  }
  0xe3   :  { %2317 = vmatpush1.bf16.msra.mxu0 %v8102_v1  ;;  %2532 = vmatpush1.bf16.msra.mxu1 %v8103_v2  ;;  %v8185_v1 = vld [vmem:[#allocation5 + $0x490] ss:$20 sps:$4 sm:$0xff]   ;;  %v8190_v2 = vld [vmem:[#allocation5 + $0x4b4] ss:$20 sps:$4 sm:$0xff]  }
  0xe4   :  { %2329 = vmatprep.subr.bf16.mxu0 %v8106_v3  ;;  %2544 = vmatprep.subr.bf16.mxu1 %v8109_v6  ;;  %v8193_v3 = vld [vmem:[#allocation5 + $0x4bc] ss:$20 sps:$4 sm:$0xff]  }
  0xe5   :  { %v8196_v6 = vld [vmem:[#allocation5 + $0x4dc] ss:$20 sps:$4 sm:$0xff]  }
  0xe6   :  { %2319 = vmatmul.mubr.bf16.vlgmr.msra.gmra.mrb[0].mxu0 %v9487_v9  ;;  %2534 = vmatmul.mubr.bf16.vlgmr.msra.gmra.mrb[0].mxu1 %v9487_v9 }
  0xe7   :  { %2330 = vmatpush1.bf16.msra.mxu0 %v8104_v7  ;;  %2545 = vmatpush1.bf16.msra.mxu1 %v8107_v8  ;;  %v8199_v7 = vld [vmem:[#allocation5 + $0x4e4] ss:$20 sps:$4 sm:$0xff]  }
  0xe8   :  { %2331 = vmatprep.subr.bf16.mxu0 %v8112_v10  ;;  %2546 = vmatprep.subr.bf16.mxu1 %v8115_v11  ;;  %v8194_v8 = vld [vmem:[#allocation5 + $0x4d8] ss:$20 sps:$4 sm:$0xff]   ;;  %v8197_v10 = vld [vmem:[#allocation5 + $0x4e0] ss:$20 sps:$4 sm:$0xff]  }
  0xe9   :  { %2361 = vmatprep.mubr.bf16.mxu0 %v9491_v36  ;;  %2576 = vmatprep.mubr.bf16.mxu1 %v9491_v36  ;;  %v8202_v11 = vld [vmem:[#allocation5 + $0x504] ss:$20 sps:$4 sm:$0xff]  }
  0xeb   :  { %2332 = vmatpush1.bf16.msra.mxu0 %v8110_v12  ;;  %2547 = vmatpush1.bf16.msra.mxu1 %v8113_v13  ;;  %v150_v12 = vld [vmem:[#allocation2 + $0x10] sm:$0xff]  ;;  %v159_v13 = vld [vmem:[#allocation2 + $0x58] sm:$0xff] }
  0xec   :  { %2333 = vmatprep.subr.bf16.mxu0 %v8118_v14  ;;  %2548 = vmatprep.subr.bf16.mxu1 %v8121_v15  ;;  %v8205_v14 = vld [vmem:[#allocation5 + $0x50c] ss:$20 sps:$4 sm:$0xff]  }
  0xed   :  { %v8200_v15 = vld [vmem:[#allocation5 + $0x500] ss:$20 sps:$4 sm:$0xff]  }
  0xef   :  { %2334 = vmatpush1.bf16.msra.mxu0 %v8116_v16  ;;  %2549 = vmatpush1.bf16.msra.mxu1 %v8119_v17  ;;  %v8203_v16 = vld [vmem:[#allocation5 + $0x508] ss:$20 sps:$4 sm:$0xff]   ;;  %v9495_v17 = vpack.c.bf16 %v159_v13, %v150_v12 }
  0xf0   :  { %2335 = vmatprep.subr.bf16.mxu0 %v8124_v18  ;;  %2550 = vmatprep.subr.bf16.mxu1 %v8127_v19  ;;  %v8208_v18 = vld [vmem:[#allocation5 + $0x52c] ss:$20 sps:$4 sm:$0xff]   ;;  %v8211_v19 = vld [vmem:[#allocation5 + $0x534] ss:$20 sps:$4 sm:$0xff]   ;;  %v8289_v13 = vld [vmem:[#allocation5 + $0x73c] ss:$20 sps:$4 sm:$0xff]  }
  0xf1   :  { %v8286_v12 = vld [vmem:[#allocation5 + $0x734] ss:$20 sps:$4 sm:$0xff]  }
  0xf3   :  { %2336 = vmatpush1.bf16.msra.mxu0 %v8122_v20  ;;  %2551 = vmatpush1.bf16.msra.mxu1 %v8125_v21  ;;  %v153_v20 = vld [vmem:[#allocation2 + $0x28] sm:$0xff]  ;;  %v162_v21 = vld [vmem:[#allocation2 + $0x70] sm:$0xff] }
  0xf4   :  { %2337 = vmatprep.subr.bf16.mxu0 %v8130_v22  ;;  %2552 = vmatprep.subr.bf16.mxu1 %v8133_v23  ;;  %v8206_v22 = vld [vmem:[#allocation5 + $0x528] ss:$20 sps:$4 sm:$0xff]   ;;  %v8209_v23 = vld [vmem:[#allocation5 + $0x530] ss:$20 sps:$4 sm:$0xff]  }
  0xf7   :  { %2338 = vmatpush1.bf16.msra.mxu0 %v8128_v24  ;;  %2553 = vmatpush1.bf16.msra.mxu1 %v8131_v25  ;;  %v9499_v24 = vpack.c.bf16 %v162_v21, %v153_v20  ;;  %v8214_v25 = vld [vmem:[#allocation5 + $0x554] ss:$20 sps:$4 sm:$0xff]   ;;  %v8298_v21 = vld [vmem:[#allocation5 + $0x784] ss:$20 sps:$4 sm:$0xff]  }
  0xf8   :  { %2339 = vmatprep.subr.bf16.mxu0 %v8136_v26  ;;  %2554 = vmatprep.subr.bf16.mxu1 %v8139_v27  ;;  %v8217_v26 = vld [vmem:[#allocation5 + $0x55c] ss:$20 sps:$4 sm:$0xff]   ;;  %v8293_v20 = vld [vmem:[#allocation5 + $0x760] ss:$20 sps:$4 sm:$0xff]  }
  0xf9   :  { %v8212_v27 = vld [vmem:[#allocation5 + $0x550] ss:$20 sps:$4 sm:$0xff]  }
  0xfb   :  { %2340 = vmatpush1.bf16.msra.mxu0 %v8134_v28  ;;  %2555 = vmatpush1.bf16.msra.mxu1 %v8137_v29  ;;  %v8215_v28 = vld [vmem:[#allocation5 + $0x558] ss:$20 sps:$4 sm:$0xff]   ;;  %v8220_v29 = vld [vmem:[#allocation5 + $0x57c] ss:$20 sps:$4 sm:$0xff]  }
  0xfc   :  { %2341 = vmatprep.subr.bf16.mxu0 %v8142_v30  ;;  %2556 = vmatprep.subr.bf16.mxu1 %v8145_v31  ;;  %v8223_v30 = vld [vmem:[#allocation5 + $0x584] ss:$20 sps:$4 sm:$0xff]  }
  0xfd   :  { %v8218_v31 = vld [vmem:[#allocation5 + $0x578] ss:$20 sps:$4 sm:$0xff]  }
  0xff   :  { %2342 = vmatpush1.bf16.msra.mxu0 %v8140_v34  ;;  %2557 = vmatpush1.bf16.msra.mxu1 %v8143_v35  ;;  %v8229_v34 = vld [vmem:[#allocation5 + $0x5ac] ss:$20 sps:$4 sm:$0xff]  }
 0x100   :  { %2343 = vmatprep.subr.bf16.mxu0 %v8148_v37  ;;  %2558 = vmatprep.subr.bf16.mxu1 %v8151_v38  ;;  %v8224_v35 = vld [vmem:[#allocation5 + $0x5a0] ss:$20 sps:$4 sm:$0xff]   ;;  %v8227_v37 = vld [vmem:[#allocation5 + $0x5a8] ss:$20 sps:$4 sm:$0xff]  }
 0x101   :  { %v8232_v38 = vld [vmem:[#allocation5 + $0x5cc] ss:$20 sps:$4 sm:$0xff]  }
 0x103   :  { %2344 = vmatpush1.bf16.msra.mxu0 %v8146_v39  ;;  %2559 = vmatpush1.bf16.msra.mxu1 %v8149_v40  ;;  %v8235_v39 = vld [vmem:[#allocation5 + $0x5d4] ss:$20 sps:$4 sm:$0xff]  }
 0x104   :  { %2345 = vmatprep.subr.bf16.mxu0 %v8154_v41  ;;  %2560 = vmatprep.subr.bf16.mxu1 %v8157_v42  ;;  %v8230_v40 = vld [vmem:[#allocation5 + $0x5c8] ss:$20 sps:$4 sm:$0xff]   ;;  %v8233_v41 = vld [vmem:[#allocation5 + $0x5d0] ss:$20 sps:$4 sm:$0xff]  }
 0x105   :  { %v8238_v42 = vld [vmem:[#allocation5 + $0x5f4] ss:$20 sps:$4 sm:$0xff]  }
 0x107   :  { %2346 = vmatpush1.bf16.msra.mxu0 %v8152_v43  ;;  %2561 = vmatpush1.bf16.msra.mxu1 %v8155_v44  ;;  %v8241_v43 = vld [vmem:[#allocation5 + $0x5fc] ss:$20 sps:$4 sm:$0xff]  }
 0x108   :  { %2347 = vmatprep.subr.bf16.mxu0 %v8160_v45  ;;  %2562 = vmatprep.subr.bf16.mxu1 %v8163_v46  ;;  %v8236_v44 = vld [vmem:[#allocation5 + $0x5f0] ss:$20 sps:$4 sm:$0xff]   ;;  %v8239_v45 = vld [vmem:[#allocation5 + $0x5f8] ss:$20 sps:$4 sm:$0xff]  }
 0x109   :  { %v8244_v46 = vld [vmem:[#allocation5 + $0x61c] ss:$20 sps:$4 sm:$0xff]  }
 0x10b   :  { %2348 = vmatpush1.bf16.msra.mxu0 %v8158_v47  ;;  %2563 = vmatpush1.bf16.msra.mxu1 %v8161_v48  ;;  %v8247_v47 = vld [vmem:[#allocation5 + $0x624] ss:$20 sps:$4 sm:$0xff]  }
 0x10c   :  { %2349 = vmatprep.subr.bf16.mxu0 %v8166_v49  ;;  %2564 = vmatprep.subr.bf16.mxu1 %v8169_v51  ;;  %v8242_v48 = vld [vmem:[#allocation5 + $0x618] ss:$20 sps:$4 sm:$0xff]   ;;  %v8245_v49 = vld [vmem:[#allocation5 + $0x620] ss:$20 sps:$4 sm:$0xff]  }
 0x10d   :  { %v8250_v51 = vld [vmem:[#allocation5 + $0x644] ss:$20 sps:$4 sm:$0xff]  }
 0x10f   :  { %2350 = vmatpush1.bf16.msra.mxu0 %v8164_v52  ;;  %2565 = vmatpush1.bf16.msra.mxu1 %v8167_v53  ;;  %v8253_v52 = vld [vmem:[#allocation5 + $0x64c] ss:$20 sps:$4 sm:$0xff]  }
 0x110   :  { %2351 = vmatprep.subr.bf16.mxu0 %v8172_v54  ;;  %2566 = vmatprep.subr.bf16.mxu1 %v8175_v55  ;;  %v8248_v53 = vld [vmem:[#allocation5 + $0x640] ss:$20 sps:$4 sm:$0xff]   ;;  %v8251_v54 = vld [vmem:[#allocation5 + $0x648] ss:$20 sps:$4 sm:$0xff]  }
 0x111   :  { %v8256_v55 = vld [vmem:[#allocation5 + $0x66c] ss:$20 sps:$4 sm:$0xff]  }
 0x113   :  { %2352 = vmatpush1.bf16.msra.mxu0 %v8170_v56  ;;  %2567 = vmatpush1.bf16.msra.mxu1 %v8173_v57  ;;  %v8259_v56 = vld [vmem:[#allocation5 + $0x674] ss:$20 sps:$4 sm:$0xff]  }
 0x114   :  { %2353 = vmatprep.subr.bf16.mxu0 %v8178_v58  ;;  %2568 = vmatprep.subr.bf16.mxu1 %v8181_v59  ;;  %v8254_v57 = vld [vmem:[#allocation5 + $0x668] ss:$20 sps:$4 sm:$0xff]   ;;  %v8257_v58 = vld [vmem:[#allocation5 + $0x670] ss:$20 sps:$4 sm:$0xff]  }
 0x115   :  { %v8262_v59 = vld [vmem:[#allocation5 + $0x694] ss:$20 sps:$4 sm:$0xff]  }
 0x117   :  { %2354 = vmatpush1.bf16.msra.mxu0 %v8176_v60  ;;  %2569 = vmatpush1.bf16.msra.mxu1 %v8179_v61  ;;  %v8265_v60 = vld [vmem:[#allocation5 + $0x69c] ss:$20 sps:$4 sm:$0xff]  }
 0x118   :  { %2355 = vmatprep.subr.bf16.mxu0 %v8184_v62  ;;  %2570 = vmatprep.subr.bf16.mxu1 %v8187_v63  ;;  %v8260_v61 = vld [vmem:[#allocation5 + $0x690] ss:$20 sps:$4 sm:$0xff]   ;;  %v8263_v62 = vld [vmem:[#allocation5 + $0x698] ss:$20 sps:$4 sm:$0xff]  }
 0x119   :  { %v8268_v63 = vld [vmem:[#allocation5 + $0x6bc] ss:$20 sps:$4 sm:$0xff]  }
 0x11b   :  { %2356 = vmatpush1.bf16.msra.mxu0 %v8182_v0  ;;  %2571 = vmatpush1.bf16.msra.mxu1 %v8185_v1  ;;  %v8271_v0 = vld [vmem:[#allocation5 + $0x6c4] ss:$20 sps:$4 sm:$0xff]  }
 0x11c   :  { %2357 = vmatprep.subr.bf16.mxu0 %v8190_v2  ;;  %2572 = vmatprep.subr.bf16.mxu1 %v8193_v3  ;;  %v8266_v1 = vld [vmem:[#allocation5 + $0x6b8] ss:$20 sps:$4 sm:$0xff]   ;;  %v8269_v2 = vld [vmem:[#allocation5 + $0x6c0] ss:$20 sps:$4 sm:$0xff]  }
 0x11d   :  { %v8274_v3 = vld [vmem:[#allocation5 + $0x6e4] ss:$20 sps:$4 sm:$0xff]  }
 0x11f   :  { %2358 = vmatpush1.bf16.msra.mxu0 %v8188_v4  ;;  %2573 = vmatpush1.bf16.msra.mxu1 %v8191_v5  ;;  %v8277_v4 = vld [vmem:[#allocation5 + $0x6ec] ss:$20 sps:$4 sm:$0xff]  }
 0x120   :  { %2359 = vmatprep.subr.bf16.mxu0 %v8196_v6  ;;  %2574 = vmatprep.subr.bf16.mxu1 %v8199_v7  ;;  %v8272_v5 = vld [vmem:[#allocation5 + $0x6e0] ss:$20 sps:$4 sm:$0xff]   ;;  %v8275_v6 = vld [vmem:[#allocation5 + $0x6e8] ss:$20 sps:$4 sm:$0xff]  }
 0x121   :  { %v8280_v7 = vld [vmem:[#allocation5 + $0x70c] ss:$20 sps:$4 sm:$0xff]  }
 0x123   :  { %2360 = vmatpush1.bf16.msra.mxu0 %v8194_v8  ;;  %2575 = vmatpush1.bf16.msra.mxu1 %v8197_v10  ;;  %v8283_v8 = vld [vmem:[#allocation5 + $0x714] ss:$20 sps:$4 sm:$0xff]  }
 0x124   :  { %2372 = vmatprep.subr.bf16.mxu0 %v8202_v11  ;;  %2587 = vmatprep.subr.bf16.mxu1 %v8205_v14  ;;  %v8278_v10 = vld [vmem:[#allocation5 + $0x708] ss:$20 sps:$4 sm:$0xff]   ;;  %v8281_v11 = vld [vmem:[#allocation5 + $0x710] ss:$20 sps:$4 sm:$0xff]  }
 0x125   :  { %v8284_v14 = vld [vmem:[#allocation5 + $0x730] ss:$20 sps:$4 sm:$0xff]  }
 0x126   :  { %2362 = vmatmul.mubr.bf16.vlgmr.msra.gmra.mrb[0].mxu0 %v9495_v17  ;;  %2577 = vmatmul.mubr.bf16.vlgmr.msra.gmra.mrb[0].mxu1 %v9495_v17 }
 0x127   :  { %2373 = vmatpush1.bf16.msra.mxu0 %v8200_v15  ;;  %2588 = vmatpush1.bf16.msra.mxu1 %v8203_v16  ;;  %v8287_v15 = vld [vmem:[#allocation5 + $0x738] ss:$20 sps:$4 sm:$0xff]   ;;  %v8292_v16 = vld [vmem:[#allocation5 + $0x75c] ss:$20 sps:$4 sm:$0xff]  }
 0x128   :  { %2374 = vmatprep.subr.bf16.mxu0 %v8208_v18  ;;  %2589 = vmatprep.subr.bf16.mxu1 %v8211_v19  ;;  %v8295_v18 = vld [vmem:[#allocation5 + $0x764] ss:$20 sps:$4 sm:$0xff]  }
 0x129   :  { %2404 = vmatprep.mubr.bf16.mxu0 %v9499_v24  ;;  %2619 = vmatprep.mubr.bf16.mxu1 %v9499_v24  ;;  %v8290_v19 = vld [vmem:[#allocation5 + $0x758] ss:$20 sps:$4 sm:$0xff]  }
 0x12b   :  { %2375 = vmatpush1.bf16.msra.mxu0 %v8206_v22  ;;  %2590 = vmatpush1.bf16.msra.mxu1 %v8209_v23  ;;  %v152_v22 = vld [vmem:[#allocation2 + $0x20] sm:$0xff]  ;;  %v161_v23 = vld [vmem:[#allocation2 + $0x68] sm:$0xff] }
 0x12c   :  { %2376 = vmatprep.subr.bf16.mxu0 %v8214_v25  ;;  %2591 = vmatprep.subr.bf16.mxu1 %v8217_v26  ;;  %v8301_v25 = vld [vmem:[#allocation5 + $0x78c] ss:$20 sps:$4 sm:$0xff]  }
 0x12d   :  { %v8296_v26 = vld [vmem:[#allocation5 + $0x780] ss:$20 sps:$4 sm:$0xff]  }
 0x12f   :  { %2377 = vmatpush1.bf16.msra.mxu0 %v8212_v27  ;;  %2592 = vmatpush1.bf16.msra.mxu1 %v8215_v28  ;;  %v8299_v27 = vld [vmem:[#allocation5 + $0x788] ss:$20 sps:$4 sm:$0xff]  }
 0x130   :  { %2378 = vmatprep.subr.bf16.mxu0 %v8220_v29  ;;  %2593 = vmatprep.subr.bf16.mxu1 %v8223_v30  ;;  %v155_v28 = vld [vmem:[#allocation2 + $0x38] sm:$0xff]  ;;  %v9503_v29 = vpack.c.bf16 %v161_v23, %v152_v22  ;;  %v164_v30 = vld [vmem:[#allocation2 + $0x80] sm:$0xff] }
 0x131   :  { %v8374_v22 = vld [vmem:[#allocation5 + $0x988] ss:$20 sps:$4 sm:$0xff]   ;;  %v8377_v23 = vld [vmem:[#allocation5 + $0x990] ss:$20 sps:$4 sm:$0xff]  }
 0x133   :  { %2379 = vmatpush1.bf16.msra.mxu0 %v8218_v31  ;;  %2594 = vmatpush1.bf16.msra.mxu1 %v8221_v32  ;;  %v8304_v31 = vld [vmem:[#allocation5 + $0x7ac] ss:$20 sps:$4 sm:$0xff]   ;;  %v8307_v32 = vld [vmem:[#allocation5 + $0x7b4] ss:$20 sps:$4 sm:$0xff]  }
 0x134   :  { %2380 = vmatprep.subr.bf16.mxu0 %v8226_v33  ;;  %2595 = vmatprep.subr.bf16.mxu1 %v8229_v34  ;;  %v8302_v33 = vld [vmem:[#allocation5 + $0x7a8] ss:$20 sps:$4 sm:$0xff]   ;;  %v9505_v34 = vpack.c.bf16 %v164_v30, %v155_v28  ;;  %v8383_v28 = vld [vmem:[#allocation5 + $0x9b8] ss:$20 sps:$4 sm:$0xff]  }
 0x135   :  { %v8388_v30 = vld [vmem:[#allocation5 + $0x9dc] ss:$20 sps:$4 sm:$0xff]  }
 0x137   :  { %2381 = vmatpush1.bf16.msra.mxu0 %v8224_v35  ;;  %2596 = vmatpush1.bf16.msra.mxu1 %v8227_v37  ;;  %v8305_v35 = vld [vmem:[#allocation5 + $0x7b0] ss:$20 sps:$4 sm:$0xff]   ;;  %v8310_v37 = vld [vmem:[#allocation5 + $0x7d4] ss:$20 sps:$4 sm:$0xff]  }
 0x138   :  { %2382 = vmatprep.subr.bf16.mxu0 %v8232_v38  ;;  %2597 = vmatprep.subr.bf16.mxu1 %v8235_v39  ;;  %v8313_v38 = vld [vmem:[#allocation5 + $0x7dc] ss:$20 sps:$4 sm:$0xff]  }
 0x139   :  { %v8308_v39 = vld [vmem:[#allocation5 + $0x7d0] ss:$20 sps:$4 sm:$0xff]  }
 0x13b   :  { %2383 = vmatpush1.bf16.msra.mxu0 %v8230_v40  ;;  %2598 = vmatpush1.bf16.msra.mxu1 %v8233_v41  ;;  %v8311_v40 = vld [vmem:[#allocation5 + $0x7d8] ss:$20 sps:$4 sm:$0xff]   ;;  %v8316_v41 = vld [vmem:[#allocation5 + $0x7fc] ss:$20 sps:$4 sm:$0xff]  }
 0x13c   :  { %2384 = vmatprep.subr.bf16.mxu0 %v8238_v42  ;;  %2599 = vmatprep.subr.bf16.mxu1 %v8241_v43  ;;  %v8319_v42 = vld [vmem:[#allocation5 + $0x804] ss:$20 sps:$4 sm:$0xff]  }
 0x13d   :  { %v8314_v43 = vld [vmem:[#allocation5 + $0x7f8] ss:$20 sps:$4 sm:$0xff]  }
 0x13f   :  { %2385 = vmatpush1.bf16.msra.mxu0 %v8236_v44  ;;  %2600 = vmatpush1.bf16.msra.mxu1 %v8239_v45  ;;  %v8317_v44 = vld [vmem:[#allocation5 + $0x800] ss:$20 sps:$4 sm:$0xff]   ;;  %v8322_v45 = vld [vmem:[#allocation5 + $0x824] ss:$20 sps:$4 sm:$0xff]  }
 0x140   :  { %2386 = vmatprep.subr.bf16.mxu0 %v8244_v46  ;;  %2601 = vmatprep.subr.bf16.mxu1 %v8247_v47  ;;  %v8325_v46 = vld [vmem:[#allocation5 + $0x82c] ss:$20 sps:$4 sm:$0xff]  }
 0x141   :  { %v8320_v47 = vld [vmem:[#allocation5 + $0x820] ss:$20 sps:$4 sm:$0xff]  }
 0x143   :  { %2387 = vmatpush1.bf16.msra.mxu0 %v8242_v48  ;;  %2602 = vmatpush1.bf16.msra.mxu1 %v8245_v49  ;;  %v8323_v48 = vld [vmem:[#allocation5 + $0x828] ss:$20 sps:$4 sm:$0xff]   ;;  %v8328_v49 = vld [vmem:[#allocation5 + $0x84c] ss:$20 sps:$4 sm:$0xff]  }
 0x144   :  { %2388 = vmatprep.subr.bf16.mxu0 %v8250_v51  ;;  %2603 = vmatprep.subr.bf16.mxu1 %v8253_v52  ;;  %v8331_v51 = vld [vmem:[#allocation5 + $0x854] ss:$20 sps:$4 sm:$0xff]  }
 0x145   :  { %v8326_v52 = vld [vmem:[#allocation5 + $0x848] ss:$20 sps:$4 sm:$0xff]  }
 0x147   :  { %2389 = vmatpush1.bf16.msra.mxu0 %v8248_v53  ;;  %2604 = vmatpush1.bf16.msra.mxu1 %v8251_v54  ;;  %v8329_v53 = vld [vmem:[#allocation5 + $0x850] ss:$20 sps:$4 sm:$0xff]   ;;  %v8334_v54 = vld [vmem:[#allocation5 + $0x874] ss:$20 sps:$4 sm:$0xff]  }
 0x148   :  { %2390 = vmatprep.subr.bf16.mxu0 %v8256_v55  ;;  %2605 = vmatprep.subr.bf16.mxu1 %v8259_v56  ;;  %v8337_v55 = vld [vmem:[#allocation5 + $0x87c] ss:$20 sps:$4 sm:$0xff]  }
 0x149   :  { %v8332_v56 = vld [vmem:[#allocation5 + $0x870] ss:$20 sps:$4 sm:$0xff]  }
 0x14b   :  { %2391 = vmatpush1.bf16.msra.mxu0 %v8254_v57  ;;  %2606 = vmatpush1.bf16.msra.mxu1 %v8257_v58  ;;  %v8335_v57 = vld [vmem:[#allocation5 + $0x878] ss:$20 sps:$4 sm:$0xff]   ;;  %v8340_v58 = vld [vmem:[#allocation5 + $0x89c] ss:$20 sps:$4 sm:$0xff]  }
 0x14c   :  { %2392 = vmatprep.subr.bf16.mxu0 %v8262_v59  ;;  %2607 = vmatprep.subr.bf16.mxu1 %v8265_v60  ;;  %v8343_v59 = vld [vmem:[#allocation5 + $0x8a4] ss:$20 sps:$4 sm:$0xff]  }
 0x14d   :  { %v8338_v60 = vld [vmem:[#allocation5 + $0x898] ss:$20 sps:$4 sm:$0xff]  }
 0x14f   :  { %2393 = vmatpush1.bf16.msra.mxu0 %v8260_v61  ;;  %2608 = vmatpush1.bf16.msra.mxu1 %v8263_v62  ;;  %v8341_v61 = vld [vmem:[#allocation5 + $0x8a0] ss:$20 sps:$4 sm:$0xff]   ;;  %v8346_v62 = vld [vmem:[#allocation5 + $0x8c4] ss:$20 sps:$4 sm:$0xff]  }
 0x150   :  { %2394 = vmatprep.subr.bf16.mxu0 %v8268_v63  ;;  %2609 = vmatprep.subr.bf16.mxu1 %v8271_v0  ;;  %v8349_v63 = vld [vmem:[#allocation5 + $0x8cc] ss:$20 sps:$4 sm:$0xff]  }
 0x151   :  { %v8344_v0 = vld [vmem:[#allocation5 + $0x8c0] ss:$20 sps:$4 sm:$0xff]  }
 0x153   :  { %2395 = vmatpush1.bf16.msra.mxu0 %v8266_v1  ;;  %2610 = vmatpush1.bf16.msra.mxu1 %v8269_v2  ;;  %v8347_v1 = vld [vmem:[#allocation5 + $0x8c8] ss:$20 sps:$4 sm:$0xff]   ;;  %v8352_v2 = vld [vmem:[#allocation5 + $0x8ec] ss:$20 sps:$4 sm:$0xff]  }
 0x154   :  { %2396 = vmatprep.subr.bf16.mxu0 %v8274_v3  ;;  %2611 = vmatprep.subr.bf16.mxu1 %v8277_v4  ;;  %v8355_v3 = vld [vmem:[#allocation5 + $0x8f4] ss:$20 sps:$4 sm:$0xff]  }
 0x155   :  { %v8350_v4 = vld [vmem:[#allocation5 + $0x8e8] ss:$20 sps:$4 sm:$0xff]  }
 0x157   :  { %2397 = vmatpush1.bf16.msra.mxu0 %v8272_v5  ;;  %2612 = vmatpush1.bf16.msra.mxu1 %v8275_v6  ;;  %v8353_v5 = vld [vmem:[#allocation5 + $0x8f0] ss:$20 sps:$4 sm:$0xff]   ;;  %v8358_v6 = vld [vmem:[#allocation5 + $0x914] ss:$20 sps:$4 sm:$0xff]  }
 0x158   :  { %2398 = vmatprep.subr.bf16.mxu0 %v8280_v7  ;;  %2613 = vmatprep.subr.bf16.mxu1 %v8283_v8  ;;  %v8361_v7 = vld [vmem:[#allocation5 + $0x91c] ss:$20 sps:$4 sm:$0xff]  }
 0x159   :  { %v8356_v8 = vld [vmem:[#allocation5 + $0x910] ss:$20 sps:$4 sm:$0xff]  }
 0x15b   :  { %2399 = vmatpush1.bf16.msra.mxu0 %v8278_v10  ;;  %2614 = vmatpush1.bf16.msra.mxu1 %v8281_v11  ;;  %v8359_v10 = vld [vmem:[#allocation5 + $0x918] ss:$20 sps:$4 sm:$0xff]   ;;  %v8364_v11 = vld [vmem:[#allocation5 + $0x93c] ss:$20 sps:$4 sm:$0xff]  }
 0x15c   :  { %2400 = vmatprep.subr.bf16.mxu0 %v8286_v12  ;;  %2615 = vmatprep.subr.bf16.mxu1 %v8289_v13  ;;  %v8367_v12 = vld [vmem:[#allocation5 + $0x944] ss:$20 sps:$4 sm:$0xff]  }
 0x15d   :  { %v8362_v13 = vld [vmem:[#allocation5 + $0x938] ss:$20 sps:$4 sm:$0xff]  }
 0x15f   :  { %2401 = vmatpush1.bf16.msra.mxu0 %v8284_v14  ;;  %2616 = vmatpush1.bf16.msra.mxu1 %v8287_v15  ;;  %v8365_v14 = vld [vmem:[#allocation5 + $0x940] ss:$20 sps:$4 sm:$0xff]   ;;  %v8370_v15 = vld [vmem:[#allocation5 + $0x964] ss:$20 sps:$4 sm:$0xff]  }
 0x160   :  { %2402 = vmatprep.subr.bf16.mxu0 %v8292_v16  ;;  %2617 = vmatprep.subr.bf16.mxu1 %v8295_v18  ;;  %v8373_v16 = vld [vmem:[#allocation5 + $0x96c] ss:$20 sps:$4 sm:$0xff]  }
 0x161   :  { %v8368_v18 = vld [vmem:[#allocation5 + $0x960] ss:$20 sps:$4 sm:$0xff]  }
 0x163   :  { %2403 = vmatpush1.bf16.msra.mxu0 %v8290_v19  ;;  %2618 = vmatpush1.bf16.msra.mxu1 %v8293_v20  ;;  %v8371_v19 = vld [vmem:[#allocation5 + $0x968] ss:$20 sps:$4 sm:$0xff]   ;;  %v8376_v20 = vld [vmem:[#allocation5 + $0x98c] ss:$20 sps:$4 sm:$0xff]  }
 0x164   :  { %2415 = vmatprep.subr.bf16.mxu0 %v8298_v21  ;;  %2630 = vmatprep.subr.bf16.mxu1 %v8301_v25  ;;  %v8379_v21 = vld [vmem:[#allocation5 + $0x994] ss:$20 sps:$4 sm:$0xff]  }
 0x165   :  { %v8382_v25 = vld [vmem:[#allocation5 + $0x9b4] ss:$20 sps:$4 sm:$0xff]  }
 0x166   :  { %2405 = vmatmul.mubr.bf16.vlgmr.msra.gmra.mrb[0].mxu0 %v9503_v29  ;;  %2620 = vmatmul.mubr.bf16.vlgmr.msra.gmra.mrb[0].mxu1 %v9503_v29 }
 0x167   :  { %2416 = vmatpush1.bf16.msra.mxu0 %v8296_v26  ;;  %2631 = vmatpush1.bf16.msra.mxu1 %v8299_v27  ;;  %v8385_v26 = vld [vmem:[#allocation5 + $0x9bc] ss:$20 sps:$4 sm:$0xff]  }
 0x168   :  { %2417 = vmatprep.subr.bf16.mxu0 %v8304_v31  ;;  %2632 = vmatprep.subr.bf16.mxu1 %v8307_v32  ;;  %v8380_v27 = vld [vmem:[#allocation5 + $0x9b0] ss:$20 sps:$4 sm:$0xff]   ;;  %v8386_v32 = vld [vmem:[#allocation5 + $0x9d8] ss:$20 sps:$4 sm:$0xff]  }
 0x169   :  { %2447 = vmatprep.mubr.bf16.mxu0 %v9505_v34  ;;  %2662 = vmatprep.mubr.bf16.mxu1 %v9505_v34  ;;  %v8391_v31 = vld [vmem:[#allocation5 + $0x9e4] ss:$20 sps:$4 sm:$0xff]  }
 0x16b   :  { %2418 = vmatpush1.bf16.msra.mxu0 %v8302_v33  ;;  %2633 = vmatpush1.bf16.msra.mxu1 %v8305_v35  ;;  %v8389_v33 = vld [vmem:[#allocation5 + $0x9e0] ss:$20 sps:$4 sm:$0xff]  }
 0x16c   :  { %2419 = vmatprep.subr.bf16.mxu0 %v8310_v37  ;;  %2634 = vmatprep.subr.bf16.mxu1 %v8313_v38  ;;  %v154_v35 = vld [vmem:[#allocation2 + $0x30] sm:$0xff]  ;;  %v163_v37 = vld [vmem:[#allocation2 + $0x78] sm:$0xff] }
 0x16d   :  { %v8394_v38 = vld [vmem:[#allocation5 + $0xa04] ss:$20 sps:$4 sm:$0xff]  }
 0x16f   :  { %2420 = vmatpush1.bf16.msra.mxu0 %v8308_v39  ;;  %2635 = vmatpush1.bf16.msra.mxu1 %v8311_v40  ;;  %v8400_v39 = vld [vmem:[#allocation5 + $0x3d0] ss:$20 sps:$4 sm:$0xff]   ;;  %v9511_v40 = vpack.c.bf16 %v163_v37, %v154_v35  ;;  %v8457_v35 = vld [vmem:[#allocation5 + $0x880] ss:$20 sps:$4 sm:$0xff]   ;;  %v8460_v37 = vld [vmem:[#allocation5 + $0x9e8] ss:$20 sps:$4 sm:$0xff]  }
 0x170   :  { %2421 = vmatprep.subr.bf16.mxu0 %v8316_v41  ;;  %2636 = vmatprep.subr.bf16.mxu1 %v8319_v42  ;;  %v8392_v41 = vld [vmem:[#allocation5 + $0xa00] ss:$20 sps:$4 sm:$0xff]  }
 0x171   :  { %v8397_v42 = vld [vmem:[#allocation5 + $0xa0c] ss:$20 sps:$4 sm:$0xff]  }
 0x173   :  { %2422 = vmatpush1.bf16.msra.mxu0 %v8314_v43  ;;  %2637 = vmatpush1.bf16.msra.mxu1 %v8317_v44  ;;  %v8401_v43 = vld [vmem:[#allocation5 + $0x290] ss:$20 sps:$4 sm:$0xff]   ;;  %v8404_v44 = vld [vmem:[#allocation5 + $0x3f8] ss:$20 sps:$4 sm:$0xff]  }
 0x174   :  { %2423 = vmatprep.subr.bf16.mxu0 %v8322_v45  ;;  %2638 = vmatprep.subr.bf16.mxu1 %v8325_v46  ;;  %v9310_v45 = vmov 0   ;;  %v8405_v46 = vld [vmem:[#allocation5 + $0x2b8] ss:$20 sps:$4 sm:$0xff]  }
 0x177   :  { %2424 = vmatpush1.bf16.msra.mxu0 %v8320_v47  ;;  %2639 = vmatpush1.bf16.msra.mxu1 %v8323_v48  ;;  %v8408_v47 = vld [vmem:[#allocation5 + $0x420] ss:$20 sps:$4 sm:$0xff]  }
 0x178   :  { %2425 = vmatprep.subr.bf16.mxu0 %v8328_v49  ;;  %2640 = vmatprep.subr.bf16.mxu1 %v8331_v51  ;;  %v156_v48 = vld [vmem:[#allocation2 + $0x40] sm:$0xff]  ;;  %v165_v49 = vld [vmem:[#allocation2 + $0x88] sm:$0xff] }
 0x179   :  { %v8409_v51 = vld [vmem:[#allocation5 + $0x2e0] ss:$20 sps:$4 sm:$0xff]  }
 0x17b   :  { %2426 = vmatpush1.bf16.msra.mxu0 %v8326_v52  ;;  %2641 = vmatpush1.bf16.msra.mxu1 %v8329_v53  ;;  %v8412_v52 = vld [vmem:[#allocation5 + $0x448] ss:$20 sps:$4 sm:$0xff]   ;;  %v9517_v53 = vpack.c.bf16 %v165_v49, %v156_v48  ;;  %v8477_v49 = vld [vmem:[#allocation8 + $0x54] ss:$20 sps:$4 sm:$0xff]  }
 0x17c   :  { %2427 = vmatprep.subr.bf16.mxu0 %v8334_v54  ;;  %2642 = vmatprep.subr.bf16.mxu1 %v8337_v55  ;;  %v8395_v54 = vld [vmem:[#allocation5 + $0xa08] ss:$20 sps:$4 sm:$0xff]   ;;  %v8398_v55 = vld [vmem:[#allocation5 + $0x150] ss:$20 sps:$4 sm:$0xff]  }
 0x17d   :  { %v8469_v48 = vld [vmem:[#allocation8 + $0x28] ss:$20 sps:$4 sm:$0xff]  }
 0x17f   :  { %2428 = vmatpush1.bf16.msra.mxu0 %v8332_v56  ;;  %2643 = vmatpush1.bf16.msra.mxu1 %v8335_v57  ;;  %v8413_v56 = vld [vmem:[#allocation5 + $0x308] ss:$20 sps:$4 sm:$0xff]   ;;  %v8416_v57 = vld [vmem:[#allocation5 + $0x470] ss:$20 sps:$4 sm:$0xff]  }
 0x180   :  { %2429 = vmatprep.subr.bf16.mxu0 %v8340_v58  ;;  %2644 = vmatprep.subr.bf16.mxu1 %v8343_v59  ;;  %v8399_v58 = vld [vmem:[#allocation5 + $0x10] ss:$20 sps:$4 sm:$0xff]   ;;  %v8420_v59 = vld [vmem:[#allocation5 + $0x498] ss:$20 sps:$4 sm:$0xff]  }
 0x183   :  { %2430 = vmatpush1.bf16.msra.mxu0 %v8338_v60  ;;  %2645 = vmatpush1.bf16.msra.mxu1 %v8341_v61  ;;  %v8402_v60 = vld [vmem:[#allocation5 + $0x178] ss:$20 sps:$4 sm:$0xff]  }
 0x184   :  { %2431 = vmatprep.subr.bf16.mxu0 %v8346_v62  ;;  %2646 = vmatprep.subr.bf16.mxu1 %v8349_v63  ;;  %v8421_v61 = vld [vmem:[#allocation5 + $0x358] ss:$20 sps:$4 sm:$0xff]   ;;  %v8424_v62 = vld [vmem:[#allocation5 + $0x4c0] ss:$20 sps:$4 sm:$0xff]  }
 0x185   :  { %v8403_v63 = vld [vmem:[#allocation5 + $0x38] ss:$20 sps:$4 sm:$0xff]  }
 0x187   :  { %2432 = vmatpush1.bf16.msra.mxu0 %v8344_v0  ;;  %2647 = vmatpush1.bf16.msra.mxu1 %v8347_v1  ;;  %v8406_v0 = vld [vmem:[#allocation5 + $0x1a0] ss:$20 sps:$4 sm:$0xff]  }
 0x188   :  { %2433 = vmatprep.subr.bf16.mxu0 %v8352_v2  ;;  %2648 = vmatprep.subr.bf16.mxu1 %v8355_v3  ;;  %v8425_v1 = vld [vmem:[#allocation5 + $0x380] ss:$20 sps:$4 sm:$0xff]   ;;  %v8428_v2 = vld [vmem:[#allocation5 + $0x4e8] ss:$20 sps:$4 sm:$0xff]  }
 0x189   :  { %v8407_v3 = vld [vmem:[#allocation5 + $0x60] ss:$20 sps:$4 sm:$0xff]  }
 0x18b   :  { %2434 = vmatpush1.bf16.msra.mxu0 %v8350_v4  ;;  %2649 = vmatpush1.bf16.msra.mxu1 %v8353_v5  ;;  %v8410_v4 = vld [vmem:[#allocation5 + $0x1c8] ss:$20 sps:$4 sm:$0xff]  }
 0x18c   :  { %2435 = vmatprep.subr.bf16.mxu0 %v8358_v6  ;;  %2650 = vmatprep.subr.bf16.mxu1 %v8361_v7  ;;  %v8429_v5 = vld [vmem:[#allocation5 + $0x3a8] ss:$20 sps:$4 sm:$0xff]   ;;  %v8432_v6 = vld [vmem:[#allocation5 + $0x8d0] ss:$20 sps:$4 sm:$0xff]  }
 0x18d   :  { %v8411_v7 = vld [vmem:[#allocation5 + $0x88] ss:$20 sps:$4 sm:$0xff]  }
 0x18f   :  { %2436 = vmatpush1.bf16.msra.mxu0 %v8356_v8  ;;  %2651 = vmatpush1.bf16.msra.mxu1 %v8359_v10  ;;  %v8414_v8 = vld [vmem:[#allocation5 + $0x1f0] ss:$20 sps:$4 sm:$0xff]  }
 0x190   :  { %2437 = vmatprep.subr.bf16.mxu0 %v8364_v11  ;;  %2652 = vmatprep.subr.bf16.mxu1 %v8367_v12  ;;  %v8433_v10 = vld [vmem:[#allocation5 + $0x790] ss:$20 sps:$4 sm:$0xff]   ;;  %v8436_v11 = vld [vmem:[#allocation5 + $0x8f8] ss:$20 sps:$4 sm:$0xff]  }
 0x191   :  { %v8415_v12 = vld [vmem:[#allocation5 + $0xb0] ss:$20 sps:$4 sm:$0xff]  }
 0x193   :  { %2438 = vmatpush1.bf16.msra.mxu0 %v8362_v13  ;;  %2653 = vmatpush1.bf16.msra.mxu1 %v8365_v14  ;;  %v8437_v13 = vld [vmem:[#allocation5 + $0x7b8] ss:$20 sps:$4 sm:$0xff]   ;;  %v8440_v14 = vld [vmem:[#allocation5 + $0x920] ss:$20 sps:$4 sm:$0xff]  }
 0x194   :  { %2439 = vmatprep.subr.bf16.mxu0 %v8370_v15  ;;  %2654 = vmatprep.subr.bf16.mxu1 %v8373_v16  ;;  %v8419_v15 = vld [vmem:[#allocation5 + $0xd8] ss:$20 sps:$4 sm:$0xff]   ;;  %v8422_v16 = vld [vmem:[#allocation5 + $0x240] ss:$20 sps:$4 sm:$0xff]  }
 0x197   :  { %2440 = vmatpush1.bf16.msra.mxu0 %v8368_v18  ;;  %2655 = vmatpush1.bf16.msra.mxu1 %v8371_v19  ;;  %v8441_v18 = vld [vmem:[#allocation5 + $0x7e0] ss:$20 sps:$4 sm:$0xff]   ;;  %v8444_v19 = vld [vmem:[#allocation5 + $0x948] ss:$20 sps:$4 sm:$0xff]  }
 0x198   :  { %2441 = vmatprep.subr.bf16.mxu0 %v8376_v20  ;;  %2656 = vmatprep.subr.bf16.mxu1 %v8379_v21  ;;  %v8423_v20 = vld [vmem:[#allocation5 + $0x100] ss:$20 sps:$4 sm:$0xff]   ;;  %v8426_v21 = vld [vmem:[#allocation5 + $0x268] ss:$20 sps:$4 sm:$0xff]  }
 0x19b   :  { %2442 = vmatpush1.bf16.msra.mxu0 %v8374_v22  ;;  %2657 = vmatpush1.bf16.msra.mxu1 %v8377_v23  ;;  %v8445_v22 = vld [vmem:[#allocation5 + $0x808] ss:$20 sps:$4 sm:$0xff]   ;;  %v8448_v23 = vld [vmem:[#allocation5 + $0x970] ss:$20 sps:$4 sm:$0xff]  }
 0x19c   :  { %2443 = vmatprep.subr.bf16.mxu0 %v8382_v25  ;;  %2658 = vmatprep.subr.bf16.mxu1 %v8385_v26  ;;  %v8430_v25 = vld [vmem:[#allocation5 + $0x650] ss:$20 sps:$4 sm:$0xff]  }
 0x19d   :  { %v8449_v26 = vld [vmem:[#allocation5 + $0x830] ss:$20 sps:$4 sm:$0xff]  }
 0x19f   :  { %2444 = vmatpush1.bf16.msra.mxu0 %v8380_v27  ;;  %2659 = vmatpush1.bf16.msra.mxu1 %v8383_v28  ;;  %v8431_v27 = vld [vmem:[#allocation5 + $0x510] ss:$20 sps:$4 sm:$0xff]   ;;  %v8434_v28 = vld [vmem:[#allocation5 + $0x678] ss:$20 sps:$4 sm:$0xff]  }
 0x1a0   :  { %2445 = vmatprep.subr.bf16.mxu0 %v8388_v30  ;;  %2660 = vmatprep.subr.bf16.mxu1 %v8391_v31  ;;  %v8453_v30 = vld [vmem:[#allocation5 + $0x858] ss:$20 sps:$4 sm:$0xff]   ;;  %v8456_v31 = vld [vmem:[#allocation5 + $0x9c0] ss:$20 sps:$4 sm:$0xff]  }
 0x1a3   :  { %2446 = vmatpush1.bf16.msra.mxu0 %v8386_v32  ;;  %2661 = vmatpush1.bf16.msra.mxu1 %v8389_v33  ;;  %v8435_v32 = vld [vmem:[#allocation5 + $0x538] ss:$20 sps:$4 sm:$0xff]   ;;  %v8438_v33 = vld [vmem:[#allocation5 + $0x6a0] ss:$20 sps:$4 sm:$0xff]  }
 0x1a4   :  { %2458 = vmatprep.subr.bf16.mxu0 %v8394_v38  ;;  %7606 = vmatprep.subr.bf16.mxu1 %v8400_v39  ;;  %v8439_v38 = vld [vmem:[#allocation5 + $0x560] ss:$20 sps:$4 sm:$0xff]   ;;  %v8442_v39 = vld [vmem:[#allocation5 + $0x6c8] ss:$20 sps:$4 sm:$0xff]  }
 0x1a6   :  { %2448 = vmatmul.mubr.bf16.vlgmr.msra.gmra.mrb[0].mxu0 %v9511_v40  ;;  %2663 = vmatmul.mubr.bf16.vlgmr.msra.gmra.mrb[0].mxu1 %v9511_v40 }
 0x1a7   :  { %2459 = vmatpush1.bf16.msra.mxu0 %v8392_v41  ;;  %2490 = vmatprep.mubr.bf16.mxu0 %v9310_v45  ;;  %v8461_v41 = vld [vmem:[#allocation5 + $0x8a8] ss:$20 sps:$4 sm:$0xff]  }
 0x1a8   :  { %2673 = vmatprep.subr.bf16.mxu0 %v8397_v42  ;;  %7607 = vmatpush3.bf16.msra.mxu1 %v8401_v43  ;;  %v8465_v42 = vld [vmem:[#allocation8 + $0x4] ss:$20 sps:$4 sm:$0xff]  }
 0x1a9   :  { %7608 = vmatprep.subr.bf16.mxu1 %v8404_v44  ;;  %2789 = vmatprep.mubr.bf16.mxu1 %v9491_v36  ;;  %v8417_v36 = vld [vmem:[#allocation5 + $0x330] ss:$20 sps:$4 sm:$0xff]   ;;  %v8443_v43 = vld [vmem:[#allocation5 + $0x588] ss:$20 sps:$4 sm:$0xff]  }
 0x1aa   :  { %v8446_v44 = vld [vmem:[#allocation5 + $0x6f0] ss:$20 sps:$4 sm:$0xff]  }
 0x1ac   :  { %7609 = vmatpush3.bf16.msra.mxu1 %v8405_v46  ;;  %v8471_v46 = vld [vmem:[#allocation8 + $0x2c] ss:$20 sps:$4 sm:$0xff]  }
 0x1ad   :  { %7610 = vmatprep.subr.bf16.mxu1 %v8408_v47  ;;  %v8447_v47 = vld [vmem:[#allocation5 + $0x5b0] ss:$20 sps:$4 sm:$0xff]  }
 0x1b0   :  { %7611 = vmatpush3.bf16.msra.mxu1 %v8409_v51  ;;  %v8451_v51 = vld [vmem:[#allocation5 + $0x5d8] ss:$20 sps:$4 sm:$0xff]  }
 0x1b1   :  { %7612 = vmatprep.subr.bf16.mxu1 %v8412_v52  ;;  %v8454_v52 = vld [vmem:[#allocation5 + $0x740] ss:$20 sps:$4 sm:$0xff]  }
 0x1b2   :  { %7140 = vmatmul.mubr.msk.bf16.vlgmr.msra.gmra.mrb[0].mxu0 %vm2282_vm0, %v9517_v53 }
 0x1b3   :  { %2674 = vmatpush1.bf16.msra.mxu0 %v8395_v54  ;;  %2705 = vmatprep.mubr.bf16.mxu0 %v9310_v45  ;;  %v8475_v54 = vld [vmem:[#allocation8 + $0x50] ss:$20 sps:$4 sm:$0xff]  }
 0x1b4   :  { %7584 = vmatprep.subr.bf16.mxu0 %v8398_v55  ;;  %7613 = vmatpush3.bf16.msra.mxu1 %v8413_v56  ;;  %v8483_v55 = vld [vmem:[#allocation8 + $0x7c] ss:$20 sps:$4 sm:$0xff]  }
 0x1b5   :  { %7614 = vmatprep.subr.bf16.mxu1 %v8416_v57  ;;  %v8455_v56 = vld [vmem:[#allocation5 + $0x600] ss:$20 sps:$4 sm:$0xff]   ;;  %v8458_v57 = vld [vmem:[#allocation5 + $0x768] ss:$20 sps:$4 sm:$0xff]  }
 0x1b8   :  { %7615 = vmatpush3.bf16.msra.mxu1 %v8417_v36  ;;  %v8481_v36 = vld [vmem:[#allocation8 + $0x78] ss:$20 sps:$4 sm:$0xff]  }
 0x1b9   :  { %7616 = vmatprep.subr.bf16.mxu1 %v8420_v59  ;;  %v8487_v59 = vld [vmem:[#allocation8 + $0xa0] ss:$20 sps:$4 sm:$0xff]  }
 0x1ba   :  { %7141 = vmatmul.mubr.msk.bf16.vlgmr.msra.gmra.mrb[4].mxu0 %vm2282_vm0, %v9517_v53 }
 0x1bb   :  { %7585 = vmatpush3.bf16.msra.mxu0 %v8399_v58  ;;  %2748 = vmatprep.mubr.bf16.mxu0 %v9483_v50  ;;  %v8418_v50 = vld [vmem:[#allocation5 + $0x218] ss:$20 sps:$4 sm:$0xff]   ;;  %v8489_v58 = vld [vmem:[#allocation8 + $0xa4] ss:$20 sps:$4 sm:$0xff]  }
 0x1bc   :  { %7586 = vmatprep.subr.bf16.mxu0 %v8402_v60  ;;  %7617 = vmatpush3.bf16.msra.mxu1 %v8421_v61  ;;  %v8495_v60 = vld [vmem:[#allocation8 + $0xcc] ss:$20 sps:$4 sm:$0xff]  }
 0x1bd   :  { %7618 = vmatprep.subr.bf16.mxu1 %v8424_v62  ;;  %v8462_v61 = vld [vmem:[#allocation5 + $0xa10] ss:$20 sps:$4 sm:$0xff]  }
 0x1be   :  { %v8468_v62 = vld [vmem:[#allocation8 + $0xc] ss:$20 sps:$4 sm:$0xff]  }
 0x1bf   :  { %7587 = vmatpush3.bf16.msra.mxu0 %v8403_v63  ;;  %v8493_v63 = vld [vmem:[#allocation8 + $0xc8] ss:$20 sps:$4 sm:$0xff]  }
 0x1c0   :  { %7588 = vmatprep.subr.bf16.mxu0 %v8406_v0  ;;  %7619 = vmatpush3.bf16.msra.mxu1 %v8425_v1  ;;  %v8501_v0 = vld [vmem:[#allocation8 + $0xf4] ss:$20 sps:$4 sm:$0xff]   ;;  %v9311_v1 = vmov 0.0  }
 0x1c1   :  { %7620 = vmatprep.subr.bf16.mxu1 %v8428_v2  ;;  %v8499_v2 = vld [vmem:[#allocation8 + $0xf0] ss:$20 sps:$4 sm:$0xff]  }
 0x1c3   :  { %7589 = vmatpush3.bf16.msra.mxu0 %v8407_v3  ;;  %v8507_v3 = vld [vmem:[#allocation8 + $0x11c] ss:$20 sps:$4 sm:$0xff]  }
 0x1c4   :  { %7590 = vmatprep.subr.bf16.mxu0 %v8410_v4  ;;  %7621 = vmatpush3.bf16.msra.mxu1 %v8429_v5  ;;  %v8466_v4 = vld [vmem:[#allocation8 + $0x8] ss:$20 sps:$4 sm:$0xff]  }
 0x1c5   :  { %7650 = vmatprep.subr.bf16.mxu1 %v8432_v6  ;;  %v8474_v5 = vld [vmem:[#allocation8 + $0x34] ss:$20 sps:$4 sm:$0xff]   ;;  %v8505_v6 = vld [vmem:[#allocation8 + $0x118] ss:$20 sps:$4 sm:$0xff]  }
 0x1c7   :  { %7591 = vmatpush3.bf16.msra.mxu0 %v8411_v7  ;;  %2790 = vmatmul.mubr.bf16.vlgmr.msra.gmra.mrb[4].mxu1 %v9495_v17  ;;  %v8427_v17 = vld [vmem:[#allocation5 + $0x128] ss:$20 sps:$4 sm:$0xff]  }
 0x1c8   :  { %7592 = vmatprep.subr.bf16.mxu0 %v8414_v8  ;;  %7651 = vmatpush3.bf16.msra.mxu1 %v8433_v10  ;;  %v8513_v7 = vld [vmem:[#allocation8 + $0x144] ss:$20 sps:$4 sm:$0xff]   ;;  %v8511_v10 = vld [vmem:[#allocation8 + $0x140] ss:$20 sps:$4 sm:$0xff]  }
 0x1c9   :  { %7652 = vmatprep.subr.bf16.mxu1 %v8436_v11  ;;  %2871 = vmatprep.mubr.bf16.mxu1 %v9505_v34  ;;  %v8452_v34 = vld [vmem:[#allocation5 + $0x998] ss:$20 sps:$4 sm:$0xff]   ;;  %v8472_v8 = vld [vmem:[#allocation8 + $0x30] ss:$20 sps:$4 sm:$0xff]  }
 0x1ca   :  { %v8519_v11 = vld [vmem:[#allocation8 + $0x16c] ss:$20 sps:$4 sm:$0xff]  }
 0x1cb   :  { %7593 = vmatpush3.bf16.msra.mxu0 %v8415_v12  ;;  %v8478_v12 = vld [vmem:[#allocation8 + $0x58] ss:$20 sps:$4 sm:$0xff]  }
 0x1cc   :  { %7594 = vmatprep.subr.bf16.mxu0 %v8418_v50  ;;  %7653 = vmatpush3.bf16.msra.mxu1 %v8437_v13  ;;  %v8486_v50 = vld [vmem:[#allocation8 + $0x84] ss:$20 sps:$4 sm:$0xff]   ;;  %v8517_v13 = vld [vmem:[#allocation8 + $0x168] ss:$20 sps:$4 sm:$0xff]  }
 0x1cd   :  { %7654 = vmatprep.subr.bf16.mxu1 %v8440_v14  ;;  %v8525_v14 = vld [vmem:[#allocation8 + $0x194] ss:$20 sps:$4 sm:$0xff]  }
 0x1cf   :  { %7595 = vmatpush3.bf16.msra.mxu0 %v8419_v15  ;;  %v8484_v15 = vld [vmem:[#allocation8 + $0x80] ss:$20 sps:$4 sm:$0xff]  }
 0x1d0   :  { %7596 = vmatprep.subr.bf16.mxu0 %v8422_v16  ;;  %7655 = vmatpush3.bf16.msra.mxu1 %v8441_v18  ;;  %v8492_v16 = vld [vmem:[#allocation8 + $0xac] ss:$20 sps:$4 sm:$0xff]   ;;  %v8523_v18 = vld [vmem:[#allocation8 + $0x190] ss:$20 sps:$4 sm:$0xff]  }
 0x1d1   :  { %7656 = vmatprep.subr.bf16.mxu1 %v8444_v19  ;;  %v8490_v19 = vld [vmem:[#allocation8 + $0xa8] ss:$20 sps:$4 sm:$0xff]  }
 0x1d3   :  { %7597 = vmatpush3.bf16.msra.mxu0 %v8423_v20  ;;  %v8498_v20 = vld [vmem:[#allocation8 + $0xd4] ss:$20 sps:$4 sm:$0xff]  }
 0x1d4   :  { %7598 = vmatprep.subr.bf16.mxu0 %v8426_v21  ;;  %7657 = vmatpush3.bf16.msra.mxu1 %v8445_v22  ;;  %v8529_v21 = vld [vmem:[#allocation8 + $0x1b8] ss:$20 sps:$4 sm:$0xff]  }
 0x1d5   :  { %7658 = vmatprep.subr.bf16.mxu1 %v8448_v23  ;;  %v8537_v22 = vld [vmem:[#allocation8 + $0x1e4] ss:$20 sps:$4 sm:$0xff]  }
 0x1d6   :  { %v8496_v23 = vld [vmem:[#allocation8 + $0xd0] ss:$20 sps:$4 sm:$0xff]  }
 0x1d7   :  { %7599 = vmatpush3.bf16.msra.mxu0 %v8427_v17  ;;  %v8504_v17 = vld [vmem:[#allocation8 + $0xfc] ss:$20 sps:$4 sm:$0xff]  }
 0x1d8   :  { %7628 = vmatprep.subr.bf16.mxu0 %v8430_v25  ;;  %7659 = vmatpush3.bf16.msra.mxu1 %v8449_v26  ;;  %v8535_v25 = vld [vmem:[#allocation8 + $0x1e0] ss:$20 sps:$4 sm:$0xff]   ;;  %v8502_v26 = vld [vmem:[#allocation8 + $0xf8] ss:$20 sps:$4 sm:$0xff]  }
 0x1d9   :  { %7660 = vmatprep.subr.bf16.mxu1 %v8452_v34  ;;  %v8543_v34 = vld [vmem:[#allocation8 + $0x20c] ss:$20 sps:$4 sm:$0xff]  }
 0x1da   :  { %2749 = vmatmul.mubr.bf16.vlgmr.msra.gmra.mrb[8].mxu0 %v9487_v9  ;;  %v8463_v9 = vld [vmem:[#allocation8] ss:$20 sps:$4 sm:$0xff]  }
 0x1db   :  { %7629 = vmatpush3.bf16.msra.mxu0 %v8431_v27  ;;  %2830 = vmatprep.mubr.bf16.mxu0 %v9499_v24  ;;  %v8450_v24 = vld [vmem:[#allocation5 + $0x718] ss:$20 sps:$4 sm:$0xff]   ;;  %v8510_v27 = vld [vmem:[#allocation8 + $0x124] ss:$20 sps:$4 sm:$0xff]  }
 0x1dc   :  { %7630 = vmatprep.subr.bf16.mxu0 %v8434_v28  ;;  %7661 = vmatpush3.bf16.msra.mxu1 %v8453_v30  ;;  %v8541_v28 = vld [vmem:[#allocation8 + $0x208] ss:$20 sps:$4 sm:$0xff]   ;;  %v8508_v30 = vld [vmem:[#allocation8 + $0x120] ss:$20 sps:$4 sm:$0xff]  }
 0x1dd   :  { %7662 = vmatprep.subr.bf16.mxu1 %v8456_v31  ;;  %v8549_v31 = vld [vmem:[#allocation8 + $0x234] ss:$20 sps:$4 sm:$0xff]  }
 0x1df   :  { %7631 = vmatpush3.bf16.msra.mxu0 %v8435_v32  ;;  %v8516_v32 = vld [vmem:[#allocation8 + $0x14c] ss:$20 sps:$4 sm:$0xff]  }
 0x1e0   :  { %7632 = vmatprep.subr.bf16.mxu0 %v8438_v33  ;;  %7663 = vmatpush3.bf16.msra.mxu1 %v8457_v35  ;;  %v8547_v33 = vld [vmem:[#allocation8 + $0x230] ss:$20 sps:$4 sm:$0xff]   ;;  %v8514_v35 = vld [vmem:[#allocation8 + $0x148] ss:$20 sps:$4 sm:$0xff]  }
 0x1e1   :  { %7664 = vmatprep.subr.bf16.mxu1 %v8460_v37  ;;  %v8555_v37 = vld [vmem:[#allocation8 + $0x25c] ss:$20 sps:$4 sm:$0xff]  }
 0x1e3   :  { %7633 = vmatpush3.bf16.msra.mxu0 %v8439_v38  ;;  %v8522_v38 = vld [vmem:[#allocation8 + $0x174] ss:$20 sps:$4 sm:$0xff]  }
 0x1e4   :  { %7634 = vmatprep.subr.bf16.mxu0 %v8442_v39  ;;  %7665 = vmatpush3.bf16.msra.mxu1 %v8461_v41  ;;  %v8553_v39 = vld [vmem:[#allocation8 + $0x258] ss:$20 sps:$4 sm:$0xff]  }
 0x1e5   :  { %4243 = vmatprep.subr.bf16.mxu1 %v8465_v42  ;;  %v8561_v41 = vld [vmem:[#allocation8 + $0x284] ss:$20 sps:$4 sm:$0xff]  }
 0x1e6   :  { %v8520_v42 = vld [vmem:[#allocation8 + $0x170] ss:$20 sps:$4 sm:$0xff]  }
 0x1e7   :  { %7635 = vmatpush3.bf16.msra.mxu0 %v8443_v43  ;;  %2872 = vmatmul.mubr.bf16.vlgmr.msra.gmra.mrb[8].mxu1 %v9511_v40  ;;  %v8459_v40 = vld [vmem:[#allocation5 + $0x628] ss:$20 sps:$4 sm:$0xff]  }
 0x1e8   :  { %7636 = vmatprep.subr.bf16.mxu0 %v8446_v44  ;;  %4244 = vmatpush1.bf16.msra.mxu1 %v8463_v9  ;;  %v8528_v43 = vld [vmem:[#allocation8 + $0x19c] ss:$20 sps:$4 sm:$0xff]   ;;  %v8526_v44 = vld [vmem:[#allocation8 + $0x198] ss:$20 sps:$4 sm:$0xff]  }
 0x1e9   :  { %4245 = vmatprep.subr.bf16.mxu1 %v8471_v46  ;;  %v8534_v9 = vld [vmem:[#allocation8 + $0x1c4] ss:$20 sps:$4 sm:$0xff]   ;;  %v8532_v46 = vld [vmem:[#allocation8 + $0x1c0] ss:$20 sps:$4 sm:$0xff]  }
 0x1eb   :  { %7637 = vmatpush3.bf16.msra.mxu0 %v8447_v47  ;;  %v8540_v47 = vld [vmem:[#allocation8 + $0x1ec] ss:$20 sps:$4 sm:$0xff]  }
 0x1ec   :  { %7638 = vmatprep.subr.bf16.mxu0 %v8450_v24  ;;  %4246 = vmatpush1.bf16.msra.mxu1 %v8469_v48  ;;  %v8538_v24 = vld [vmem:[#allocation8 + $0x1e8] ss:$20 sps:$4 sm:$0xff]  }
 0x1ed   :  { %4247 = vmatprep.subr.bf16.mxu1 %v8477_v49  ;;  %v8546_v48 = vld [vmem:[#allocation8 + $0x214] ss:$20 sps:$4 sm:$0xff]   ;;  %v8544_v49 = vld [vmem:[#allocation8 + $0x210] ss:$20 sps:$4 sm:$0xff]  }
 0x1ef   :  { %7639 = vmatpush3.bf16.msra.mxu0 %v8451_v51  ;;  %v8552_v51 = vld [vmem:[#allocation8 + $0x23c] ss:$20 sps:$4 sm:$0xff]  }
 0x1f0   :  { %7640 = vmatprep.subr.bf16.mxu0 %v8454_v52  ;;  %4248 = vmatpush1.bf16.msra.mxu1 %v8475_v54  ;;  %v8550_v52 = vld [vmem:[#allocation8 + $0x238] ss:$20 sps:$4 sm:$0xff]  }
 0x1f1   :  { %4249 = vmatprep.subr.bf16.mxu1 %v8483_v55  ;;  %v8558_v54 = vld [vmem:[#allocation8 + $0x264] ss:$20 sps:$4 sm:$0xff]   ;;  %v8556_v55 = vld [vmem:[#allocation8 + $0x260] ss:$20 sps:$4 sm:$0xff]  }
 0x1f3   :  { %7641 = vmatpush3.bf16.msra.mxu0 %v8455_v56  ;;  %v8564_v56 = vld [vmem:[#allocation8 + $0x28c] ss:$20 sps:$4 sm:$0xff]  }
 0x1f4   :  { %7642 = vmatprep.subr.bf16.mxu0 %v8458_v57  ;;  %4250 = vmatpush1.bf16.msra.mxu1 %v8481_v36  ;;  %v567_v57 = vlaneseq }
 0x1f5   :  { %4251 = vmatprep.subr.bf16.mxu1 %v8489_v58 }
 0x1f7   :  { %7643 = vmatpush3.bf16.msra.mxu0 %v8459_v40 }
 0x1f8   :  { %7833 = vmatprep.subr.bf16.mxu0 %v9311_v1  ;;  %4252 = vmatpush1.bf16.msra.mxu1 %v8487_v59  ;;  %v9536_v59 = vshrl.u32 %v567_v57, 7  ;;  %v8588_v57 = vld [vmem:[#allocation8 + $0x32c] ss:$20 sps:$4 sm:$0xff]  }
 0x1f9   :  { %4253 = vmatprep.subr.bf16.mxu1 %v8495_v60 }
 0x1fa   :  { %2831 = vmatmul.mubr.bf16.vlgmr.msra.gmra.mrb[12].mxu0 %v9503_v29  ;;  %v8480_v29 = vld [vmem:[#allocation8 + $0x5c] ss:$20 sps:$4 sm:$0xff]  }
 0x1fb   :  { %7834 = vmatpush3.bf16.msra.mxu0 %v8462_v61  ;;  %7835 = vmatprep.mubr.msk.bf16.mxu0 %vm9312_vm1, %v9311_v1  ;;  %v9539_v61 = vsub.s32 0, %v9536_v59 }
 0x1fc   :  { %4372 = vmatprep.subr.bf16.mxu0 %v8468_v62  ;;  %4254 = vmatpush1.bf16.msra.mxu1 %v8493_v63  ;;  %v9542_v62 = vsub.s32 1, %v9536_v59  ;;  %v9544_v63 = vld [vmem:[#allocation7] sm:$0x1f] }
 0x1fd   :  { %4255 = vmatprep.subr.bf16.mxu1 %v8501_v0  ;;  %v570_v0 = vrot.slane %v9544_v63, %v9539_v61 }
 0x200   :  { %4256 = vmatpush1.bf16.msra.mxu1 %v8499_v2  ;;  %v574_v2 = vrot.slane %v9544_v63, %v9542_v62 }
 0x201   :  { %4257 = vmatprep.subr.bf16.mxu1 %v8507_v3  ;;  %v9551_v3 = vsub.s32 2, %v9536_v59 }
 0x202   :  { %7836 = vmatmul.mubr.msk.bf16.vlgmr.msra.gmra.mrb[16].mxu0 %vm2282_vm0, %v9517_v53  ;;  %v8531_v53 = vld [vmem:[#allocation8 + $0x1bc] ss:$20 sps:$4 sm:$0xff]  }
 0x203   :  { %4373 = vmatpush1.bf16.msra.mxu0 %v8466_v4  ;;  %v9554_v4 = vsub.s32 3, %v9536_v59 }
 0x204   :  { %4374 = vmatprep.subr.bf16.mxu0 %v8474_v5  ;;  %4258 = vmatpush1.bf16.msra.mxu1 %v8505_v6 }
 0x205   :  { %4259 = vmatprep.subr.bf16.mxu1 %v8513_v7 }
 0x207   :  { %4375 = vmatpush1.bf16.msra.mxu0 %v8472_v8 }
 0x208   :  { %4376 = vmatprep.subr.bf16.mxu0 %v8480_v29  ;;  %4260 = vmatpush1.bf16.msra.mxu1 %v8511_v10  ;;  %v578_v10 = vrot.slane %v9544_v63, %v9551_v3 }
 0x209   :  { %4261 = vmatprep.subr.bf16.mxu1 %v8519_v11 }
 0x20b   :  { %4377 = vmatpush1.bf16.msra.mxu0 %v8478_v12 }
 0x20c   :  { %4378 = vmatprep.subr.bf16.mxu0 %v8486_v50  ;;  %4262 = vmatpush1.bf16.msra.mxu1 %v8517_v13  ;;  %v582_v50 = vrot.slane %v9544_v63, %v9554_v4 }
 0x20d   :  { %4263 = vmatprep.subr.bf16.mxu1 %v8525_v14 }
 0x20f   :  { %4379 = vmatpush1.bf16.msra.mxu0 %v8484_v15 }
 0x210   :  { %4380 = vmatprep.subr.bf16.mxu0 %v8492_v16  ;;  %4264 = vmatpush1.bf16.msra.mxu1 %v8523_v18 }
 0x211   :  { %4265 = vmatprep.subr.bf16.mxu1 %v8531_v53  ;;  %v8559_v53 = vld [vmem:[#allocation8 + $0x280] ss:$20 sps:$4 sm:$0xff]  }
 0x213   :  { %4381 = vmatpush1.bf16.msra.mxu0 %v8490_v19  ;;  %v8562_v19 = vld [vmem:[#allocation8 + $0x288] ss:$20 sps:$4 sm:$0xff]  }
 0x214   :  { %4382 = vmatprep.subr.bf16.mxu0 %v8498_v20  ;;  %4266 = vmatpush1.bf16.msra.mxu1 %v8529_v21 }
 0x215   :  { %4267 = vmatprep.subr.bf16.mxu1 %v8537_v22  ;;  %v8567_v22 = vld [vmem:[#allocation8 + $0x2ac] ss:$20 sps:$4 sm:$0xff]  }
 0x217   :  { %4383 = vmatpush1.bf16.msra.mxu0 %v8496_v23  ;;  %v8570_v23 = vld [vmem:[#allocation8 + $0x2b4] ss:$20 sps:$4 sm:$0xff]  }
 0x218   :  { %4384 = vmatprep.subr.bf16.mxu0 %v8504_v17  ;;  %4268 = vmatpush1.bf16.msra.mxu1 %v8535_v25 }
 0x219   :  { %4269 = vmatprep.subr.bf16.mxu1 %v8543_v34 }
 0x21b   :  { %4385 = vmatpush1.bf16.msra.mxu0 %v8502_v26 }
 0x21c   :  { %4386 = vmatprep.subr.bf16.mxu0 %v8510_v27  ;;  %4270 = vmatpush1.bf16.msra.mxu1 %v8541_v28 }
 0x21d   :  { %4271 = vmatprep.subr.bf16.mxu1 %v8549_v31 }
 0x21f   :  { %4387 = vmatpush1.bf16.msra.mxu0 %v8508_v30 }
 0x220   :  { %4388 = vmatprep.subr.bf16.mxu0 %v8516_v32  ;;  %4272 = vmatpush1.bf16.msra.mxu1 %v8547_v33  ;;  %v8565_v33 = vld [vmem:[#allocation8 + $0x2a8] ss:$20 sps:$4 sm:$0xff]  }
 0x221   :  { %4273 = vmatprep.subr.bf16.mxu1 %v8555_v37 }
 0x223   :  { %4389 = vmatpush1.bf16.msra.mxu0 %v8514_v35 }
 0x224   :  { %4390 = vmatprep.subr.bf16.mxu0 %v8522_v38  ;;  %4274 = vmatpush1.bf16.msra.mxu1 %v8553_v39  ;;  %v8568_v38 = vld [vmem:[#allocation8 + $0x2b0] ss:$20 sps:$4 sm:$0xff]  }
 0x225   :  { %4286 = vmatprep.subr.bf16.mxu1 %v8561_v41  ;;  %v8573_v41 = vld [vmem:[#allocation8 + $0x2d4] ss:$20 sps:$4 sm:$0xff]  }
 0x227   :  { %4391 = vmatpush1.bf16.msra.mxu0 %v8520_v42 }
 0x228   :  { %4392 = vmatprep.subr.bf16.mxu0 %v8528_v43 }
 0x22b   :  { %4393 = vmatpush1.bf16.msra.mxu0 %v8526_v44  ;;  %v8576_v44 = vld [vmem:[#allocation8 + $0x2dc] ss:$20 sps:$4 sm:$0xff]  }
 0x22c   :  { %4394 = vmatprep.subr.bf16.mxu0 %v8534_v9 }
 0x22f   :  { %4395 = vmatpush1.bf16.msra.mxu0 %v8532_v46 }
 0x230   :  { %4396 = vmatprep.subr.bf16.mxu0 %v8540_v47  ;;  %v8571_v47 = vld [vmem:[#allocation8 + $0x2d0] ss:$20 sps:$4 sm:$0xff]  }
 0x233   :  { %4397 = vmatpush1.bf16.msra.mxu0 %v8538_v24  ;;  %v8574_v24 = vld [vmem:[#allocation8 + $0x2d8] ss:$20 sps:$4 sm:$0xff]  }
 0x234   :  { %4398 = vmatprep.subr.bf16.mxu0 %v8546_v48 }
 0x237   :  { %4399 = vmatpush1.bf16.msra.mxu0 %v8544_v49  ;;  %v8579_v49 = vld [vmem:[#allocation8 + $0x2fc] ss:$20 sps:$4 sm:$0xff]  }
 0x238   :  { %4400 = vmatprep.subr.bf16.mxu0 %v8552_v51 }
 0x23b   :  { %4401 = vmatpush1.bf16.msra.mxu0 %v8550_v52  ;;  %v8582_v52 = vld [vmem:[#allocation8 + $0x304] ss:$20 sps:$4 sm:$0xff]  }
 0x23c   :  { %4402 = vmatprep.subr.bf16.mxu0 %v8558_v54  ;;  %v8577_v54 = vld [vmem:[#allocation8 + $0x2f8] ss:$20 sps:$4 sm:$0xff]  }
 0x23f   :  { %4403 = vmatpush1.bf16.msra.mxu0 %v8556_v55  ;;  %v8580_v55 = vld [vmem:[#allocation8 + $0x300] ss:$20 sps:$4 sm:$0xff]  }
 0x240   :  { %4415 = vmatprep.subr.bf16.mxu0 %v8564_v56  ;;  %v8585_v56 = vld [vmem:[#allocation8 + $0x324] ss:$20 sps:$4 sm:$0xff]  }
 0x279   :  { %v2664_v36 = vpop.f32.mrb[0].mxu1 }
 0x27a   :  { %v2666_v58 = vpop.f32.mrb[1].mxu1  ;;  %v7903_v20 = vadd.f32 %v2664_v36, %v578_v10 }
 0x27b   :  { %v2668_v40 = vpop.f32.mrb[2].mxu1  ;;  %v7905_v17 = vadd.f32 %v2666_v58, %v582_v50 }
 0x27c   :  { %v2670_v60 = vpop.f32.mrb[3].mxu1  ;;  %v7907_v34 = vadd.f32 %v2668_v40, %v578_v10  ;;  %v8592_v10 = vld [vmem:[#allocation8 + $0x350] ss:$20 sps:$4 sm:$0xff]  }
 0x27d   :  { %v7909_v30 = vadd.f32 %v2670_v60, %v582_v50  ;;  %v8595_v50 = vld [vmem:[#allocation8 + $0x370] ss:$20 sps:$4 sm:$0xff]  }
 0x285   :  { %v2492_v5 = vpop.f32.mrb[0].mxu0 }
 0x286   :  { %v7899_v6 = vadd.f32 %v2492_v5, %v570_v0  ;;  %v2494_v7 = vpop.f32.mrb[1].mxu0 }
 0x287   :  { %v7900_v8 = vadd.f32 %v2494_v7, %v574_v2  ;;  %v2496_v29 = vpop.f32.mrb[2].mxu0  ;;  %v8594_v7 = vld [vmem:[#allocation8 + $0x354] ss:$20 sps:$4 sm:$0xff]  }
 0x288   :  { %v7901_v11 = vadd.f32 %v2496_v29, %v570_v0  ;;  %v2498_v12 = vpop.f32.mrb[3].mxu0  ;;  %v2921_v14 = vmax.f32 %v7899_v6, 0.0  ;;  %v8583_v0 = vld [vmem:[#allocation8 + $0x320] ss:$20 sps:$4 sm:$0xff]   ;;  %v8589_v29 = vld [vmem:[#allocation8 + $0x348] ss:$20 sps:$4 sm:$0xff]  }
 0x289   :  { %v7902_v13 = vadd.f32 %v2498_v12, %v574_v2  ;;  %v2922_v16 = vmax.f32 %v7900_v8, 0.0  ;;  %v8586_v2 = vld [vmem:[#allocation8 + $0x328] ss:$20 sps:$4 sm:$0xff]   ;;  %v8591_v6 = vld [vmem:[#allocation8 + $0x34c] ss:$20 sps:$4 sm:$0xff]  }
 0x28a   :  { %v2926_v15 = vmax.f32 %v7901_v11, 0.0  ;;  %v8597_v11 = vld [vmem:[#allocation8 + $0x374] ss:$20 sps:$4 sm:$0xff]   ;;  %v8600_v12 = vld [vmem:[#allocation8 + $0x37c] ss:$20 sps:$4 sm:$0xff]  }
 0x28b   :  { %v2927_v18 = vmax.f32 %v7902_v13, 0.0  ;;  %v8598_v13 = vld [vmem:[#allocation8 + $0x378] ss:$20 sps:$4 sm:$0xff]  }
 0x28c   :  { %v9560_v21 = vpack.c.bf16 %v2926_v15, %v2921_v14  ;;  %v8603_v14 = vld [vmem:[#allocation8 + $0x39c] ss:$20 sps:$4 sm:$0xff]   ;;  %v8606_v15 = vld [vmem:[#allocation8 + $0x3a4] ss:$20 sps:$4 sm:$0xff]  }
 0x28d   :  { %v9562_v25 = vpack.c.bf16 %v2927_v18, %v2922_v16  ;;  %v2707_v26 = vpop.f32.mrb[4].mxu0  ;;  %v8601_v16 = vld [vmem:[#allocation8 + $0x398] ss:$20 sps:$4 sm:$0xff]   ;;  %v8604_v18 = vld [vmem:[#allocation8 + $0x3a0] ss:$20 sps:$4 sm:$0xff]  }
 0x28e   :  { %v7904_v27 = vadd.f32 %v7903_v20, %v2707_v26  ;;  %v2709_v28 = vpop.f32.mrb[5].mxu0  ;;  %v8612_v20 = vld [vmem:[#allocation8 + $0x3cc] ss:$20 sps:$4 sm:$0xff]  }
 0x28f   :  { %v7906_v31 = vadd.f32 %v7905_v17, %v2709_v28  ;;  %v2711_v32 = vpop.f32.mrb[6].mxu0  ;;  %4275 = vmatprep.mubr.bf16.mxu1 %v9562_v25  ;;  %4404 = vmatprep.mubr.bf16.mxu0 %v9562_v25 }
 0x290   :  { %v7908_v35 = vadd.f32 %v7907_v34, %v2711_v32  ;;  %v2713_v37 = vpop.f32.mrb[7].mxu0  ;;  %4276 = vmatmul.mubr.bf16.vlgmr.msra.gmra.mrb[12].mxu1 %v9560_v21  ;;  %4405 = vmatmul.mubr.bf16.vlgmr.msra.gmra.mrb[20].mxu0 %v9560_v21  ;;  %v2923_v42 = vmax.f32 %v7904_v27, 0.0  ;;  %v8615_v34 = vld [vmem:[#allocation8 + $0x3ec] ss:$20 sps:$4 sm:$0xff]   ;;  %v8618_v27 = vld [vmem:[#allocation8 + $0x3f4] ss:$20 sps:$4 sm:$0xff]  }
 0x291   :  { %v7910_v39 = vadd.f32 %v7909_v30, %v2713_v37  ;;  %4287 = vmatpush1.bf16.msra.mxu1 %v8559_v53  ;;  %4416 = vmatpush1.bf16.msra.mxu0 %v8562_v19  ;;  %v2924_v9 = vmax.f32 %v7906_v31, 0.0  ;;  %v9575_v53 = vsub.s32 4, %v9536_v59  ;;  %v8609_v19 = vld [vmem:[#allocation8 + $0x3c4] ss:$20 sps:$4 sm:$0xff]   ;;  %v8613_v32 = vld [vmem:[#allocation8 + $0x3e8] ss:$20 sps:$4 sm:$0xff]  }
 0x292   :  { %v2928_v43 = vmax.f32 %v7908_v35, 0.0  ;;  %4288 = vmatprep.subr.bf16.mxu1 %v8567_v22  ;;  %4417 = vmatprep.subr.bf16.mxu0 %v8570_v23  ;;  %v8607_v22 = vld [vmem:[#allocation8 + $0x3c0] ss:$20 sps:$4 sm:$0xff]   ;;  %v8610_v23 = vld [vmem:[#allocation8 + $0x3c8] ss:$20 sps:$4 sm:$0xff]  }
 0x293   :  { %v2929_v46 = vmax.f32 %v7910_v39, 0.0  ;;  %v586_v26 = vrot.slane %v9544_v63, %v9575_v53  ;;  %v8624_v39 = vld [vmem:[#allocation8 + $0x41c] ss:$20 sps:$4 sm:$0xff]  }
 0x294   :  { %v9568_v48 = vpack.c.bf16 %v2928_v43, %v2923_v42  ;;  %v8619_v42 = vld [vmem:[#allocation8 + $0x410] ss:$20 sps:$4 sm:$0xff]   ;;  %v8622_v43 = vld [vmem:[#allocation8 + $0x418] ss:$20 sps:$4 sm:$0xff]  }
 0x295   :  { %v9570_v51 = vpack.c.bf16 %v2929_v46, %v2924_v9  ;;  %4289 = vmatpush1.bf16.msra.mxu1 %v8565_v33  ;;  %4418 = vmatpush1.bf16.msra.mxu0 %v8568_v38  ;;  %v8616_v33 = vld [vmem:[#allocation8 + $0x3f0] ss:$20 sps:$4 sm:$0xff]   ;;  %v8621_v38 = vld [vmem:[#allocation8 + $0x414] ss:$20 sps:$4 sm:$0xff]  }
 0x296   :  { %4290 = vmatprep.subr.bf16.mxu1 %v8573_v41  ;;  %4419 = vmatprep.subr.bf16.mxu0 %v8576_v44  ;;  %v8627_v9 = vld [vmem:[#allocation8 + $0x43c] ss:$20 sps:$4 sm:$0xff]   ;;  %v8630_v46 = vld [vmem:[#allocation8 + $0x444] ss:$20 sps:$4 sm:$0xff]  }
 0x297   :  { %4318 = vmatprep.mubr.bf16.mxu1 %v9570_v51  ;;  %4447 = vmatprep.mubr.bf16.mxu0 %v9570_v51 }
 0x299   :  { %4291 = vmatpush1.bf16.msra.mxu1 %v8571_v47  ;;  %4420 = vmatpush1.bf16.msra.mxu0 %v8574_v24  ;;  %v8625_v47 = vld [vmem:[#allocation8 + $0x438] ss:$20 sps:$4 sm:$0xff]   ;;  %v8628_v24 = vld [vmem:[#allocation8 + $0x440] ss:$20 sps:$4 sm:$0xff]  }
 0x29a   :  { %4292 = vmatprep.subr.bf16.mxu1 %v8579_v49  ;;  %4421 = vmatprep.subr.bf16.mxu0 %v8582_v52  ;;  %v7622_v36 = vpop.f32.mrb[4].mxu1  ;;  %v8633_v49 = vld [vmem:[#allocation8 + $0x464] ss:$20 sps:$4 sm:$0xff]   ;;  %v8636_v52 = vld [vmem:[#allocation8 + $0x46c] ss:$20 sps:$4 sm:$0xff]  }
 0x29b   :  { %v7623_v58 = vpop.f32.mrb[5].mxu1 }
 0x29c   :  { %v7624_v40 = vadd.f32 %v7623_v58, %v7622_v36  ;;  %v7625_v60 = vpop.f32.mrb[6].mxu1  ;;  %v8631_v36 = vld [vmem:[#allocation8 + $0x460] ss:$20 sps:$4 sm:$0xff]   ;;  %v8634_v58 = vld [vmem:[#allocation8 + $0x468] ss:$20 sps:$4 sm:$0xff]  }
 0x29d   :  { %4293 = vmatpush1.bf16.msra.mxu1 %v8577_v54  ;;  %4422 = vmatpush1.bf16.msra.mxu0 %v8580_v55  ;;  %v7626_v5 = vpop.f32.mrb[7].mxu1 }
 0x29e   :  { %4294 = vmatprep.subr.bf16.mxu1 %v8585_v56  ;;  %4423 = vmatprep.subr.bf16.mxu0 %v8588_v57  ;;  %v7627_v8 = vadd.f32 %v7626_v5, %v7625_v60  ;;  %v8639_v60 = vld [vmem:[#allocation8 + $0x48c] ss:$20 sps:$4 sm:$0xff]   ;;  %v8637_v5 = vld [vmem:[#allocation8 + $0x488] ss:$20 sps:$4 sm:$0xff]  }
 0x2a1   :  { %4295 = vmatpush1.bf16.msra.mxu1 %v8583_v0  ;;  %4424 = vmatpush1.bf16.msra.mxu0 %v8586_v2  ;;  %v8642_v0 = vld [vmem:[#allocation8 + $0x494] ss:$20 sps:$4 sm:$0xff]  }
 0x2a2   :  { %4296 = vmatprep.subr.bf16.mxu1 %v8591_v6  ;;  %4425 = vmatprep.subr.bf16.mxu0 %v8594_v7  ;;  %v8640_v6 = vld [vmem:[#allocation8 + $0x490] ss:$20 sps:$4 sm:$0xff]   ;;  %v8645_v7 = vld [vmem:[#allocation8 + $0x4b4] ss:$20 sps:$4 sm:$0xff]  }
 0x2a5   :  { %4297 = vmatpush1.bf16.msra.mxu1 %v8589_v29  ;;  %4426 = vmatpush1.bf16.msra.mxu0 %v8592_v10  ;;  %v8643_v29 = vld [vmem:[#allocation8 + $0x4b0] ss:$20 sps:$4 sm:$0xff]   ;;  %v8646_v10 = vld [vmem:[#allocation8 + $0x4b8] ss:$20 sps:$4 sm:$0xff]  }
 0x2a6   :  { %4298 = vmatprep.subr.bf16.mxu1 %v8597_v11  ;;  %4427 = vmatprep.subr.bf16.mxu0 %v8600_v12  ;;  %v8651_v11 = vld [vmem:[#allocation8 + $0x4dc] ss:$20 sps:$4 sm:$0xff]   ;;  %v8654_v12 = vld [vmem:[#allocation8 + $0x4e4] ss:$20 sps:$4 sm:$0xff]  }
 0x2a9   :  { %4299 = vmatpush1.bf16.msra.mxu1 %v8595_v50  ;;  %4428 = vmatpush1.bf16.msra.mxu0 %v8598_v13  ;;  %v8649_v50 = vld [vmem:[#allocation8 + $0x4d8] ss:$20 sps:$4 sm:$0xff]   ;;  %v8652_v13 = vld [vmem:[#allocation8 + $0x4e0] ss:$20 sps:$4 sm:$0xff]  }
 0x2aa   :  { %4300 = vmatprep.subr.bf16.mxu1 %v8603_v14  ;;  %4429 = vmatprep.subr.bf16.mxu0 %v8606_v15  ;;  %v8657_v14 = vld [vmem:[#allocation8 + $0x504] ss:$20 sps:$4 sm:$0xff]   ;;  %v8660_v15 = vld [vmem:[#allocation8 + $0x50c] ss:$20 sps:$4 sm:$0xff]  }
 0x2ad   :  { %4301 = vmatpush1.bf16.msra.mxu1 %v8601_v16  ;;  %4430 = vmatpush1.bf16.msra.mxu0 %v8604_v18  ;;  %v7600_v17 = vpop.f32.mrb[8].mxu0  ;;  %v8655_v18 = vld [vmem:[#allocation8 + $0x500] ss:$20 sps:$4 sm:$0xff]  }
 0x2ae   :  { %4302 = vmatprep.subr.bf16.mxu1 %v8609_v19  ;;  %4431 = vmatprep.subr.bf16.mxu0 %v8612_v20  ;;  %v7601_v28 = vpop.f32.mrb[9].mxu0  ;;  %v8658_v19 = vld [vmem:[#allocation8 + $0x508] ss:$20 sps:$4 sm:$0xff]  }
 0x2af   :  { %v7602_v30 = vadd.f32 %v7601_v28, %v7600_v17  ;;  %v7603_v59 = vpop.f32.mrb[10].mxu0 }
 0x2b0   :  { %v7604_v31 = vpop.f32.mrb[11].mxu0 }
 0x2b1   :  { %4303 = vmatpush1.bf16.msra.mxu1 %v8607_v22  ;;  %4432 = vmatpush1.bf16.msra.mxu0 %v8610_v23  ;;  %v2751_v35 = vadd.f32 %v7602_v30, %v586_v26  ;;  %v7605_v37 = vadd.f32 %v7604_v31, %v7603_v59  ;;  %v8663_v22 = vld [vmem:[#allocation8 + $0x52c] ss:$20 sps:$4 sm:$0xff]   ;;  %v8666_v23 = vld [vmem:[#allocation8 + $0x534] ss:$20 sps:$4 sm:$0xff]   ;;  %v8664_v59 = vld [vmem:[#allocation8 + $0x530] ss:$20 sps:$4 sm:$0xff]  }
 0x2b2   :  { %4304 = vmatprep.subr.bf16.mxu1 %v8615_v34  ;;  %4433 = vmatprep.subr.bf16.mxu0 %v8618_v27  ;;  %v8661_v30 = vld [vmem:[#allocation8 + $0x528] ss:$20 sps:$4 sm:$0xff]  }
 0x2b3   :  { %v2754_v41 = vadd.f32 %v7605_v37, %v586_v26  ;;  %v9579_v63 = vadd.f32 %v7624_v40, %v2751_v35  ;;  %v8669_v31 = vld [vmem:[#allocation8 + $0x554] ss:$20 sps:$4 sm:$0xff]  }
 0x2b5   :  { %4305 = vmatpush1.bf16.msra.mxu1 %v8613_v32  ;;  %4434 = vmatpush1.bf16.msra.mxu0 %v8616_v33  ;;  %v9581_v44 = vadd.f32 %v7627_v8, %v2754_v41  ;;  %v8648_v8 = vld [vmem:[#allocation8 + $0x4bc] ss:$20 sps:$4 sm:$0xff]   ;;  %v8670_v41 = vld [vmem:[#allocation8 + $0x558] ss:$20 sps:$4 sm:$0xff]  }
 0x2b6   :  { %4306 = vmatprep.subr.bf16.mxu1 %v8621_v38  ;;  %4435 = vmatprep.subr.bf16.mxu0 %v8624_v39  ;;  %v8672_v32 = vld [vmem:[#allocation8 + $0x55c] ss:$20 sps:$4 sm:$0xff]  }
 0x2b7   :  { %v8667_v39 = vld [vmem:[#allocation8 + $0x550] ss:$20 sps:$4 sm:$0xff]  }
 0x2b9   :  { %4307 = vmatpush1.bf16.msra.mxu1 %v8619_v42  ;;  %4436 = vmatpush1.bf16.msra.mxu0 %v8622_v43  ;;  %v8675_v43 = vld [vmem:[#allocation8 + $0x57c] ss:$20 sps:$4 sm:$0xff]  }
 0x2ba   :  { %4308 = vmatprep.subr.bf16.mxu1 %v8627_v9  ;;  %4437 = vmatprep.subr.bf16.mxu0 %v8630_v46  ;;  %v7666_v54 = vpop.f32.mrb[8].mxu1  ;;  %v8678_v9 = vld [vmem:[#allocation8 + $0x584] ss:$20 sps:$4 sm:$0xff]  }
 0x2bb   :  { %v7667_v55 = vpop.f32.mrb[9].mxu1 }
 0x2bc   :  { %v7668_v56 = vadd.f32 %v7667_v55, %v7666_v54  ;;  %v7669_v57 = vpop.f32.mrb[10].mxu1  ;;  %v8681_v55 = vld [vmem:[#allocation8 + $0x5a4] ss:$20 sps:$4 sm:$0xff]  }
 0x2bd   :  { %4309 = vmatpush1.bf16.msra.mxu1 %v8625_v47  ;;  %4438 = vmatpush1.bf16.msra.mxu0 %v8628_v24  ;;  %v7670_v40 = vpop.f32.mrb[11].mxu1  ;;  %v8673_v24 = vld [vmem:[#allocation8 + $0x578] ss:$20 sps:$4 sm:$0xff]  }
 0x2be   :  { %4310 = vmatprep.subr.bf16.mxu1 %v8633_v49  ;;  %4439 = vmatprep.subr.bf16.mxu0 %v8636_v52  ;;  %v7671_v2 = vadd.f32 %v7670_v40, %v7669_v57  ;;  %v8676_v49 = vld [vmem:[#allocation8 + $0x580] ss:$20 sps:$4 sm:$0xff]  }
 0x2bf   :  { %v8687_v40 = vld [vmem:[#allocation8 + $0x5cc] ss:$20 sps:$4 sm:$0xff]  }
 0x2c1   :  { %4311 = vmatpush1.bf16.msra.mxu1 %v8631_v36  ;;  %4440 = vmatpush1.bf16.msra.mxu0 %v8634_v58  ;;  %v8679_v36 = vld [vmem:[#allocation8 + $0x5a0] ss:$20 sps:$4 sm:$0xff]   ;;  %v8682_v58 = vld [vmem:[#allocation8 + $0x5a8] ss:$20 sps:$4 sm:$0xff]  }
 0x2c2   :  { %4312 = vmatprep.subr.bf16.mxu1 %v8639_v60  ;;  %4441 = vmatprep.subr.bf16.mxu0 %v8642_v0  ;;  %v8690_v60 = vld [vmem:[#allocation8 + $0x5d4] ss:$20 sps:$4 sm:$0xff]  }
 0x2c3   :  { %v8685_v0 = vld [vmem:[#allocation8 + $0x5c8] ss:$20 sps:$4 sm:$0xff]  }
 0x2c5   :  { %4313 = vmatpush1.bf16.msra.mxu1 %v8637_v5  ;;  %4442 = vmatpush1.bf16.msra.mxu0 %v8640_v6  ;;  %v8693_v5 = vld [vmem:[#allocation8 + $0x5f4] ss:$20 sps:$4 sm:$0xff]   ;;  %v8696_v6 = vld [vmem:[#allocation8 + $0x5fc] ss:$20 sps:$4 sm:$0xff]  }
 0x2c6   :  { %4314 = vmatprep.subr.bf16.mxu1 %v8645_v7  ;;  %4443 = vmatprep.subr.bf16.mxu0 %v8648_v8  ;;  %v8691_v7 = vld [vmem:[#allocation8 + $0x5f0] ss:$20 sps:$4 sm:$0xff]   ;;  %v8694_v8 = vld [vmem:[#allocation8 + $0x5f8] ss:$20 sps:$4 sm:$0xff]  }
 0x2c9   :  { %4315 = vmatpush1.bf16.msra.mxu1 %v8643_v29  ;;  %4444 = vmatpush1.bf16.msra.mxu0 %v8646_v10  ;;  %v8699_v29 = vld [vmem:[#allocation8 + $0x61c] ss:$20 sps:$4 sm:$0xff]   ;;  %v8702_v10 = vld [vmem:[#allocation8 + $0x624] ss:$20 sps:$4 sm:$0xff]  }
 0x2ca   :  { %4316 = vmatprep.subr.bf16.mxu1 %v8651_v11  ;;  %4445 = vmatprep.subr.bf16.mxu0 %v8654_v12  ;;  %v8697_v11 = vld [vmem:[#allocation8 + $0x618] ss:$20 sps:$4 sm:$0xff]   ;;  %v8700_v12 = vld [vmem:[#allocation8 + $0x620] ss:$20 sps:$4 sm:$0xff]  }
 0x2cd   :  { %v7644_v16 = vpop.f32.mrb[12].mxu0  ;;  %4317 = vmatpush1.bf16.msra.mxu1 %v8649_v50  ;;  %4446 = vmatpush1.bf16.msra.mxu0 %v8652_v13  ;;  %v8703_v50 = vld [vmem:[#allocation8 + $0x150] ss:$20 sps:$4 sm:$0xff]  }
 0x2ce   :  { %v7645_v20 = vpop.f32.mrb[13].mxu0  ;;  %4329 = vmatprep.subr.bf16.mxu1 %v8657_v14  ;;  %4458 = vmatprep.subr.bf16.mxu0 %v8660_v15  ;;  %v8704_v13 = vld [vmem:[#allocation8 + $0x3d0] ss:$20 sps:$4 sm:$0xff]  }
 0x2cf   :  { %v7646_v17 = vadd.f32 %v7645_v20, %v7644_v16  ;;  %v7647_v26 = vpop.f32.mrb[14].mxu0  ;;  %v8705_v14 = vld [vmem:[#allocation8 + $0x10] ss:$20 sps:$4 sm:$0xff]   ;;  %v8707_v16 = vld [vmem:[#allocation8 + $0x178] ss:$20 sps:$4 sm:$0xff]  }
 0x2d0   :  { %v7648_v34 = vpop.f32.mrb[15].mxu0  ;;  %4319 = vmatmul.mubr.bf16.vlgmr.msra.gmra.mrb[12].mxu1 %v9568_v48  ;;  %4448 = vmatmul.mubr.bf16.vlgmr.msra.gmra.mrb[20].mxu0 %v9568_v48  ;;  %v8706_v15 = vld [vmem:[#allocation8 + $0x290] ss:$20 sps:$4 sm:$0xff]   ;;  %v8710_v20 = vld [vmem:[#allocation8 + $0x2b8] ss:$20 sps:$4 sm:$0xff]  }
 0x2d1   :  { %v2833_v27 = vadd.f32 %v7646_v17, %v9579_v63  ;;  %v7649_v28 = vadd.f32 %v7648_v34, %v7647_v26  ;;  %4330 = vmatpush1.bf16.msra.mxu1 %v8655_v18  ;;  %4459 = vmatpush1.bf16.msra.mxu0 %v8658_v19  ;;  %v8708_v18 = vld [vmem:[#allocation8 + $0x3f8] ss:$20 sps:$4 sm:$0xff]   ;;  %v8713_v17 = vld [vmem:[#allocation8 + $0x60] ss:$20 sps:$4 sm:$0xff]   ;;  %v8715_v34 = vld [vmem:[#allocation8 + $0x1c8] ss:$20 sps:$4 sm:$0xff]  }
 0x2d2   :  { %4331 = vmatprep.subr.bf16.mxu1 %v8663_v22  ;;  %4460 = vmatprep.subr.bf16.mxu0 %v8666_v23  ;;  %v8709_v19 = vld [vmem:[#allocation8 + $0x38] ss:$20 sps:$4 sm:$0xff]   ;;  %v8711_v22 = vld [vmem:[#allocation8 + $0x1a0] ss:$20 sps:$4 sm:$0xff]  }
 0x2d3   :  { %v2836_v33 = vadd.f32 %v7649_v28, %v9581_v44  ;;  %v2874_v35 = vadd.f32 %v7668_v56, %v2833_v27  ;;  %4361 = vmatprep.mubr.bf16.mxu1 %v9310_v45  ;;  %4490 = vmatprep.mubr.bf16.mxu0 %v9310_v45  ;;  %v8684_v56 = vld [vmem:[#allocation8 + $0x5ac] ss:$20 sps:$4 sm:$0xff]   ;;  %v8716_v27 = vld [vmem:[#allocation8 + $0x448] ss:$20 sps:$4 sm:$0xff]  }
 0x2d4   :  { %v8712_v23 = vld [vmem:[#allocation8 + $0x420] ss:$20 sps:$4 sm:$0xff]   ;;  %v8717_v28 = vld [vmem:[#allocation8 + $0x88] ss:$20 sps:$4 sm:$0xff]  }
 0x2d5   :  { %v2914_v37 = vpop.f32.mrb[16].mxu0  ;;  %4332 = vmatpush1.bf16.msra.mxu1 %v8661_v30  ;;  %4461 = vmatpush1.bf16.msra.mxu0 %v8664_v59  ;;  %v2877_v38 = vadd.f32 %v7671_v2, %v2836_v33  ;;  %v8688_v2 = vld [vmem:[#allocation8 + $0x5d0] ss:$20 sps:$4 sm:$0xff]   ;;  %v8714_v26 = vld [vmem:[#allocation8 + $0x2e0] ss:$20 sps:$4 sm:$0xff]  }
 0x2d6   :  { %v2915_v63 = vadd.f32 %v2914_v37, %v2874_v35  ;;  %v7837_v42 = vpop.f32.mrb[17].mxu0  ;;  %4333 = vmatprep.subr.bf16.mxu1 %v8669_v31  ;;  %4462 = vmatprep.subr.bf16.mxu0 %v8672_v32  ;;  %v8719_v30 = vld [vmem:[#allocation8 + $0x1f0] ss:$20 sps:$4 sm:$0xff]   ;;  %v8723_v32 = vld [vmem:[#allocation8 + $0x218] ss:$20 sps:$4 sm:$0xff]  }
 0x2d7   :  { %v2917_v46 = vpop.f32.mrb[18].mxu0  ;;  %v8721_v59 = vld [vmem:[#allocation8 + $0xb0] ss:$20 sps:$4 sm:$0xff]   ;;  %v8724_v33 = vld [vmem:[#allocation8 + $0x498] ss:$20 sps:$4 sm:$0xff]  }
 0x2d8   :  { %v2918_v47 = vadd.f32 %v2917_v46, %v2877_v38  ;;  %v7838_v44 = vpop.f32.mrb[19].mxu0  ;;  %v2925_v52 = vmax.f32 %v2915_v63, 0.0  ;;  %v8722_v31 = vld [vmem:[#allocation8 + $0x330] ss:$20 sps:$4 sm:$0xff]   ;;  %v8725_v35 = vld [vmem:[#allocation8 + $0xd8] ss:$20 sps:$4 sm:$0xff]  }
 0x2d9   :  { %4334 = vmatpush1.bf16.msra.mxu1 %v8667_v39  ;;  %4463 = vmatpush1.bf16.msra.mxu0 %v8670_v41  ;;  %v8726_v37 = vld [vmem:[#allocation8 + $0x358] ss:$20 sps:$4 sm:$0xff]   ;;  %v8727_v38 = vld [vmem:[#allocation8 + $0x240] ss:$20 sps:$4 sm:$0xff]   ;;  %v8731_v42 = vld [vmem:[#allocation8 + $0x268] ss:$20 sps:$4 sm:$0xff]  }
 0x2da   :  { %v2930_v54 = vmax.f32 %v2918_v47, 0.0  ;;  %4335 = vmatprep.subr.bf16.mxu1 %v8675_v43  ;;  %4464 = vmatprep.subr.bf16.mxu0 %v8678_v9  ;;  %v8728_v39 = vld [vmem:[#allocation8 + $0x4c0] ss:$20 sps:$4 sm:$0xff]   ;;  %v8732_v43 = vld [vmem:[#allocation8 + $0x4e8] ss:$20 sps:$4 sm:$0xff]  }
 0x2db   :  { %v8729_v41 = vld [vmem:[#allocation8 + $0x100] ss:$20 sps:$4 sm:$0xff]   ;;  %v8733_v9 = vld [vmem:[#allocation8 + $0x128] ss:$20 sps:$4 sm:$0xff]   ;;  %v8735_v44 = vld [vmem:[#allocation8 + $0x510] ss:$20 sps:$4 sm:$0xff]  }
 0x2dc   :  { %v9589_v57 = vpack.c.bf16 %v2930_v54, %v2925_v52  ;;  %v8730_v63 = vld [vmem:[#allocation8 + $0x380] ss:$20 sps:$4 sm:$0xff]   ;;  %v8734_v46 = vld [vmem:[#allocation8 + $0x3a8] ss:$20 sps:$4 sm:$0xff]   ;;  %v8736_v52 = vld [vmem:[#allocation8 + $0x538] ss:$20 sps:$4 sm:$0xff]  }
 0x2dd   :  { %4336 = vmatpush1.bf16.msra.mxu1 %v8673_v24  ;;  %4465 = vmatpush1.bf16.msra.mxu0 %v8676_v49  ;;  %v8745_v47 = vld [vmem:[#allocation11 + $0x4] ss:$20 sps:$4 sm:$0xff]   ;;  %v8743_v24 = vld [vmem:[#allocation11] ss:$20 sps:$4 sm:$0xff]   ;;  %v8749_v54 = vld [vmem:[#allocation11 + $0x28] ss:$20 sps:$4 sm:$0xff]  }
 0x2de   :  { %4337 = vmatprep.subr.bf16.mxu1 %v8681_v55  ;;  %4466 = vmatprep.subr.bf16.mxu0 %v8684_v56  ;;  %v8751_v49 = vld [vmem:[#allocation11 + $0x2c] ss:$20 sps:$4 sm:$0xff]   ;;  %v8757_v55 = vld [vmem:[#allocation11 + $0x54] ss:$20 sps:$4 sm:$0xff]  }
 0x2df   :  { %v8737_v56 = vld [vmem:[#allocation8 + $0x560] ss:$20 sps:$4 sm:$0xff]  }
 0x2e1   :  { %4338 = vmatpush1.bf16.msra.mxu1 %v8679_v36  ;;  %4467 = vmatpush1.bf16.msra.mxu0 %v8682_v58  ;;  %v8763_v36 = vld [vmem:[#allocation11 + $0x7c] ss:$20 sps:$4 sm:$0xff]   ;;  %v8761_v58 = vld [vmem:[#allocation11 + $0x78] ss:$20 sps:$4 sm:$0xff]  }
 0x2e2   :  { %4339 = vmatprep.subr.bf16.mxu1 %v8687_v40  ;;  %4468 = vmatprep.subr.bf16.mxu0 %v8690_v60  ;;  %v8769_v40 = vld [vmem:[#allocation11 + $0xa4] ss:$20 sps:$4 sm:$0xff]   ;;  %v8739_v60 = vld [vmem:[#allocation8 + $0x5b0] ss:$20 sps:$4 sm:$0xff]  }
 0x2e5   :  { %4340 = vmatpush1.bf16.msra.mxu1 %v8685_v0  ;;  %4469 = vmatpush1.bf16.msra.mxu0 %v8688_v2  ;;  %v8767_v0 = vld [vmem:[#allocation11 + $0xa0] ss:$20 sps:$4 sm:$0xff]  }
 0x2e6   :  { %4341 = vmatprep.subr.bf16.mxu1 %v8693_v5  ;;  %4470 = vmatprep.subr.bf16.mxu0 %v8696_v6  ;;  %v8775_v2 = vld [vmem:[#allocation11 + $0xcc] ss:$20 sps:$4 sm:$0xff]   ;;  %v8740_v5 = vld [vmem:[#allocation8 + $0x5d8] ss:$20 sps:$4 sm:$0xff]  }
 0x2e7   :  { %v8773_v6 = vld [vmem:[#allocation11 + $0xc8] ss:$20 sps:$4 sm:$0xff]  }
 0x2e9   :  { %4342 = vmatpush1.bf16.msra.mxu1 %v8691_v7  ;;  %4471 = vmatpush1.bf16.msra.mxu0 %v8694_v8  ;;  %v8781_v7 = vld [vmem:[#allocation11 + $0xf4] ss:$20 sps:$4 sm:$0xff]   ;;  %v8741_v8 = vld [vmem:[#allocation8 + $0x600] ss:$20 sps:$4 sm:$0xff]  }
 0x2ea   :  { %4343 = vmatprep.subr.bf16.mxu1 %v8699_v29  ;;  %4472 = vmatprep.subr.bf16.mxu0 %v8702_v10  ;;  %v8779_v29 = vld [vmem:[#allocation11 + $0xf0] ss:$20 sps:$4 sm:$0xff]  }
 0x2eb   :  { %v8787_v10 = vld [vmem:[#allocation11 + $0x11c] ss:$20 sps:$4 sm:$0xff]  }
 0x2ed   :  { %4344 = vmatpush1.bf16.msra.mxu1 %v8697_v11  ;;  %4473 = vmatpush1.bf16.msra.mxu0 %v8700_v12  ;;  %v8742_v11 = vld [vmem:[#allocation8 + $0x628] ss:$20 sps:$4 sm:$0xff]  }
 0x2ee   :  { %7674 = vmatprep.subr.bf16.mxu1 %v8703_v50  ;;  %7696 = vmatprep.subr.bf16.mxu0 %v8704_v13  ;;  %v8748_v12 = vld [vmem:[#allocation11 + $0xc] ss:$20 sps:$4 sm:$0xff]   ;;  %v8793_v13 = vld [vmem:[#allocation11 + $0x144] ss:$20 sps:$4 sm:$0xff]  }
 0x2ef   :  { %v8785_v50 = vld [vmem:[#allocation11 + $0x118] ss:$20 sps:$4 sm:$0xff]  }
 0x2f0   :  { %4362 = vmatmul.mubr.bf16.vlgmr.msra.gmra.mrb[12].mxu1 %v9589_v57  ;;  %4491 = vmatmul.mubr.bf16.vlgmr.msra.gmra.mrb[20].mxu0 %v9589_v57 }
 0x2f1   :  { %7675 = vmatpush3.bf16.msra.mxu1 %v8705_v14  ;;  %4533 = vmatprep.mubr.bf16.mxu1 %v9562_v25  ;;  %v8718_v25 = vld [vmem:[#allocation8 + $0x308] ss:$20 sps:$4 sm:$0xff]   ;;  %v8746_v14 = vld [vmem:[#allocation11 + $0x8] ss:$20 sps:$4 sm:$0xff]  }
 0x2f2   :  { %7697 = vmatpush3.bf16.msra.mxu0 %v8706_v15  ;;  %4574 = vmatprep.mubr.bf16.mxu0 %v9570_v51  ;;  %v8720_v51 = vld [vmem:[#allocation8 + $0x470] ss:$20 sps:$4 sm:$0xff]  }
 0x2f3   :  { %7676 = vmatprep.subr.bf16.mxu1 %v8707_v16  ;;  %7698 = vmatprep.subr.bf16.mxu0 %v8708_v18  ;;  %v8754_v15 = vld [vmem:[#allocation11 + $0x34] ss:$20 sps:$4 sm:$0xff]   ;;  %v8799_v18 = vld [vmem:[#allocation11 + $0x16c] ss:$20 sps:$4 sm:$0xff]  }
 0x2f4   :  { %v8791_v16 = vld [vmem:[#allocation11 + $0x140] ss:$20 sps:$4 sm:$0xff]  }
 0x2f5   :  { %7677 = vmatpush3.bf16.msra.mxu1 %v8709_v19  ;;  %v8752_v19 = vld [vmem:[#allocation11 + $0x30] ss:$20 sps:$4 sm:$0xff]  }
 0x2f6   :  { %7699 = vmatpush3.bf16.msra.mxu0 %v8710_v20  ;;  %7678 = vmatprep.subr.bf16.mxu1 %v8711_v22  ;;  %v8760_v20 = vld [vmem:[#allocation11 + $0x5c] ss:$20 sps:$4 sm:$0xff]  }
 0x2f7   :  { %7700 = vmatprep.subr.bf16.mxu0 %v8712_v23  ;;  %v8797_v22 = vld [vmem:[#allocation11 + $0x168] ss:$20 sps:$4 sm:$0xff]  }
 0x2f8   :  { %v8805_v23 = vld [vmem:[#allocation11 + $0x194] ss:$20 sps:$4 sm:$0xff]  }
 0x2f9   :  { %7679 = vmatpush3.bf16.msra.mxu1 %v8713_v17  ;;  %v8758_v17 = vld [vmem:[#allocation11 + $0x58] ss:$20 sps:$4 sm:$0xff]  }
 0x2fa   :  { %7701 = vmatpush3.bf16.msra.mxu0 %v8714_v26  ;;  %7680 = vmatprep.subr.bf16.mxu1 %v8715_v34  ;;  %v8766_v26 = vld [vmem:[#allocation11 + $0x84] ss:$20 sps:$4 sm:$0xff]  }
 0x2fb   :  { %7702 = vmatprep.subr.bf16.mxu0 %v8716_v27  ;;  %v8803_v34 = vld [vmem:[#allocation11 + $0x190] ss:$20 sps:$4 sm:$0xff]  }
 0x2fc   :  { %v8811_v27 = vld [vmem:[#allocation11 + $0x1bc] ss:$20 sps:$4 sm:$0xff]  }
 0x2fd   :  { %7681 = vmatpush3.bf16.msra.mxu1 %v8717_v28  ;;  %v8772_v28 = vld [vmem:[#allocation11 + $0xac] ss:$20 sps:$4 sm:$0xff]  }
 0x2fe   :  { %7703 = vmatpush3.bf16.msra.mxu0 %v8718_v25  ;;  %7682 = vmatprep.subr.bf16.mxu1 %v8719_v30  ;;  %v8809_v25 = vld [vmem:[#allocation11 + $0x1b8] ss:$20 sps:$4 sm:$0xff]  }
 0x2ff   :  { %7704 = vmatprep.subr.bf16.mxu0 %v8720_v51  ;;  %v8817_v30 = vld [vmem:[#allocation11 + $0x1e4] ss:$20 sps:$4 sm:$0xff]   ;;  %v8770_v51 = vld [vmem:[#allocation11 + $0xa8] ss:$20 sps:$4 sm:$0xff]  }
 0x301   :  { %7683 = vmatpush3.bf16.msra.mxu1 %v8721_v59  ;;  %v8778_v59 = vld [vmem:[#allocation11 + $0xd4] ss:$20 sps:$4 sm:$0xff]  }
 0x302   :  { %7705 = vmatpush3.bf16.msra.mxu0 %v8722_v31  ;;  %7684 = vmatprep.subr.bf16.mxu1 %v8723_v32  ;;  %v8815_v31 = vld [vmem:[#allocation11 + $0x1e0] ss:$20 sps:$4 sm:$0xff]  }
 0x303   :  { %7706 = vmatprep.subr.bf16.mxu0 %v8724_v33  ;;  %v8823_v32 = vld [vmem:[#allocation11 + $0x20c] ss:$20 sps:$4 sm:$0xff]   ;;  %v8776_v33 = vld [vmem:[#allocation11 + $0xd0] ss:$20 sps:$4 sm:$0xff]  }
 0x305   :  { %7685 = vmatpush3.bf16.msra.mxu1 %v8725_v35  ;;  %v8784_v35 = vld [vmem:[#allocation11 + $0xfc] ss:$20 sps:$4 sm:$0xff]  }
 0x306   :  { %7707 = vmatpush3.bf16.msra.mxu0 %v8726_v37  ;;  %7686 = vmatprep.subr.bf16.mxu1 %v8727_v38  ;;  %v8821_v37 = vld [vmem:[#allocation11 + $0x208] ss:$20 sps:$4 sm:$0xff]  }
 0x307   :  { %7708 = vmatprep.subr.bf16.mxu0 %v8728_v39  ;;  %v8829_v38 = vld [vmem:[#allocation11 + $0x234] ss:$20 sps:$4 sm:$0xff]   ;;  %v8782_v39 = vld [vmem:[#allocation11 + $0xf8] ss:$20 sps:$4 sm:$0xff]  }
 0x309   :  { %7687 = vmatpush3.bf16.msra.mxu1 %v8729_v41  ;;  %v8790_v41 = vld [vmem:[#allocation11 + $0x124] ss:$20 sps:$4 sm:$0xff]  }
 0x30a   :  { %7709 = vmatpush3.bf16.msra.mxu0 %v8730_v63  ;;  %7688 = vmatprep.subr.bf16.mxu1 %v8731_v42  ;;  %v8827_v63 = vld [vmem:[#allocation11 + $0x230] ss:$20 sps:$4 sm:$0xff]  }
 0x30b   :  { %7710 = vmatprep.subr.bf16.mxu0 %v8732_v43  ;;  %v8835_v42 = vld [vmem:[#allocation11 + $0x25c] ss:$20 sps:$4 sm:$0xff]   ;;  %v8788_v43 = vld [vmem:[#allocation11 + $0x120] ss:$20 sps:$4 sm:$0xff]  }
 0x30d   :  { %7689 = vmatpush3.bf16.msra.mxu1 %v8733_v9  ;;  %v8796_v9 = vld [vmem:[#allocation11 + $0x14c] ss:$20 sps:$4 sm:$0xff]  }
 0x30e   :  { %7711 = vmatpush3.bf16.msra.mxu0 %v8734_v46  ;;  %7839 = vmatprep.subr.bf16.mxu1 %v9311_v1  ;;  %v8833_v46 = vld [vmem:[#allocation11 + $0x258] ss:$20 sps:$4 sm:$0xff]  }
 0x30f   :  { %5946 = vmatprep.subr.bf16.mxu0 %v8745_v47  ;;  %v8841_v47 = vld [vmem:[#allocation11 + $0x284] ss:$20 sps:$4 sm:$0xff]  }
 0x310   :  { %4534 = vmatmul.mubr.bf16.vlgmr.msra.gmra.mrb[16].mxu1 %v9560_v21  ;;  %v8755_v21 = vld [vmem:[#allocation11 + $0x50] ss:$20 sps:$4 sm:$0xff]  }
 0x311   :  { %4575 = vmatmul.mubr.bf16.vlgmr.msra.gmra.mrb[24].mxu0 %v9568_v48  ;;  %7840 = vmatpush3.bf16.msra.mxu1 %v8735_v44  ;;  %v8738_v48 = vld [vmem:[#allocation8 + $0x588] ss:$20 sps:$4 sm:$0xff]   ;;  %v8794_v44 = vld [vmem:[#allocation11 + $0x148] ss:$20 sps:$4 sm:$0xff]  }
 0x312   :  { %7841 = vmatprep.subr.bf16.mxu1 %v9311_v1  ;;  %7855 = vmatprep.mubr.msk.bf16.mxu1 %vm9312_vm1, %v9311_v1 }
 0x313   :  { %5947 = vmatpush1.bf16.msra.mxu0 %v8743_v24  ;;  %v8802_v24 = vld [vmem:[#allocation11 + $0x174] ss:$20 sps:$4 sm:$0xff]  }
 0x314   :  { %5948 = vmatprep.subr.bf16.mxu0 %v8751_v49  ;;  %v8800_v49 = vld [vmem:[#allocation11 + $0x170] ss:$20 sps:$4 sm:$0xff]  }
 0x315   :  { %7842 = vmatpush3.bf16.msra.mxu1 %v8736_v52  ;;  %v8808_v52 = vld [vmem:[#allocation11 + $0x19c] ss:$20 sps:$4 sm:$0xff]  }
 0x316   :  { %7843 = vmatprep.subr.bf16.mxu1 %v9311_v1 }
 0x317   :  { %5949 = vmatpush1.bf16.msra.mxu0 %v8749_v54  ;;  %v8806_v54 = vld [vmem:[#allocation11 + $0x198] ss:$20 sps:$4 sm:$0xff]  }
 0x318   :  { %5950 = vmatprep.subr.bf16.mxu0 %v8757_v55  ;;  %v8814_v55 = vld [vmem:[#allocation11 + $0x1c4] ss:$20 sps:$4 sm:$0xff]  }
 0x319   :  { %7844 = vmatpush3.bf16.msra.mxu1 %v8737_v56  ;;  %v8812_v56 = vld [vmem:[#allocation11 + $0x1c0] ss:$20 sps:$4 sm:$0xff]  }
 0x31a   :  { %7845 = vmatprep.subr.bf16.mxu1 %v9311_v1 }
 0x31b   :  { %5951 = vmatpush1.bf16.msra.mxu0 %v8755_v21  ;;  %v8820_v21 = vld [vmem:[#allocation11 + $0x1ec] ss:$20 sps:$4 sm:$0xff]  }
 0x31c   :  { %5952 = vmatprep.subr.bf16.mxu0 %v8763_v36  ;;  %v8818_v36 = vld [vmem:[#allocation11 + $0x1e8] ss:$20 sps:$4 sm:$0xff]  }
 0x31d   :  { %7846 = vmatpush3.bf16.msra.mxu1 %v8738_v48  ;;  %v8826_v48 = vld [vmem:[#allocation11 + $0x214] ss:$20 sps:$4 sm:$0xff]  }
 0x31e   :  { %7847 = vmatprep.subr.bf16.mxu1 %v9311_v1 }
 0x31f   :  { %5953 = vmatpush1.bf16.msra.mxu0 %v8761_v58  ;;  %v8824_v58 = vld [vmem:[#allocation11 + $0x210] ss:$20 sps:$4 sm:$0xff]  }
 0x320   :  { %5954 = vmatprep.subr.bf16.mxu0 %v8769_v40  ;;  %v8832_v40 = vld [vmem:[#allocation11 + $0x23c] ss:$20 sps:$4 sm:$0xff]  }
 0x321   :  { %7848 = vmatpush3.bf16.msra.mxu1 %v8739_v60  ;;  %v8830_v60 = vld [vmem:[#allocation11 + $0x238] ss:$20 sps:$4 sm:$0xff]  }
 0x322   :  { %7849 = vmatprep.subr.bf16.mxu1 %v9311_v1 }
 0x323   :  { %5955 = vmatpush1.bf16.msra.mxu0 %v8767_v0  ;;  %v8838_v0 = vld [vmem:[#allocation11 + $0x264] ss:$20 sps:$4 sm:$0xff]  }
 0x324   :  { %5956 = vmatprep.subr.bf16.mxu0 %v8775_v2  ;;  %v8836_v2 = vld [vmem:[#allocation11 + $0x260] ss:$20 sps:$4 sm:$0xff]  }
 0x325   :  { %7850 = vmatpush3.bf16.msra.mxu1 %v8740_v5  ;;  %v8844_v5 = vld [vmem:[#allocation11 + $0x28c] ss:$20 sps:$4 sm:$0xff]  }
 0x326   :  { %7851 = vmatprep.subr.bf16.mxu1 %v9311_v1 }
 0x327   :  { %5957 = vmatpush1.bf16.msra.mxu0 %v8773_v6  ;;  %v9608_v6 = vld [vmem:[#allocation10] sm:$0x1f] }
 0x328   :  { %5958 = vmatprep.subr.bf16.mxu0 %v8781_v7  ;;  %v3181_v7 = vrot.slane %v9608_v6, %v9539_v61 }
 0x329   :  { %7852 = vmatpush3.bf16.msra.mxu1 %v8741_v8  ;;  %v3189_v8 = vrot.slane %v9608_v6, %v9551_v3 }
 0x32a   :  { %7853 = vmatprep.subr.bf16.mxu1 %v9311_v1 }
 0x32b   :  { %5959 = vmatpush1.bf16.msra.mxu0 %v8779_v29  ;;  %v3185_v29 = vrot.slane %v9608_v6, %v9542_v62 }
 0x32c   :  { %5960 = vmatprep.subr.bf16.mxu0 %v8787_v10  ;;  %v3193_v10 = vrot.slane %v9608_v6, %v9554_v4 }
 0x32d   :  { %7854 = vmatpush3.bf16.msra.mxu1 %v8742_v11 }
 0x32e   :  { %6075 = vmatprep.subr.bf16.mxu1 %v8748_v12 }
 0x32f   :  { %5961 = vmatpush1.bf16.msra.mxu0 %v8785_v50 }
 0x330   :  { %7856 = vmatmul.mubr.bf16.vlgmr.msra.gmra.mrb[20].mxu1 %v9589_v57  ;;  %5962 = vmatprep.subr.bf16.mxu0 %v8793_v13  ;;  %v8764_v57 = vld [vmem:[#allocation11 + $0x80] ss:$20 sps:$4 sm:$0xff]  }
 0x331   :  { %6076 = vmatpush1.bf16.msra.mxu1 %v8746_v14 }
 0x332   :  { %6077 = vmatprep.subr.bf16.mxu1 %v8754_v15 }
 0x333   :  { %5963 = vmatpush1.bf16.msra.mxu0 %v8791_v16 }
 0x334   :  { %5964 = vmatprep.subr.bf16.mxu0 %v8799_v18 }
 0x335   :  { %6078 = vmatpush1.bf16.msra.mxu1 %v8752_v19 }
 0x336   :  { %6079 = vmatprep.subr.bf16.mxu1 %v8760_v20 }
 0x337   :  { %5965 = vmatpush1.bf16.msra.mxu0 %v8797_v22 }
 0x338   :  { %5966 = vmatprep.subr.bf16.mxu0 %v8805_v23 }
 0x339   :  { %6080 = vmatpush1.bf16.msra.mxu1 %v8758_v17 }
 0x33a   :  { %6081 = vmatprep.subr.bf16.mxu1 %v8766_v26 }
 0x33b   :  { %5967 = vmatpush1.bf16.msra.mxu0 %v8803_v34 }
 0x33c   :  { %5968 = vmatprep.subr.bf16.mxu0 %v8811_v27 }
 0x33d   :  { %6082 = vmatpush1.bf16.msra.mxu1 %v8764_v57 }
 0x33e   :  { %6083 = vmatprep.subr.bf16.mxu1 %v8772_v28 }
 0x33f   :  { %5969 = vmatpush1.bf16.msra.mxu0 %v8809_v25 }
 0x340   :  { %5970 = vmatprep.subr.bf16.mxu0 %v8817_v30 }
 0x341   :  { %6084 = vmatpush1.bf16.msra.mxu1 %v8770_v51 }
 0x342   :  { %6085 = vmatprep.subr.bf16.mxu1 %v8778_v59 }
 0x343   :  { %5971 = vmatpush1.bf16.msra.mxu0 %v8815_v31 }
 0x344   :  { %5972 = vmatprep.subr.bf16.mxu0 %v8823_v32 }
 0x345   :  { %6086 = vmatpush1.bf16.msra.mxu1 %v8776_v33 }
 0x346   :  { %6087 = vmatprep.subr.bf16.mxu1 %v8784_v35 }
 0x347   :  { %5973 = vmatpush1.bf16.msra.mxu0 %v8821_v37 }
 0x348   :  { %5974 = vmatprep.subr.bf16.mxu0 %v8829_v38 }
 0x349   :  { %6088 = vmatpush1.bf16.msra.mxu1 %v8782_v39  ;;  %v8839_v39 = vld [vmem:[#allocation11 + $0x280] ss:$20 sps:$4 sm:$0xff]  }
 0x34a   :  { %6089 = vmatprep.subr.bf16.mxu1 %v8790_v41  ;;  %v8842_v41 = vld [vmem:[#allocation11 + $0x288] ss:$20 sps:$4 sm:$0xff]  }
 0x34b   :  { %5975 = vmatpush1.bf16.msra.mxu0 %v8827_v63  ;;  %v8847_v63 = vld [vmem:[#allocation11 + $0x2ac] ss:$20 sps:$4 sm:$0xff]  }
 0x34c   :  { %5976 = vmatprep.subr.bf16.mxu0 %v8835_v42  ;;  %v8850_v42 = vld [vmem:[#allocation11 + $0x2b4] ss:$20 sps:$4 sm:$0xff]  }
 0x34d   :  { %6090 = vmatpush1.bf16.msra.mxu1 %v8788_v43  ;;  %v8845_v43 = vld [vmem:[#allocation11 + $0x2a8] ss:$20 sps:$4 sm:$0xff]  }
 0x34e   :  { %6091 = vmatprep.subr.bf16.mxu1 %v8796_v9  ;;  %v8848_v9 = vld [vmem:[#allocation11 + $0x2b0] ss:$20 sps:$4 sm:$0xff]  }
 0x34f   :  { %5977 = vmatpush1.bf16.msra.mxu0 %v8833_v46  ;;  %v8853_v46 = vld [vmem:[#allocation11 + $0x2d4] ss:$20 sps:$4 sm:$0xff]  }
 0x350   :  { %5989 = vmatprep.subr.bf16.mxu0 %v8841_v47  ;;  %v8856_v47 = vld [vmem:[#allocation11 + $0x2dc] ss:$20 sps:$4 sm:$0xff]  }
 0x351   :  { %6092 = vmatpush1.bf16.msra.mxu1 %v8794_v44  ;;  %v8851_v44 = vld [vmem:[#allocation11 + $0x2d0] ss:$20 sps:$4 sm:$0xff]  }
 0x352   :  { %6093 = vmatprep.subr.bf16.mxu1 %v8802_v24  ;;  %v8854_v24 = vld [vmem:[#allocation11 + $0x2d8] ss:$20 sps:$4 sm:$0xff]  }
 0x355   :  { %6094 = vmatpush1.bf16.msra.mxu1 %v8800_v49  ;;  %v8859_v49 = vld [vmem:[#allocation11 + $0x2fc] ss:$20 sps:$4 sm:$0xff]  }
 0x356   :  { %6095 = vmatprep.subr.bf16.mxu1 %v8808_v52  ;;  %v8862_v52 = vld [vmem:[#allocation11 + $0x304] ss:$20 sps:$4 sm:$0xff]  }
 0x359   :  { %6096 = vmatpush1.bf16.msra.mxu1 %v8806_v54  ;;  %v8857_v54 = vld [vmem:[#allocation11 + $0x2f8] ss:$20 sps:$4 sm:$0xff]  }
 0x35a   :  { %6097 = vmatprep.subr.bf16.mxu1 %v8814_v55  ;;  %v8860_v55 = vld [vmem:[#allocation11 + $0x300] ss:$20 sps:$4 sm:$0xff]  }
 0x35d   :  { %6098 = vmatpush1.bf16.msra.mxu1 %v8812_v56  ;;  %v8865_v56 = vld [vmem:[#allocation11 + $0x324] ss:$20 sps:$4 sm:$0xff]  }
 0x35e   :  { %6099 = vmatprep.subr.bf16.mxu1 %v8820_v21  ;;  %v8868_v21 = vld [vmem:[#allocation11 + $0x32c] ss:$20 sps:$4 sm:$0xff]  }
 0x361   :  { %6100 = vmatpush1.bf16.msra.mxu1 %v8818_v36  ;;  %v8863_v36 = vld [vmem:[#allocation11 + $0x320] ss:$20 sps:$4 sm:$0xff]  }
 0x362   :  { %6101 = vmatprep.subr.bf16.mxu1 %v8826_v48  ;;  %v8866_v48 = vld [vmem:[#allocation11 + $0x328] ss:$20 sps:$4 sm:$0xff]  }
 0x365   :  { %6102 = vmatpush1.bf16.msra.mxu1 %v8824_v58  ;;  %v8871_v58 = vld [vmem:[#allocation11 + $0x34c] ss:$20 sps:$4 sm:$0xff]  }
 0x366   :  { %6103 = vmatprep.subr.bf16.mxu1 %v8832_v40  ;;  %v8874_v40 = vld [vmem:[#allocation11 + $0x354] ss:$20 sps:$4 sm:$0xff]  }
 0x369   :  { %6104 = vmatpush1.bf16.msra.mxu1 %v8830_v60  ;;  %v8869_v60 = vld [vmem:[#allocation11 + $0x348] ss:$20 sps:$4 sm:$0xff]  }
 0x36a   :  { %6105 = vmatprep.subr.bf16.mxu1 %v8838_v0  ;;  %v8872_v0 = vld [vmem:[#allocation11 + $0x350] ss:$20 sps:$4 sm:$0xff]  }
 0x36d   :  { %6106 = vmatpush1.bf16.msra.mxu1 %v8836_v2  ;;  %v8877_v2 = vld [vmem:[#allocation11 + $0x374] ss:$20 sps:$4 sm:$0xff]  }
 0x36e   :  { %6118 = vmatprep.subr.bf16.mxu1 %v8844_v5  ;;  %v8880_v5 = vld [vmem:[#allocation11 + $0x37c] ss:$20 sps:$4 sm:$0xff]  }
 0x3c3   :  { %v4363_v11 = vpop.f32.mrb[12].mxu1  ;;  %v4492_v12 = vpop.f32.mrb[20].mxu0 }
 0x3c4   :  { %v7911_v50 = vadd.f32 %v4363_v11, %v3181_v7  ;;  %v7915_v13 = vadd.f32 %v4492_v12, %v3189_v8  ;;  %v4365_v14 = vpop.f32.mrb[13].mxu1  ;;  %v4494_v15 = vpop.f32.mrb[21].mxu0 }
 0x3c5   :  { %v7912_v16 = vadd.f32 %v4365_v14, %v3185_v29  ;;  %v7916_v18 = vadd.f32 %v4494_v15, %v3193_v10  ;;  %v4367_v19 = vpop.f32.mrb[14].mxu1  ;;  %v4496_v20 = vpop.f32.mrb[22].mxu0 }
 0x3c6   :  { %v7913_v22 = vadd.f32 %v4367_v19, %v3181_v7  ;;  %v7917_v23 = vadd.f32 %v4496_v20, %v3189_v8  ;;  %v4369_v17 = vpop.f32.mrb[15].mxu1  ;;  %v4498_v26 = vpop.f32.mrb[23].mxu0  ;;  %v4624_v57 = vmax.f32 %v7911_v50, 0.0  ;;  %v4626_v28 = vmax.f32 %v7915_v13, 0.0  ;;  %v8883_v50 = vld [vmem:[#allocation11 + $0x39c] ss:$20 sps:$4 sm:$0xff]  }
 0x3c7   :  { %v7914_v34 = vadd.f32 %v4369_v17, %v3185_v29  ;;  %v7918_v27 = vadd.f32 %v4498_v26, %v3193_v10  ;;  %v4625_v51 = vmax.f32 %v7912_v16, 0.0  ;;  %v4627_v59 = vmax.f32 %v7916_v18, 0.0  ;;  %v8875_v29 = vld [vmem:[#allocation11 + $0x370] ss:$20 sps:$4 sm:$0xff]   ;;  %v8878_v10 = vld [vmem:[#allocation11 + $0x378] ss:$20 sps:$4 sm:$0xff]  }
 0x3c8   :  { %v4629_v25 = vmax.f32 %v7913_v22, 0.0  ;;  %v4631_v30 = vmax.f32 %v7917_v23, 0.0  ;;  %v3197_v8 = vrot.slane %v9608_v6, %v9575_v53  ;;  %v8886_v13 = vld [vmem:[#allocation11 + $0x3a4] ss:$20 sps:$4 sm:$0xff]   ;;  %v8884_v26 = vld [vmem:[#allocation11 + $0x3a0] ss:$20 sps:$4 sm:$0xff]  }
 0x3c9   :  { %v4630_v31 = vmax.f32 %v7914_v34, 0.0  ;;  %v4632_v32 = vmax.f32 %v7918_v27, 0.0  ;;  %v8881_v6 = vld [vmem:[#allocation11 + $0x398] ss:$20 sps:$4 sm:$0xff]  }
 0x3ca   :  { %v9618_v33 = vpack.c.bf16 %v4629_v25, %v4624_v57  ;;  %v9620_v35 = vpack.c.bf16 %v4631_v30, %v4626_v28  ;;  %v8889_v27 = vld [vmem:[#allocation11 + $0x3c4] ss:$20 sps:$4 sm:$0xff]   ;;  %v8892_v57 = vld [vmem:[#allocation11 + $0x3cc] ss:$20 sps:$4 sm:$0xff]  }
 0x3cb   :  { %v9622_v37 = vpack.c.bf16 %v4630_v31, %v4625_v51  ;;  %v9624_v38 = vpack.c.bf16 %v4632_v32, %v4627_v59  ;;  %v8887_v30 = vld [vmem:[#allocation11 + $0x3c0] ss:$20 sps:$4 sm:$0xff]   ;;  %v8890_v51 = vld [vmem:[#allocation11 + $0x3c8] ss:$20 sps:$4 sm:$0xff]  }
 0x3cc   :  { %v8895_v31 = vld [vmem:[#allocation11 + $0x3ec] ss:$20 sps:$4 sm:$0xff]   ;;  %v8898_v32 = vld [vmem:[#allocation11 + $0x3f4] ss:$20 sps:$4 sm:$0xff]  }
 0x3cd   :  { %5978 = vmatprep.mubr.bf16.mxu0 %v9622_v37  ;;  %6107 = vmatprep.mubr.bf16.mxu1 %v9622_v37 }
 0x3ce   :  { %5979 = vmatmul.mubr.bf16.vlgmr.msra.gmra.mrb[28].mxu0 %v9618_v33  ;;  %6108 = vmatmul.mubr.bf16.vlgmr.msra.gmra.mrb[24].mxu1 %v9618_v33 }
 0x3cf   :  { %5990 = vmatpush1.bf16.msra.mxu0 %v8839_v39  ;;  %6119 = vmatpush1.bf16.msra.mxu1 %v8842_v41  ;;  %v8893_v39 = vld [vmem:[#allocation11 + $0x3e8] ss:$20 sps:$4 sm:$0xff]   ;;  %v8896_v41 = vld [vmem:[#allocation11 + $0x3f0] ss:$20 sps:$4 sm:$0xff]  }
 0x3d0   :  { %6021 = vmatprep.mubr.bf16.mxu0 %v9624_v38  ;;  %6150 = vmatprep.mubr.bf16.mxu1 %v9624_v38 }
 0x3d1   :  { %5991 = vmatprep.subr.bf16.mxu0 %v8847_v63  ;;  %6120 = vmatprep.subr.bf16.mxu1 %v8850_v42  ;;  %v8901_v63 = vld [vmem:[#allocation11 + $0x414] ss:$20 sps:$4 sm:$0xff]   ;;  %v8904_v42 = vld [vmem:[#allocation11 + $0x41c] ss:$20 sps:$4 sm:$0xff]  }
 0x3d3   :  { %5992 = vmatpush1.bf16.msra.mxu0 %v8845_v43  ;;  %6121 = vmatpush1.bf16.msra.mxu1 %v8848_v9  ;;  %v8899_v43 = vld [vmem:[#allocation11 + $0x410] ss:$20 sps:$4 sm:$0xff]   ;;  %v8902_v9 = vld [vmem:[#allocation11 + $0x418] ss:$20 sps:$4 sm:$0xff]  }
 0x3d4   :  { %5993 = vmatprep.subr.bf16.mxu0 %v8853_v46  ;;  %6122 = vmatprep.subr.bf16.mxu1 %v8856_v47  ;;  %v8907_v46 = vld [vmem:[#allocation11 + $0x43c] ss:$20 sps:$4 sm:$0xff]   ;;  %v8910_v47 = vld [vmem:[#allocation11 + $0x444] ss:$20 sps:$4 sm:$0xff]  }
 0x3d7   :  { %5994 = vmatpush1.bf16.msra.mxu0 %v8851_v44  ;;  %6123 = vmatpush1.bf16.msra.mxu1 %v8854_v24  ;;  %v8905_v44 = vld [vmem:[#allocation11 + $0x438] ss:$20 sps:$4 sm:$0xff]   ;;  %v8908_v24 = vld [vmem:[#allocation11 + $0x440] ss:$20 sps:$4 sm:$0xff]  }
 0x3d8   :  { %5995 = vmatprep.subr.bf16.mxu0 %v8859_v49  ;;  %6124 = vmatprep.subr.bf16.mxu1 %v8862_v52  ;;  %v8913_v49 = vld [vmem:[#allocation11 + $0x464] ss:$20 sps:$4 sm:$0xff]   ;;  %v8916_v52 = vld [vmem:[#allocation11 + $0x46c] ss:$20 sps:$4 sm:$0xff]  }
 0x3db   :  { %5996 = vmatpush1.bf16.msra.mxu0 %v8857_v54  ;;  %6125 = vmatpush1.bf16.msra.mxu1 %v8860_v55  ;;  %v8911_v54 = vld [vmem:[#allocation11 + $0x460] ss:$20 sps:$4 sm:$0xff]   ;;  %v8914_v55 = vld [vmem:[#allocation11 + $0x468] ss:$20 sps:$4 sm:$0xff]  }
 0x3dc   :  { %5997 = vmatprep.subr.bf16.mxu0 %v8865_v56  ;;  %6126 = vmatprep.subr.bf16.mxu1 %v8868_v21  ;;  %v8919_v56 = vld [vmem:[#allocation11 + $0x48c] ss:$20 sps:$4 sm:$0xff]   ;;  %v8922_v21 = vld [vmem:[#allocation11 + $0x494] ss:$20 sps:$4 sm:$0xff]  }
 0x3df   :  { %5998 = vmatpush1.bf16.msra.mxu0 %v8863_v36  ;;  %6127 = vmatpush1.bf16.msra.mxu1 %v8866_v48  ;;  %v8917_v36 = vld [vmem:[#allocation11 + $0x488] ss:$20 sps:$4 sm:$0xff]   ;;  %v8920_v48 = vld [vmem:[#allocation11 + $0x490] ss:$20 sps:$4 sm:$0xff]  }
 0x3e0   :  { %5999 = vmatprep.subr.bf16.mxu0 %v8871_v58  ;;  %6128 = vmatprep.subr.bf16.mxu1 %v8874_v40  ;;  %v8925_v58 = vld [vmem:[#allocation11 + $0x4b4] ss:$20 sps:$4 sm:$0xff]   ;;  %v8928_v40 = vld [vmem:[#allocation11 + $0x4bc] ss:$20 sps:$4 sm:$0xff]  }
 0x3e3   :  { %6000 = vmatpush1.bf16.msra.mxu0 %v8869_v60  ;;  %6129 = vmatpush1.bf16.msra.mxu1 %v8872_v0  ;;  %v7690_v7 = vpop.f32.mrb[16].mxu1  ;;  %v8923_v0 = vld [vmem:[#allocation11 + $0x4b0] ss:$20 sps:$4 sm:$0xff]  }
 0x3e4   :  { %v7712_v11 = vpop.f32.mrb[24].mxu0  ;;  %v7691_v12 = vpop.f32.mrb[17].mxu1  ;;  %6001 = vmatprep.subr.bf16.mxu0 %v8877_v2  ;;  %6130 = vmatprep.subr.bf16.mxu1 %v8880_v5  ;;  %v8926_v2 = vld [vmem:[#allocation11 + $0x4b8] ss:$20 sps:$4 sm:$0xff]  }
 0x3e5   :  { %v7692_v14 = vadd.f32 %v7691_v12, %v7690_v7  ;;  %v7713_v15 = vpop.f32.mrb[25].mxu0  ;;  %v7693_v16 = vpop.f32.mrb[18].mxu1 }
 0x3e6   :  { %v7714_v18 = vadd.f32 %v7713_v15, %v7712_v11  ;;  %v7715_v19 = vpop.f32.mrb[26].mxu0  ;;  %v7694_v20 = vpop.f32.mrb[19].mxu1 }
 0x3e7   :  { %v4536_v22 = vadd.f32 %v7692_v14, %v3197_v8  ;;  %v7695_v23 = vadd.f32 %v7694_v20, %v7693_v16  ;;  %v7716_v17 = vpop.f32.mrb[27].mxu0  ;;  %6002 = vmatpush1.bf16.msra.mxu0 %v8875_v29  ;;  %6131 = vmatpush1.bf16.msra.mxu1 %v8878_v10  ;;  %v8934_v29 = vld [vmem:[#allocation11 + $0x4e4] ss:$20 sps:$4 sm:$0xff]   ;;  %v8935_v20 = vld [vmem:[#allocation11 + $0x500] ss:$20 sps:$4 sm:$0xff]  }
 0x3e8   :  { %v7717_v34 = vadd.f32 %v7716_v17, %v7715_v19  ;;  %6003 = vmatprep.subr.bf16.mxu0 %v8883_v50  ;;  %6132 = vmatprep.subr.bf16.mxu1 %v8886_v13  ;;  %v8929_v50 = vld [vmem:[#allocation11 + $0x4d8] ss:$20 sps:$4 sm:$0xff]   ;;  %v8932_v13 = vld [vmem:[#allocation11 + $0x4e0] ss:$20 sps:$4 sm:$0xff]  }
 0x3e9   :  { %v4539_v28 = vadd.f32 %v7695_v23, %v3197_v8  ;;  %v4577_v25 = vadd.f32 %v7714_v18, %v4536_v22  ;;  %v8931_v8 = vld [vmem:[#allocation11 + $0x4dc] ss:$20 sps:$4 sm:$0xff]   ;;  %v8937_v16 = vld [vmem:[#allocation11 + $0x504] ss:$20 sps:$4 sm:$0xff]   ;;  %v8940_v18 = vld [vmem:[#allocation11 + $0x50c] ss:$20 sps:$4 sm:$0xff]  }
 0x3ea   :  { %v8938_v22 = vld [vmem:[#allocation11 + $0x508] ss:$20 sps:$4 sm:$0xff]   ;;  %v8943_v23 = vld [vmem:[#allocation11 + $0x52c] ss:$20 sps:$4 sm:$0xff]  }
 0x3eb   :  { %6004 = vmatpush1.bf16.msra.mxu0 %v8881_v6  ;;  %6133 = vmatpush1.bf16.msra.mxu1 %v8884_v26  ;;  %v4580_v59 = vadd.f32 %v7717_v34, %v4539_v28  ;;  %v8946_v17 = vld [vmem:[#allocation11 + $0x534] ss:$20 sps:$4 sm:$0xff]   ;;  %v8944_v26 = vld [vmem:[#allocation11 + $0x530] ss:$20 sps:$4 sm:$0xff]   ;;  %v8950_v28 = vld [vmem:[#allocation11 + $0x558] ss:$20 sps:$4 sm:$0xff]  }
 0x3ec   :  { %6005 = vmatprep.subr.bf16.mxu0 %v8889_v27  ;;  %6134 = vmatprep.subr.bf16.mxu1 %v8892_v57  ;;  %v8941_v6 = vld [vmem:[#allocation11 + $0x528] ss:$20 sps:$4 sm:$0xff]   ;;  %v8947_v57 = vld [vmem:[#allocation11 + $0x550] ss:$20 sps:$4 sm:$0xff]  }
 0x3ed   :  { %v8949_v34 = vld [vmem:[#allocation11 + $0x554] ss:$20 sps:$4 sm:$0xff]   ;;  %v8952_v27 = vld [vmem:[#allocation11 + $0x55c] ss:$20 sps:$4 sm:$0xff]  }
 0x3ef   :  { %6006 = vmatpush1.bf16.msra.mxu0 %v8887_v30  ;;  %6135 = vmatpush1.bf16.msra.mxu1 %v8890_v51  ;;  %v8958_v30 = vld [vmem:[#allocation11 + $0x584] ss:$20 sps:$4 sm:$0xff]  }
 0x3f0   :  { %6007 = vmatprep.subr.bf16.mxu0 %v8895_v31  ;;  %6136 = vmatprep.subr.bf16.mxu1 %v8898_v32  ;;  %v8953_v51 = vld [vmem:[#allocation11 + $0x578] ss:$20 sps:$4 sm:$0xff]  }
 0x3f1   :  { %v8961_v31 = vld [vmem:[#allocation11 + $0x5a4] ss:$20 sps:$4 sm:$0xff]   ;;  %v8964_v32 = vld [vmem:[#allocation11 + $0x5ac] ss:$20 sps:$4 sm:$0xff]  }
 0x3f3   :  { %6008 = vmatpush1.bf16.msra.mxu0 %v8893_v39  ;;  %6137 = vmatpush1.bf16.msra.mxu1 %v8896_v41  ;;  %v8959_v39 = vld [vmem:[#allocation11 + $0x5a0] ss:$20 sps:$4 sm:$0xff]  }
 0x3f4   :  { %6009 = vmatprep.subr.bf16.mxu0 %v8901_v63  ;;  %6138 = vmatprep.subr.bf16.mxu1 %v8904_v42  ;;  %v8967_v41 = vld [vmem:[#allocation11 + $0x5cc] ss:$20 sps:$4 sm:$0xff]   ;;  %v8970_v63 = vld [vmem:[#allocation11 + $0x5d4] ss:$20 sps:$4 sm:$0xff]  }
 0x3f5   :  { %v8965_v42 = vld [vmem:[#allocation11 + $0x5c8] ss:$20 sps:$4 sm:$0xff]  }
 0x3f7   :  { %6010 = vmatpush1.bf16.msra.mxu0 %v8899_v43  ;;  %6139 = vmatpush1.bf16.msra.mxu1 %v8902_v9  ;;  %v8968_v43 = vld [vmem:[#allocation11 + $0x5d0] ss:$20 sps:$4 sm:$0xff]   ;;  %v8973_v9 = vld [vmem:[#allocation11 + $0x5f4] ss:$20 sps:$4 sm:$0xff]  }
 0x3f8   :  { %6011 = vmatprep.subr.bf16.mxu0 %v8907_v46  ;;  %6140 = vmatprep.subr.bf16.mxu1 %v8910_v47  ;;  %v8976_v46 = vld [vmem:[#allocation11 + $0x5fc] ss:$20 sps:$4 sm:$0xff]  }
 0x3f9   :  { %v8971_v47 = vld [vmem:[#allocation11 + $0x5f0] ss:$20 sps:$4 sm:$0xff]  }
 0x3fb   :  { %6012 = vmatpush1.bf16.msra.mxu0 %v8905_v44  ;;  %6141 = vmatpush1.bf16.msra.mxu1 %v8908_v24  ;;  %v8974_v44 = vld [vmem:[#allocation11 + $0x5f8] ss:$20 sps:$4 sm:$0xff]   ;;  %v8979_v24 = vld [vmem:[#allocation11 + $0x61c] ss:$20 sps:$4 sm:$0xff]  }
 0x3fc   :  { %6013 = vmatprep.subr.bf16.mxu0 %v8913_v49  ;;  %6142 = vmatprep.subr.bf16.mxu1 %v8916_v52  ;;  %v8982_v49 = vld [vmem:[#allocation11 + $0x624] ss:$20 sps:$4 sm:$0xff]  }
 0x3fd   :  { %v8977_v52 = vld [vmem:[#allocation11 + $0x618] ss:$20 sps:$4 sm:$0xff]  }
 0x3ff   :  { %6014 = vmatpush1.bf16.msra.mxu0 %v8911_v54  ;;  %6143 = vmatpush1.bf16.msra.mxu1 %v8914_v55  ;;  %v8980_v54 = vld [vmem:[#allocation11 + $0x620] ss:$20 sps:$4 sm:$0xff]   ;;  %v8983_v55 = vld [vmem:[#allocation11 + $0x150] ss:$20 sps:$4 sm:$0xff]  }
 0x400   :  { %6015 = vmatprep.subr.bf16.mxu0 %v8919_v56  ;;  %6144 = vmatprep.subr.bf16.mxu1 %v8922_v21  ;;  %v8984_v56 = vld [vmem:[#allocation11 + $0x3d0] ss:$20 sps:$4 sm:$0xff]  }
 0x401   :  { %v8985_v21 = vld [vmem:[#allocation11 + $0x10] ss:$20 sps:$4 sm:$0xff]  }
 0x403   :  { %6016 = vmatpush1.bf16.msra.mxu0 %v8917_v36  ;;  %6145 = vmatpush1.bf16.msra.mxu1 %v8920_v48  ;;  %v4617_v60 = vpop.f32.mrb[20].mxu1  ;;  %v8986_v36 = vld [vmem:[#allocation11 + $0x290] ss:$20 sps:$4 sm:$0xff]   ;;  %v8987_v48 = vld [vmem:[#allocation11 + $0x178] ss:$20 sps:$4 sm:$0xff]  }
 0x404   :  { %v4618_v5 = vadd.f32 %v4617_v60, %v4577_v25  ;;  %v7857_v7 = vpop.f32.mrb[21].mxu1  ;;  %6017 = vmatprep.subr.bf16.mxu0 %v8925_v58  ;;  %6146 = vmatprep.subr.bf16.mxu1 %v8928_v40  ;;  %v8955_v25 = vld [vmem:[#allocation11 + $0x57c] ss:$20 sps:$4 sm:$0xff]   ;;  %v8988_v58 = vld [vmem:[#allocation11 + $0x3f8] ss:$20 sps:$4 sm:$0xff]  }
 0x405   :  { %v4620_v10 = vpop.f32.mrb[22].mxu1  ;;  %v8989_v40 = vld [vmem:[#allocation11 + $0x38] ss:$20 sps:$4 sm:$0xff]   ;;  %v8994_v7 = vld [vmem:[#allocation11 + $0x2e0] ss:$20 sps:$4 sm:$0xff]  }
 0x406   :  { %v4621_v11 = vadd.f32 %v4620_v10, %v4580_v59  ;;  %v7858_v12 = vpop.f32.mrb[23].mxu1  ;;  %v4628_v14 = vmax.f32 %v4618_v5, 0.0  ;;  %v8956_v59 = vld [vmem:[#allocation11 + $0x580] ss:$20 sps:$4 sm:$0xff]   ;;  %v8990_v60 = vld [vmem:[#allocation11 + $0x2b8] ss:$20 sps:$4 sm:$0xff]  }
 0x407   :  { %6018 = vmatpush1.bf16.msra.mxu0 %v8923_v0  ;;  %6147 = vmatpush1.bf16.msra.mxu1 %v8926_v2  ;;  %v8991_v0 = vld [vmem:[#allocation11 + $0x1a0] ss:$20 sps:$4 sm:$0xff]   ;;  %v8997_v10 = vld [vmem:[#allocation11 + $0x88] ss:$20 sps:$4 sm:$0xff]   ;;  %v9001_v12 = vld [vmem:[#allocation11 + $0xb0] ss:$20 sps:$4 sm:$0xff]  }
 0x408   :  { %v4633_v15 = vmax.f32 %v4621_v11, 0.0  ;;  %6019 = vmatprep.subr.bf16.mxu0 %v8931_v8  ;;  %6148 = vmatprep.subr.bf16.mxu1 %v8934_v29  ;;  %v8992_v2 = vld [vmem:[#allocation11 + $0x420] ss:$20 sps:$4 sm:$0xff]   ;;  %v8995_v8 = vld [vmem:[#allocation11 + $0x1c8] ss:$20 sps:$4 sm:$0xff]  }
 0x409   :  { %v8993_v5 = vld [vmem:[#allocation11 + $0x60] ss:$20 sps:$4 sm:$0xff]   ;;  %v8996_v29 = vld [vmem:[#allocation11 + $0x448] ss:$20 sps:$4 sm:$0xff]   ;;  %v8999_v11 = vld [vmem:[#allocation11 + $0x1f0] ss:$20 sps:$4 sm:$0xff]  }
 0x40a   :  { %v9634_v19 = vpack.c.bf16 %v4633_v15, %v4628_v14  ;;  %v9004_v14 = vld [vmem:[#allocation11 + $0x498] ss:$20 sps:$4 sm:$0xff]  }
 0x40b   :  { %6020 = vmatpush1.bf16.msra.mxu0 %v8929_v50  ;;  %6149 = vmatpush1.bf16.msra.mxu1 %v8932_v13  ;;  %v9002_v50 = vld [vmem:[#allocation11 + $0x330] ss:$20 sps:$4 sm:$0xff]   ;;  %v9003_v13 = vld [vmem:[#allocation11 + $0x218] ss:$20 sps:$4 sm:$0xff]  }
 0x40c   :  { %6032 = vmatprep.subr.bf16.mxu0 %v8937_v16  ;;  %6161 = vmatprep.subr.bf16.mxu1 %v8940_v18  ;;  %v9005_v15 = vld [vmem:[#allocation11 + $0xd8] ss:$20 sps:$4 sm:$0xff]   ;;  %v9007_v18 = vld [vmem:[#allocation11 + $0x240] ss:$20 sps:$4 sm:$0xff]  }
 0x40d   :  { %v9006_v16 = vld [vmem:[#allocation11 + $0x358] ss:$20 sps:$4 sm:$0xff]  }
 0x40e   :  { %6022 = vmatmul.mubr.bf16.vlgmr.msra.gmra.mrb[28].mxu0 %v9620_v35  ;;  %6151 = vmatmul.mubr.bf16.vlgmr.msra.gmra.mrb[24].mxu1 %v9620_v35 }
 0x40f   :  { %6033 = vmatpush1.bf16.msra.mxu0 %v8935_v20  ;;  %6162 = vmatpush1.bf16.msra.mxu1 %v8938_v22  ;;  %v9008_v20 = vld [vmem:[#allocation11 + $0x4c0] ss:$20 sps:$4 sm:$0xff]  }
 0x410   :  { %6034 = vmatprep.subr.bf16.mxu0 %v8943_v23  ;;  %6163 = vmatprep.subr.bf16.mxu1 %v8946_v17  ;;  %v9009_v22 = vld [vmem:[#allocation11 + $0x100] ss:$20 sps:$4 sm:$0xff]   ;;  %v9011_v17 = vld [vmem:[#allocation11 + $0x268] ss:$20 sps:$4 sm:$0xff]  }
 0x411   :  { %6064 = vmatprep.mubr.bf16.mxu0 %v9310_v45  ;;  %6193 = vmatprep.mubr.bf16.mxu1 %v9310_v45  ;;  %v8962_v45 = vld [vmem:[#allocation11 + $0x5a8] ss:$20 sps:$4 sm:$0xff]   ;;  %v9010_v23 = vld [vmem:[#allocation11 + $0x380] ss:$20 sps:$4 sm:$0xff]  }
 0x413   :  { %6035 = vmatpush1.bf16.msra.mxu0 %v8941_v6  ;;  %6164 = vmatpush1.bf16.msra.mxu1 %v8944_v26  ;;  %v9012_v6 = vld [vmem:[#allocation11 + $0x4e8] ss:$20 sps:$4 sm:$0xff]  }
 0x414   :  { %6036 = vmatprep.subr.bf16.mxu0 %v8949_v34  ;;  %6165 = vmatprep.subr.bf16.mxu1 %v8952_v27  ;;  %v9013_v26 = vld [vmem:[#allocation11 + $0x128] ss:$20 sps:$4 sm:$0xff]  }
 0x415   :  { %v9014_v34 = vld [vmem:[#allocation11 + $0x3a8] ss:$20 sps:$4 sm:$0xff]  }
 0x416   :  { %v9023_v27 = vld [vmem:[#allocation14 + $0x40] sm:$0xff]  }
 0x417   :  { %6037 = vmatpush1.bf16.msra.mxu0 %v8947_v57  ;;  %6166 = vmatpush1.bf16.msra.mxu1 %v8950_v28  ;;  %v9015_v57 = vld [vmem:[#allocation11 + $0x510] ss:$20 sps:$4 sm:$0xff]  }
 0x418   :  { %6038 = vmatprep.subr.bf16.mxu0 %v8955_v25  ;;  %6167 = vmatprep.subr.bf16.mxu1 %v8958_v30  ;;  %v9025_v28 = vld [vmem:[#allocation14] sm:$0xff]   ;;  %v9027_v25 = vld [vmem:[#allocation14 + $0x48] sm:$0xff]  }
 0x419   :  { %v9016_v30 = vld [vmem:[#allocation11 + $0x538] ss:$20 sps:$4 sm:$0xff]  }
 0x41b   :  { %6039 = vmatpush1.bf16.msra.mxu0 %v8953_v51  ;;  %6168 = vmatpush1.bf16.msra.mxu1 %v8956_v59  ;;  %v9029_v51 = vld [vmem:[#allocation14 + $0x8] sm:$0xff]   ;;  %v9031_v59 = vld [vmem:[#allocation14 + $0x50] sm:$0xff]  }
 0x41c   :  { %6040 = vmatprep.subr.bf16.mxu0 %v8961_v31  ;;  %6169 = vmatprep.subr.bf16.mxu1 %v8964_v32  ;;  %v9017_v31 = vld [vmem:[#allocation11 + $0x560] ss:$20 sps:$4 sm:$0xff]  }
 0x41d   :  { %v9035_v32 = vld [vmem:[#allocation14 + $0x58] sm:$0xff]  }
 0x41f   :  { %6041 = vmatpush1.bf16.msra.mxu0 %v8959_v39  ;;  %6170 = vmatpush1.bf16.msra.mxu1 %v8962_v45  ;;  %v9037_v39 = vld [vmem:[#allocation14 + $0x18] sm:$0xff]   ;;  %v9039_v45 = vld [vmem:[#allocation14 + $0x60] sm:$0xff]  }
 0x420   :  { %6042 = vmatprep.subr.bf16.mxu0 %v8967_v41  ;;  %6171 = vmatprep.subr.bf16.mxu1 %v8970_v63  ;;  %v9019_v41 = vld [vmem:[#allocation11 + $0x5b0] ss:$20 sps:$4 sm:$0xff]  }
 0x421   :  { %v9041_v63 = vld [vmem:[#allocation14 + $0x20] sm:$0xff]  }
 0x423   :  { %6043 = vmatpush1.bf16.msra.mxu0 %v8965_v42  ;;  %6172 = vmatpush1.bf16.msra.mxu1 %v8968_v43  ;;  %v9043_v42 = vld [vmem:[#allocation14 + $0x68] sm:$0xff]  }
 0x424   :  { %6044 = vmatprep.subr.bf16.mxu0 %v8973_v9  ;;  %6173 = vmatprep.subr.bf16.mxu1 %v8976_v46  ;;  %v9020_v43 = vld [vmem:[#allocation11 + $0x5d8] ss:$20 sps:$4 sm:$0xff]   ;;  %v9021_v9 = vld [vmem:[#allocation11 + $0x600] ss:$20 sps:$4 sm:$0xff]   ;;  %v9022_v46 = vld [vmem:[#allocation11 + $0x628] ss:$20 sps:$4 sm:$0xff]  }
 0x427   :  { %6045 = vmatpush1.bf16.msra.mxu0 %v8971_v47  ;;  %6174 = vmatpush1.bf16.msra.mxu1 %v8974_v44  ;;  %v9024_v47 = vld [vmem:[#allocation14 + $0xc0] sm:$0xff]  }
 0x428   :  { %6046 = vmatprep.subr.bf16.mxu0 %v8979_v24  ;;  %6175 = vmatprep.subr.bf16.mxu1 %v8982_v49  ;;  %v9026_v44 = vld [vmem:[#allocation14 + $0x80] sm:$0xff]   ;;  %v9028_v24 = vld [vmem:[#allocation14 + $0xc8] sm:$0xff]  }
 0x429   :  { %v9030_v49 = vld [vmem:[#allocation14 + $0x88] sm:$0xff]  }
 0x42b   :  { %6047 = vmatpush1.bf16.msra.mxu0 %v8977_v52  ;;  %6176 = vmatpush1.bf16.msra.mxu1 %v8980_v54  ;;  %v9032_v52 = vld [vmem:[#allocation14 + $0xd0] sm:$0xff]  }
 0x42c   :  { %7727 = vmatprep.subr.bf16.mxu0 %v8983_v55  ;;  %7749 = vmatprep.subr.bf16.mxu1 %v8984_v56  ;;  %v9034_v54 = vld [vmem:[#allocation14 + $0x90] sm:$0xff]   ;;  %v9036_v55 = vld [vmem:[#allocation14 + $0xd8] sm:$0xff]  }
 0x42d   :  { %v9038_v56 = vld [vmem:[#allocation14 + $0x98] sm:$0xff]  }
 0x42e   :  { %6065 = vmatmul.mubr.bf16.vlgmr.msra.gmra.mrb[28].mxu0 %v9634_v19  ;;  %6194 = vmatmul.mubr.bf16.vlgmr.msra.gmra.mrb[24].mxu1 %v9634_v19 }
 0x42f   :  { %7728 = vmatpush3.bf16.msra.mxu0 %v8985_v21  ;;  %6236 = vmatprep.mubr.bf16.mxu0 %v9622_v37  ;;  %v8998_v37 = vld [vmem:[#allocation11 + $0x308] ss:$20 sps:$4 sm:$0xff]  }
 0x430   :  { %7750 = vmatpush3.bf16.msra.mxu1 %v8986_v36  ;;  %6277 = vmatprep.mubr.bf16.mxu1 %v9624_v38  ;;  %v9000_v38 = vld [vmem:[#allocation11 + $0x470] ss:$20 sps:$4 sm:$0xff]  }
 0x431   :  { %7729 = vmatprep.subr.bf16.mxu0 %v8987_v48  ;;  %7751 = vmatprep.subr.bf16.mxu1 %v8988_v58  ;;  %v9040_v21 = vld [vmem:[#allocation14 + $0xe0] sm:$0xff]   ;;  %v9044_v48 = vld [vmem:[#allocation14 + $0xe8] sm:$0xff]  }
 0x432   :  { %v9042_v36 = vld [vmem:[#allocation14 + $0xa0] sm:$0xff]   ;;  %v9045_v58 = vld [vmem:[#allocation14 + $0x28] sm:$0xff]  }
 0x433   :  { %7730 = vmatpush3.bf16.msra.mxu0 %v8989_v40  ;;  %v9047_v40 = vld [vmem:[#allocation14 + $0x70] sm:$0xff]  }
 0x434   :  { %7752 = vmatpush3.bf16.msra.mxu1 %v8990_v60  ;;  %7731 = vmatprep.subr.bf16.mxu0 %v8991_v0  ;;  %v9048_v60 = vld [vmem:[#allocation14 + $0xf0] sm:$0xff]  }
 0x435   :  { %7753 = vmatprep.subr.bf16.mxu1 %v8992_v2  ;;  %v9049_v0 = vld [vmem:[#allocation14 + $0x30] sm:$0xff]  }
 0x436   :  { %v9050_v2 = vld [vmem:[#allocation14 + $0xb0] sm:$0xff]  }
 0x437   :  { %7732 = vmatpush3.bf16.msra.mxu0 %v8993_v5  ;;  %v9051_v5 = vld [vmem:[#allocation14 + $0x78] sm:$0xff]  }
 0x438   :  { %7754 = vmatpush3.bf16.msra.mxu1 %v8994_v7  ;;  %7733 = vmatprep.subr.bf16.mxu0 %v8995_v8  ;;  %v9052_v7 = vld [vmem:[#allocation14 + $0xf8] sm:$0xff]  }
 0x439   :  { %7755 = vmatprep.subr.bf16.mxu1 %v8996_v29  ;;  %v9053_v8 = vld [vmem:[#allocation14 + $0x38] sm:$0xff]  }
 0x43a   :  { %v9054_v29 = vld [vmem:[#allocation14 + $0xb8] sm:$0xff]  }
 0x43b   :  { %7734 = vmatpush3.bf16.msra.mxu0 %v8997_v10  ;;  %v4879_v10 = vld [vmem:[#allocation13] sm:$0x1f] }
 0x43c   :  { %7756 = vmatpush3.bf16.msra.mxu1 %v8998_v37  ;;  %7735 = vmatprep.subr.bf16.mxu0 %v8999_v11  ;;  %v4884_v37 = vrot.slane %v4879_v10, %v9539_v61  ;;  %v4892_v11 = vrot.slane %v4879_v10, %v9551_v3 }
 0x43d   :  { %7757 = vmatprep.subr.bf16.mxu1 %v9000_v38  ;;  %v4888_v38 = vrot.slane %v4879_v10, %v9542_v62 }
 0x43f   :  { %7736 = vmatpush3.bf16.msra.mxu0 %v9001_v12  ;;  %v4896_v12 = vrot.slane %v4879_v10, %v9554_v4 }
 0x440   :  { %7758 = vmatpush3.bf16.msra.mxu1 %v9002_v50  ;;  %7737 = vmatprep.subr.bf16.mxu0 %v9003_v13 }
 0x441   :  { %7759 = vmatprep.subr.bf16.mxu1 %v9004_v14 }
 0x443   :  { %7738 = vmatpush3.bf16.msra.mxu0 %v9005_v15 }
 0x444   :  { %7760 = vmatpush3.bf16.msra.mxu1 %v9006_v16  ;;  %7739 = vmatprep.subr.bf16.mxu0 %v9007_v18 }
 0x445   :  { %7761 = vmatprep.subr.bf16.mxu1 %v9008_v20 }
 0x447   :  { %7740 = vmatpush3.bf16.msra.mxu0 %v9009_v22 }
 0x448   :  { %7762 = vmatpush3.bf16.msra.mxu1 %v9010_v23  ;;  %7741 = vmatprep.subr.bf16.mxu0 %v9011_v17 }
 0x449   :  { %7763 = vmatprep.subr.bf16.mxu1 %v9012_v6 }
 0x44b   :  { %7742 = vmatpush3.bf16.msra.mxu0 %v9013_v26 }
 0x44c   :  { %7764 = vmatpush3.bf16.msra.mxu1 %v9014_v34  ;;  %7859 = vmatprep.subr.bf16.mxu0 %v9311_v1 }
 0x44d   :  { %7780 = vmatprep.subr.bf16.mxu1 %v9023_v27 }
 0x44e   :  { %6237 = vmatmul.mubr.bf16.vlgmr.msra.gmra.mrb[32].mxu0 %v9618_v33  ;;  %v9033_v33 = vld [vmem:[#allocation14 + $0x10] sm:$0xff]  }
 0x44f   :  { %6278 = vmatmul.mubr.bf16.vlgmr.msra.gmra.mrb[28].mxu1 %v9620_v35  ;;  %7860 = vmatpush3.bf16.msra.mxu0 %v9015_v57  ;;  %v9018_v35 = vld [vmem:[#allocation11 + $0x588] ss:$20 sps:$4 sm:$0xff]  }
 0x450   :  { %7861 = vmatprep.subr.bf16.mxu0 %v9311_v1  ;;  %7875 = vmatprep.mubr.msk.bf16.mxu0 %vm9312_vm1, %v9311_v1 }
 0x451   :  { %7781 = vmatpush3.bf16.msra.mxu1 %v9025_v28 }
 0x452   :  { %7782 = vmatprep.subr.bf16.mxu1 %v9027_v25 }
 0x453   :  { %7862 = vmatpush3.bf16.msra.mxu0 %v9016_v30 }
 0x454   :  { %7863 = vmatprep.subr.bf16.mxu0 %v9311_v1 }
 0x455   :  { %7783 = vmatpush3.bf16.msra.mxu1 %v9029_v51 }
 0x456   :  { %7784 = vmatprep.subr.bf16.mxu1 %v9031_v59 }
 0x457   :  { %7864 = vmatpush3.bf16.msra.mxu0 %v9017_v31 }
 0x458   :  { %7865 = vmatprep.subr.bf16.mxu0 %v9311_v1 }
 0x459   :  { %7785 = vmatpush3.bf16.msra.mxu1 %v9033_v33 }
 0x45a   :  { %7786 = vmatprep.subr.bf16.mxu1 %v9035_v32 }
 0x45b   :  { %7866 = vmatpush3.bf16.msra.mxu0 %v9018_v35 }
 0x45c   :  { %7867 = vmatprep.subr.bf16.mxu0 %v9311_v1 }
 0x45d   :  { %7787 = vmatpush3.bf16.msra.mxu1 %v9037_v39  ;;  %v9055_v39 = vld [vmem:[#allocation14 + $0x100] sm:$0xff]  }
 0x45e   :  { %7788 = vmatprep.subr.bf16.mxu1 %v9039_v45  ;;  %v9056_v45 = vld [vmem:[#allocation14 + $0x108] sm:$0xff]  }
 0x45f   :  { %7868 = vmatpush3.bf16.msra.mxu0 %v9019_v41  ;;  %v9057_v41 = vld [vmem:[#allocation14 + $0x110] sm:$0xff]  }
 0x460   :  { %7869 = vmatprep.subr.bf16.mxu0 %v9311_v1 }
 0x461   :  { %7789 = vmatpush3.bf16.msra.mxu1 %v9041_v63  ;;  %v9058_v63 = vld [vmem:[#allocation14 + $0x118] sm:$0xff]  }
 0x462   :  { %7790 = vmatprep.subr.bf16.mxu1 %v9043_v42  ;;  %v9059_v42 = vld [vmem:[#allocation14 + $0x120] sm:$0xff]  }
 0x463   :  { %7870 = vmatpush3.bf16.msra.mxu0 %v9020_v43  ;;  %v9060_v43 = vld [vmem:[#allocation14 + $0x128] sm:$0xff]  }
 0x464   :  { %7871 = vmatprep.subr.bf16.mxu0 %v9311_v1 }
 0x465   :  { %7791 = vmatpush3.bf16.msra.mxu1 %v9045_v58 }
 0x466   :  { %7792 = vmatprep.subr.bf16.mxu1 %v9047_v40 }
 0x467   :  { %7872 = vmatpush3.bf16.msra.mxu0 %v9021_v9 }
 0x468   :  { %7873 = vmatprep.subr.bf16.mxu0 %v9311_v1 }
 0x469   :  { %7793 = vmatpush3.bf16.msra.mxu1 %v9049_v0 }
 0x46a   :  { %7794 = vmatprep.subr.bf16.mxu1 %v9051_v5 }
 0x46b   :  { %7874 = vmatpush3.bf16.msra.mxu0 %v9022_v46  ;;  %v4900_v46 = vrot.slane %v4879_v10, %v9575_v53 }
 0x46c   :  { %7802 = vmatprep.subr.bf16.mxu0 %v9024_v47  ;;  %v9061_v47 = vld [vmem:[#allocation14 + $0x130] sm:$0xff]  }
 0x46d   :  { %7795 = vmatpush3.bf16.msra.mxu1 %v9053_v8 }
 0x46e   :  { %7876 = vmatmul.mubr.bf16.vlgmr.msra.gmra.mrb[36].mxu0 %v9634_v19  ;;  %v9046_v19 = vld [vmem:[#allocation14 + $0xa8] sm:$0xff]   ;;  %7879 = vmatprep.subr.bf16.mxu1 %v9311_v1 }
 0x46f   :  { %7803 = vmatpush3.bf16.msra.mxu0 %v9026_v44 }
 0x470   :  { %7804 = vmatprep.subr.bf16.mxu0 %v9028_v24 }
 0x473   :  { %7805 = vmatpush3.bf16.msra.mxu0 %v9030_v49 }
 0x474   :  { %7806 = vmatprep.subr.bf16.mxu0 %v9032_v52 }
 0x477   :  { %7807 = vmatpush3.bf16.msra.mxu0 %v9034_v54 }
 0x478   :  { %7808 = vmatprep.subr.bf16.mxu0 %v9036_v55 }
 0x47b   :  { %7809 = vmatpush3.bf16.msra.mxu0 %v9038_v56 }
 0x47c   :  { %7810 = vmatprep.subr.bf16.mxu0 %v9040_v21 }
 0x47f   :  { %7811 = vmatpush3.bf16.msra.mxu0 %v9042_v36 }
 0x480   :  { %7812 = vmatprep.subr.bf16.mxu0 %v9044_v48 }
 0x483   :  { %7813 = vmatpush3.bf16.msra.mxu0 %v9046_v19  ;;  %v9062_v19 = vld [vmem:[#allocation14 + $0x138] sm:$0xff]  }
 0x484   :  { %7814 = vmatprep.subr.bf16.mxu0 %v9048_v60 }
 0x487   :  { %7815 = vmatpush3.bf16.msra.mxu0 %v9050_v2 }
 0x488   :  { %7816 = vmatprep.subr.bf16.mxu0 %v9052_v7 }
 0x48b   :  { %7817 = vmatpush3.bf16.msra.mxu0 %v9054_v29 }
 0x501   :  { %v6066_v50 = vpop.f32.mrb[28].mxu0  ;;  %v6195_v13 = vpop.f32.mrb[24].mxu1 }
 0x502   :  { %v7919_v14 = vadd.f32 %v6066_v50, %v4884_v37  ;;  %v7923_v15 = vadd.f32 %v6195_v13, %v4892_v11  ;;  %v6068_v16 = vpop.f32.mrb[29].mxu0  ;;  %v6197_v18 = vpop.f32.mrb[25].mxu1  ;;  %v7543_v13 = vld [vmem:[#allocation16] ss:$0 sm:$0xff] }
 0x503   :  { %v7920_v20 = vadd.f32 %v6068_v16, %v4888_v38  ;;  %v7924_v22 = vadd.f32 %v6197_v18, %v4896_v12  ;;  %v6070_v23 = vpop.f32.mrb[30].mxu0  ;;  %v6199_v17 = vpop.f32.mrb[26].mxu1 }
 0x504   :  { %v7921_v6 = vadd.f32 %v6070_v23, %v4884_v37  ;;  %v7925_v26 = vadd.f32 %v6199_v17, %v4892_v11  ;;  %v6072_v34 = vpop.f32.mrb[31].mxu0  ;;  %v6201_v61 = vpop.f32.mrb[27].mxu1  ;;  %v6327_v57 = vmax.f32 %v7919_v14, 0.0  ;;  %v6329_v62 = vmax.f32 %v7923_v15, 0.0 }
 0x505   :  { %v7922_v27 = vadd.f32 %v6072_v34, %v4888_v38  ;;  %v7926_v3 = vadd.f32 %v6201_v61, %v4896_v12  ;;  %v6328_v25 = vmax.f32 %v7920_v20, 0.0  ;;  %v6330_v30 = vmax.f32 %v7924_v22, 0.0 }
 0x506   :  { %v6332_v28 = vmax.f32 %v7921_v6, 0.0  ;;  %v6334_v4 = vmax.f32 %v7925_v26, 0.0 }
 0x507   :  { %v6333_v51 = vmax.f32 %v7922_v27, 0.0  ;;  %v6335_v59 = vmax.f32 %v7926_v3, 0.0 }
 0x508   :  { %v6337_v31 = vpack.c.bf16 %v6332_v28, %v6327_v57  ;;  %v6339_v33 = vpack.c.bf16 %v6334_v4, %v6329_v62 }
 0x509   :  { %v6338_v32 = vpack.c.bf16 %v6333_v51, %v6328_v25  ;;  %v6340_v35 = vpack.c.bf16 %v6335_v59, %v6330_v30 }
 0x50b   :  { %6701 = vmatprep.mubr.bf16.mxu1 %v6338_v32  ;;  %6742 = vmatprep.mubr.bf16.mxu0 %v6340_v35 }
 0x50c   :  { %6702 = vmatmul.mubr.bf16.vlgmr.msra.gmra.mrb[32].mxu1 %v6337_v31  ;;  %6743 = vmatmul.mubr.bf16.vlgmr.msra.gmra.mrb[40].mxu0 %v6339_v33 }
 0x50d   :  { %7880 = vmatpush3.bf16.msra.mxu1 %v9055_v39  ;;  %7895 = vmatprep.mubr.msk.bf16.mxu1 %vm9312_vm1, %v9311_v1 }
 0x50e   :  { %7881 = vmatprep.subr.bf16.mxu1 %v9311_v1 }
 0x511   :  { %7882 = vmatpush3.bf16.msra.mxu1 %v9056_v45 }
 0x512   :  { %7883 = vmatprep.subr.bf16.mxu1 %v9311_v1 }
 0x515   :  { %7884 = vmatpush3.bf16.msra.mxu1 %v9057_v41 }
 0x516   :  { %7885 = vmatprep.subr.bf16.mxu1 %v9311_v1 }
 0x519   :  { %7886 = vmatpush3.bf16.msra.mxu1 %v9058_v63 }
 0x51a   :  { %7887 = vmatprep.subr.bf16.mxu1 %v9311_v1 }
 0x51d   :  { %7888 = vmatpush3.bf16.msra.mxu1 %v9059_v42 }
 0x51e   :  { %7889 = vmatprep.subr.bf16.mxu1 %v9311_v1 }
 0x521   :  { %v7743_v9 = vpop.f32.mrb[32].mxu0  ;;  %7890 = vmatpush3.bf16.msra.mxu1 %v9060_v43 }
 0x522   :  { %v7765_v44 = vpop.f32.mrb[28].mxu1  ;;  %v7744_v24 = vpop.f32.mrb[33].mxu0  ;;  %7891 = vmatprep.subr.bf16.mxu1 %v9311_v1 }
 0x523   :  { %v7745_v49 = vadd.f32 %v7744_v24, %v7743_v9  ;;  %v7766_v52 = vpop.f32.mrb[29].mxu1  ;;  %v7746_v54 = vpop.f32.mrb[34].mxu0 }
 0x524   :  { %v7767_v55 = vadd.f32 %v7766_v52, %v7765_v44  ;;  %v7768_v56 = vpop.f32.mrb[30].mxu1  ;;  %v7747_v21 = vpop.f32.mrb[35].mxu0 }
 0x525   :  { %v6239_v36 = vadd.f32 %v7745_v49, %v4900_v46  ;;  %v7748_v48 = vadd.f32 %v7747_v21, %v7746_v54  ;;  %v7769_v58 = vpop.f32.mrb[31].mxu1  ;;  %7892 = vmatpush3.bf16.msra.mxu1 %v9061_v47 }
 0x526   :  { %v7770_v40 = vadd.f32 %v7769_v58, %v7768_v56  ;;  %7893 = vmatprep.subr.bf16.mxu1 %v9311_v1 }
 0x527   :  { %v6242_v53 = vadd.f32 %v7748_v48, %v4900_v46  ;;  %v6280_v60 = vadd.f32 %v7767_v55, %v6239_v36 }
 0x529   :  { %v6283_v0 = vadd.f32 %v7770_v40, %v6242_v53  ;;  %7894 = vmatpush3.bf16.msra.mxu1 %v9062_v19 }
 0x541   :  { %v6320_v2 = vpop.f32.mrb[36].mxu0 }
 0x542   :  { %v6321_v5 = vadd.f32 %v6320_v2, %v6280_v60  ;;  %v7877_v7 = vpop.f32.mrb[37].mxu0 }
 0x543   :  { %v6323_v8 = vpop.f32.mrb[38].mxu0 }
 0x544   :  { %v6324_v29 = vadd.f32 %v6323_v8, %v6283_v0  ;;  %v7878_v10 = vpop.f32.mrb[39].mxu0  ;;  %v6331_v37 = vmax.f32 %v6321_v5, 0.0 }
 0x546   :  { %v6336_v11 = vmax.f32 %v6324_v29, 0.0 }
 0x548   :  { %v6341_v38 = vpack.c.bf16 %v6336_v11, %v6331_v37 }
 0x54a   :  { %7896 = vmatmul.mubr.bf16.vlgmr.msra.gmra.mrb[36].mxu1 %v6341_v38 }
 0x5df   :  { %v7796_v12 = vpop.f32.mrb[32].mxu1  ;;  %v7818_v50 = vpop.f32.mrb[40].mxu0 }
 0x5e0   :  { %v7797_v14 = vpop.f32.mrb[33].mxu1  ;;  %v7819_v15 = vpop.f32.mrb[41].mxu0 }
 0x5e1   :  { %v7798_v1 = vadd.f32 %v7797_v14, %v7796_v12  ;;  %v7820_v16 = vadd.f32 %v7819_v15, %v7818_v50  ;;  %v7799_v18 = vpop.f32.mrb[34].mxu1  ;;  %v7821_v20 = vpop.f32.mrb[42].mxu0 }
 0x5e2   :  { %v7800_v22 = vpop.f32.mrb[35].mxu1  ;;  %v7822_v23 = vpop.f32.mrb[43].mxu0 }
 0x5e3   :  { %v6704_v17 = vadd.f32 %v7798_v1, %v7543_v13  ;;  %v7801_v6 = vadd.f32 %v7800_v22, %v7799_v18  ;;  %v7823_v26 = vadd.f32 %v7822_v23, %v7821_v20 }
 0x5e5   :  { %v6707_v34 = vadd.f32 %v7801_v6, %v7543_v13  ;;  %v6745_v61 = vadd.f32 %v7820_v16, %v6704_v17 }
 0x5e7   :  { %v6748_v27 = vadd.f32 %v7823_v26, %v6707_v34 }
 0x61d   :  { %v6785_v3 = vpop.f32.mrb[36].mxu1 }
 0x61e   :  { %v6786_v57 = vadd.f32 %v6785_v3, %v6745_v61  ;;  %v7897_v62 = vpop.f32.mrb[37].mxu1 }
 0x61f   :  { %v6788_v28 = vpop.f32.mrb[38].mxu1 }
 0x620   :  { %6792 = vst [vmem:[#allocation17] sm:$0xff] %v6786_v57  ;;  %v6789_v4 = vadd.f32 %v6788_v28, %v6748_v27  ;;  %v7898_v25 = vpop.f32.mrb[39].mxu1 }
 0x622   :  { %6793 = vst [vmem:[#allocation17 + $0x8] sm:$0xff] %v6789_v4 }
 0x623   :  { %9272 = shalt.err (!%p9269_p6)
}
 0x624   :  { %s9273_s30 = scalar_lea.hbm %s9693_s9, 256 }
 0x625   :  { %p9274_p7 = scmp.ne.s32.totalorder %s9693_s9, %s9273_s30  ;;  %p9277_p8 = scmp.lt.u32.totalorder %s9273_s30, %s9693_s9 }
 0x627   :  { %p9279_p9 = pnand %p9277_p8, %p9274_p7 }
 0x629   :  { %9282 = shalt.err (!%p9279_p9)
}
 0x62a   :  { %s9314_s14 = smov 128   ;;  %s9315_s5 = smov 8  }
 0x62b   :  { %6805 = dma.vmem_to_hbm [thread:$0]  %s6800_s27, 256, %s9693_s9, [#allocation4], %s9314_s14, %s9314_s14, %s9315_s5  }
 0x62c   :  { %9293 = dma.done.wait [#allocation4], 256  }
 0x62d   :  { %9294 = vsyncadd [#allocation4], 4294967040 }
 0x62e   :  { %6809 = vsyncpa [#allocation3], 1 }
 0x62f   :  { %6810 = vsyncpa [#allocation6], 1 }
 0x630   :  { %6811 = vsyncpa [#allocation9], 1 }
 0x631   :  { %6812 = vsyncpa [#allocation12], 1 }
 0x632   :  { %6813 = vsyncpa [#allocation15], 1 }
 0x633   :  { %6814 = vsyncpa [#allocation4], 1 }

</bundles_post_ra>
